<compile_context>
chip_gen: v5e
topology: v5e:2x2
jax: 0.10.0
libtpu: 0.0.40
codegen_flags: <defaults>
</compile_context>

<pallas_src>
import functools

import jax
import jax.numpy as jnp
from jax import lax
from jax.experimental import pallas as pl
from jax.experimental.pallas import tpu as pltpu

EPS = 1e-5  # PyTorch BatchNorm3d default eps


# ---------------------------------------------------------------------------
# In-kernel helpers
# ---------------------------------------------------------------------------
def _gather_patch(scr, d, Ho, Wo):
    """Gather the (Ho*Wo, 27*C) im2col patch for output depth `d` from a
    zero-padded (Do+2, Ho+2, Wo+2, C) VMEM scratch.

    Only the leading (depth) index is dynamic; every slice is 2-D with static
    offsets, lane-axis concats build the K dimension and a sublane concat
    stacks the Ho rows -> safe Mosaic lowering, no HBM traffic."""
    rows = []
    for ho in range(Ho):
        cols = []
        for kd in range(3):
            for kh in range(3):
                r = scr[d + kd, ho + kh]               # (Wo+2, C)
                for kw in range(3):
                    cols.append(r[kw:kw + Wo, :])      # (Wo, C)
        # column order: (kd, kh, kw) major, channel minor  (matches _w_to_mat)
        rows.append(jnp.concatenate(cols, axis=-1))    # (Wo, 27*C)
    return jnp.concatenate(rows, axis=0)               # (Ho*Wo, 27*C)


def _gather_center(scr, d, Ho, Wo):
    """Un-padded (Ho*Wo, C) plane at output depth `d` from the padded scratch
    (used for the residual-skip path)."""
    rows = [scr[d + 1, 1 + ho, 1:1 + Wo, :] for ho in range(Ho)]
    return jnp.concatenate(rows, axis=0)               # (Ho*Wo, C)


def _conv1_plane(scr_x, scr_h, w_ref, s_ref, b_ref, d, Ho, Wo):
    """relu(bn1(conv1(pooled)))) for output depth `d`, written into the padded
    h1 scratch at depth d+1 (stays in VMEM, never touches HBM)."""
    patch = _gather_patch(scr_x, d, Ho, Wo).astype(jnp.bfloat16)  # (Ho*Wo, 27*Cin)
    acc = jnp.dot(patch, w_ref[...], preferred_element_type=jnp.float32)
    y = jnp.maximum(acc * s_ref[...] + b_ref[...], 0.0)           # bn1 + relu
    for ho in range(Ho):
        scr_h[d + 1, 1 + ho, 1:1 + Wo, :] = y[ho * Wo:(ho + 1) * Wo, :]


# ---------------------------------------------------------------------------
# Fused Down kernel: pool + conv1 + bn1 + relu + conv2 + bn2 + skip + relu
# ---------------------------------------------------------------------------
def _down_kernel(*refs, Do, Ho, Wo, Cin, skip_conv):
    if skip_conv:
        (x_ref, w1_ref, s1_ref, b1_ref, w2_ref, s2_ref, b2_ref,
         ws_ref, bs_ref, o_ref, scr_x, scr_h) = refs
    else:
        (x_ref, w1_ref, s1_ref, b1_ref, w2_ref, s2_ref, b2_ref,
         o_ref, scr_x, scr_h) = refs
    do = pl.program_id(1)

    # Once per batch element: fused 2x2x2 max-pool of the resident input volume
    # into a zero-padded scratch (border zeros = conv padding=1), zero the h1
    # scratch, and prime the depth pipeline with h1 plane 0.
    @pl.when(do == 0)
    def _():
        xv = x_ref[0].astype(jnp.float32)               # (D, H, Wo, 2*Cin)
        v = xv.reshape(Do, 2, Ho, 2, Wo, 2 * Cin)       # leading-dims-only reshape
        m = jnp.maximum(jnp.maximum(v[:, 0, :, 0], v[:, 0, :, 1]),
                        jnp.maximum(v[:, 1, :, 0], v[:, 1, :, 1]))
        pooled = jnp.maximum(m[..., :Cin], m[..., Cin:])   # (Do, Ho, Wo, Cin)
        scr_x[...] = jnp.zeros_like(scr_x)
        scr_x[1:1 + Do, 1:1 + Ho, 1:1 + Wo, :] = pooled
        scr_h[...] = jnp.zeros_like(scr_h)
        _conv1_plane(scr_x, scr_h, w1_ref, s1_ref, b1_ref, 0, Ho, Wo)

    # Depth-skewed pipeline: produce h1 plane do+1 so conv2 at plane do can
    # read h1 planes do-1..do+1 from VMEM.
    @pl.when(do + 1 < Do)
    def _():
        _conv1_plane(scr_x, scr_h, w1_ref, s1_ref, b1_ref, do + 1, Ho, Wo)

    # conv2 + bn2 + skip + relu for output plane `do`.
    patch = _gather_patch(scr_h, do, Ho, Wo).astype(jnp.bfloat16)  # (Ho*Wo, 27*Cmid)
    acc = jnp.dot(patch, w2_ref[...], preferred_element_type=jnp.float32)
    y = acc * s2_ref[...] + b2_ref[...]                            # bn2

    xp = _gather_center(scr_x, do, Ho, Wo)                         # (Ho*Wo, Cin) f32
    if skip_conv:
        ident = jnp.dot(xp.astype(jnp.bfloat16), ws_ref[...],
                        preferred_element_type=jnp.float32) + bs_ref[...]
    else:  # identity skip: plain add, no eye-matmul
        ident = xp
    y = jnp.maximum(y + ident, 0.0)                                # (Ho*Wo, Cout)

    # Lane-dense store: spatial on lanes, channels on sublanes.
    o_ref[0, 0] = y.T                                              # (Cout, Ho*Wo)


# ---------------------------------------------------------------------------
# pallas_call wrapper
# ---------------------------------------------------------------------------
def down_pallas(x_pairs, w1, s1, b1, w2, s2, b2, ws=None, bs=None):
    N, D, H, Wo, C2 = x_pairs.shape
    Cin = C2 // 2
    Do, Ho = D // 2, H // 2
    Cout = w1.shape[1]
    skip_conv = ws is not None
    kernel = functools.partial(_down_kernel, Do=Do, Ho=Ho, Wo=Wo, Cin=Cin,
                               skip_conv=skip_conv)

    in_specs = [
        # per-batch input volume, resident across the depth grid axis
        pl.BlockSpec((1, D, H, Wo, C2), lambda n, d: (n, 0, 0, 0, 0)),
        pl.BlockSpec((27 * Cin, Cout), lambda n, d: (0, 0)),
        pl.BlockSpec((1, Cout), lambda n, d: (0, 0)),
        pl.BlockSpec((1, Cout), lambda n, d: (0, 0)),
        pl.BlockSpec((27 * Cout, Cout), lambda n, d: (0, 0)),
        pl.BlockSpec((1, Cout), lambda n, d: (0, 0)),
        pl.BlockSpec((1, Cout), lambda n, d: (0, 0)),
    ]
    args = [x_pairs, w1, s1, b1, w2, s2, b2]
    if skip_conv:
        in_specs += [pl.BlockSpec((Cin, Cout), lambda n, d: (0, 0)),
                     pl.BlockSpec((1, Cout), lambda n, d: (0, 0))]
        args += [ws, bs]

    return pl.pallas_call(
        kernel,
        out_shape=jax.ShapeDtypeStruct((N, Do, Cout, Ho * Wo), jnp.float32),
        grid=(N, Do),
        in_specs=in_specs,
        out_specs=pl.BlockSpec((1, 1, Cout, Ho * Wo), lambda n, d: (n, d, 0, 0)),
        scratch_shapes=[
            pltpu.VMEM((Do + 2, Ho + 2, Wo + 2, Cin), jnp.float32),   # padded pooled x
            pltpu.VMEM((Do + 2, Ho + 2, Wo + 2, Cout), jnp.float32),  # padded h1
        ],
        compiler_params=pltpu.CompilerParams(
            dimension_semantics=("parallel", "arbitrary"),
            vmem_limit_bytes=32 * 1024 * 1024),
    )(*args)


# ---------------------------------------------------------------------------
# Parameter / layout glue (no HBM compute beyond transposes & casts)
# ---------------------------------------------------------------------------
def _w_to_mat(w):
    # PyTorch Conv3d weight (O, I, kd, kh, kw) -> (27*I, O); row order
    # (kd, kh, kw, ci) matches _gather_patch's column order.
    O, I = w.shape[0], w.shape[1]
    return jnp.transpose(w, (2, 3, 4, 1, 0)).reshape(27 * I, O)


def _fold_bn(conv_bias, bn):
    # Inference-mode BatchNorm3d (+ conv bias) folded into scale / bias (f32).
    scale = bn['gamma'] / jnp.sqrt(bn['var'] + EPS)
    bias = (conv_bias - bn['mean']) * scale + bn['beta']
    return (scale.reshape(1, -1).astype(jnp.float32),
            bias.reshape(1, -1).astype(jnp.float32))


# ---------------------------------------------------------------------------
# Down.forward
# ---------------------------------------------------------------------------
def down_forward(x_ncdhw, params):
    x = jnp.transpose(x_ncdhw, (0, 2, 3, 4, 1))          # NCDHW -> NDHWC
    N, D, H, W, Cin = x.shape
    assert D % 2 == 0 and H % 2 == 0 and W % 2 == 0, "MaxPool3d(2) needs even dims"
    Do, Ho, Wo = D // 2, H // 2, W // 2
    Cout = params['w1'].shape[0]

    # Pair the W axis with channels (free reshape) so the fused 2x2x2 pool only
    # needs leading-dim reshapes + lane-half maxima; bf16 halves the input DMA.
    x_pairs = x.reshape(N, D, H, Wo, 2 * Cin).astype(jnp.bfloat16)

    w1 = _w_to_mat(params['w1']).astype(jnp.bfloat16)    # (27*Cin,  Cout)
    w2 = _w_to_mat(params['w2']).astype(jnp.bfloat16)    # (27*Cout, Cout)
    scale1, bias1 = _fold_bn(params['b1'], params['bn1'])
    scale2, bias2 = _fold_bn(params['b2'], params['bn2'])

    if Cin != Cout:
        ws = params['w_skip'].reshape(Cout, Cin).T.astype(jnp.bfloat16)
        bs = params['b_skip'].reshape(1, Cout).astype(jnp.float32)
        out = down_pallas(x_pairs, w1, scale1, bias1, w2, scale2, bias2, ws, bs)
    else:
        out = down_pallas(x_pairs, w1, scale1, bias1, w2, scale2, bias2)

    # (N, Do, Cout, Ho*Wo) -> NCDHW
    out = jnp.transpose(out, (0, 2, 1, 3)).reshape(N, Cout, Do, Ho, Wo)
    return out


# ---------------------------------------------------------------------------
# Pure-JAX f32 reference (verification only)
# ---------------------------------------------------------------------------
def reference_down(x_ncdhw, params):
    x = jnp.transpose(x_ncdhw, (0, 2, 3, 4, 1)).astype(jnp.float32)
    Cin = x.shape[-1]
    Cout = params['w1'].shape[0]
    xp = lax.reduce_window(x, -jnp.inf, lax.max,
                           (1, 2, 2, 2, 1), (1, 2, 2, 2, 1), 'VALID')

    def conv3(h, w, b):
        wd = jnp.transpose(w, (2, 3, 4, 1, 0))  # DHWIO
        y = lax.conv_general_dilated(
            h, wd, (1, 1, 1), ((1, 1), (1, 1), (1, 1)),
            dimension_numbers=('NDHWC', 'DHWIO', 'NDHWC'),
            precision=lax.Precision.HIGHEST)
        return y + b

    def bn(y, p):
        return (y - p['mean']) / jnp.sqrt(p['var'] + EPS) * p['gamma'] + p['beta']

    h = jax.nn.relu(bn(conv3(xp, params['w1'], params['b1']), params['bn1']))
    h = bn(conv3(h, params['w2'], params['b2']), params['bn2'])
    if Cin != Cout:
        ident = jnp.einsum('ndhwi,io->ndhwo', xp,
                           params['w_skip'].reshape(Cout, Cin).T,
                           precision=lax.Precision.HIGHEST) + params['b_skip']
    else:
        ident = xp
    out = jax.nn.relu(h + ident)
    return jnp.transpose(out, (0, 4, 1, 2, 3))


# ---------------------------------------------------------------------------
# Deterministic parameter init (shapes from Down(in_ch, out_ch).__init__)
# ---------------------------------------------------------------------------
def init_params(key, in_ch, out_ch):
    ks = jax.random.split(key, 8)

    def bn_params(k):
        k1, k2, k3, k4 = jax.random.split(k, 4)
        return {
            'gamma': 1.0 + 0.1 * jax.random.normal(k1, (out_ch,), jnp.float32),
            'beta': 0.1 * jax.random.normal(k2, (out_ch,), jnp.float32),
            'mean': 0.1 * jax.random.normal(k3, (out_ch,), jnp.float32),
            'var': 0.5 + jnp.abs(jax.random.normal(k4, (out_ch,), jnp.float32)),
        }

    params = {
        'w1': 0.1 * jax.random.normal(ks[0], (out_ch, in_ch, 3, 3, 3), jnp.float32),
        'b1': 0.1 * jax.random.normal(ks[1], (out_ch,), jnp.float32),
        'bn1': bn_params(ks[2]),
        'w2': 0.1 * jax.random.normal(ks[3], (out_ch, out_ch, 3, 3, 3), jnp.float32),
        'b2': 0.1 * jax.random.normal(ks[4], (out_ch,), jnp.float32),
        'bn2': bn_params(ks[5]),
    }
    if in_ch != out_ch:
        params['w_skip'] = 0.1 * jax.random.normal(
            ks[6], (out_ch, in_ch, 1, 1, 1), jnp.float32)
        params['b_skip'] = 0.1 * jax.random.normal(ks[7], (out_ch,), jnp.float32)
    return params


if __name__ == "__main__":
    key = jax.random.PRNGKey(0)
    in_ch, out_ch = 4, 8
    params = init_params(key, in_ch, out_ch)

    kx = jax.random.fold_in(key, 123)
    x = jax.random.normal(kx, (2, in_ch, 8, 8, 8), jnp.float32)   # NCDHW

    # Both paths consume the same bf16-quantized inputs so the check isolates
    # kernel logic; the kernel additionally keeps intermediate activations in
    # bf16 on the MXU (f32 accumulation), bounding the deviation from the f32
    # reference at a few 1e-2 for these magnitudes -> tolerance 1e-1.
    def q(a):
        return a.astype(jnp.bfloat16).astype(jnp.float32)

    params_q = {k: (q(v) if k in ('w1', 'w2', 'w_skip') else v)
                for k, v in params.items()}
    x_q = q(x)

    fwd = jax.jit(down_forward)
    out = jax.block_until_ready(fwd(x_q, params_q))
    ref = jax.block_until_ready(jax.jit(reference_down)(x_q, params_q))

    assert out.shape == (2, out_ch, 4, 4, 4), out.shape
    if not bool(jnp.allclose(out, ref, rtol=1e-1, atol=1e-1)):
        raise AssertionError(
            f"mismatch, max abs diff = {float(jnp.max(jnp.abs(out - ref)))}")
    print("KERNEL_OK")
</pallas_src>

<mosaic_0001>
module attributes {stable_mosaic.version = 11 : i64} {
  func.func @_down_kernel(%arg0: i32, %arg1: i32, %arg2: memref<1x8x8x4x8xbf16, #tpu.memory_space<vmem>>, %arg3: memref<108x8xbf16, #tpu.memory_space<vmem>>, %arg4: memref<1x8xf32, #tpu.memory_space<vmem>>, %arg5: memref<1x8xf32, #tpu.memory_space<vmem>>, %arg6: memref<216x8xbf16, #tpu.memory_space<vmem>>, %arg7: memref<1x8xf32, #tpu.memory_space<vmem>>, %arg8: memref<1x8xf32, #tpu.memory_space<vmem>>, %arg9: memref<4x8xbf16, #tpu.memory_space<vmem>>, %arg10: memref<1x8xf32, #tpu.memory_space<vmem>>, %arg11: memref<1x1x8x16xf32, #tpu.memory_space<vmem>>, %arg12: memref<6x6x6x4xf32, #tpu.memory_space<vmem>>, %arg13: memref<6x6x6x8xf32, #tpu.memory_space<vmem>>) attributes {dimension_semantics = [#tpu.dimension_semantics<parallel>, #tpu.dimension_semantics<arbitrary>], iteration_bounds = array<i64: 2, 4>, scalar_prefetch = 0 : i64, scratch_operands = 2 : i64, tpu.core_type = #tpu.core_type<tc>, window_params = [{transform_indices = @transform_0, window_bounds = array<i64: 1, 8, 8, 4, 8>}, {pipeline_mode = #tpu.pipeline_mode<synchronous>, transform_indices = @transform_1, window_bounds = array<i64: 108, 8>}, {pipeline_mode = #tpu.pipeline_mode<synchronous>, transform_indices = @transform_2, window_bounds = array<i64: 1, 8>}, {pipeline_mode = #tpu.pipeline_mode<synchronous>, transform_indices = @transform_3, window_bounds = array<i64: 1, 8>}, {pipeline_mode = #tpu.pipeline_mode<synchronous>, transform_indices = @transform_4, window_bounds = array<i64: 216, 8>}, {pipeline_mode = #tpu.pipeline_mode<synchronous>, transform_indices = @transform_5, window_bounds = array<i64: 1, 8>}, {pipeline_mode = #tpu.pipeline_mode<synchronous>, transform_indices = @transform_6, window_bounds = array<i64: 1, 8>}, {pipeline_mode = #tpu.pipeline_mode<synchronous>, transform_indices = @transform_7, window_bounds = array<i64: 4, 8>}, {pipeline_mode = #tpu.pipeline_mode<synchronous>, transform_indices = @transform_8, window_bounds = array<i64: 1, 8>}, {transform_indices = @transform_9, window_bounds = array<i64: 1, 1, 8, 16>}]} {
    %c0_i32 = arith.constant 0 : i32
    %0 = arith.cmpi eq, %arg1, %c0_i32 : i32
    %1 = arith.extui %0 : i1 to i32
    %c0_i32_0 = arith.constant 0 : i32
    %2 = arith.cmpi ne, %1, %c0_i32_0 : i32
    scf.if %2 {
      %c0_171 = arith.constant 0 : index
      %c0_172 = arith.constant 0 : index
      %c0_173 = arith.constant 0 : index
      %c0_174 = arith.constant 0 : index
      %c0_175 = arith.constant 0 : index
      %311 = vector.load %arg2[%c0_171, %c0_172, %c0_173, %c0_174, %c0_175] : memref<1x8x8x4x8xbf16, #tpu.memory_space<vmem>>, vector<1x8x8x4x8xbf16>
      %312 = vector.shape_cast %311 : vector<1x8x8x4x8xbf16> to vector<8x8x4x8xbf16>
      %313 = arith.extf %312 : vector<8x8x4x8xbf16> to vector<8x8x4x8xf32>
      %314 = vector.shape_cast %313 : vector<8x8x4x8xf32> to vector<4x2x4x2x4x8xf32>
      %315 = vector.extract_strided_slice %314 {offsets = [0, 0, 0, 0, 0, 0], sizes = [4, 1, 4, 1, 4, 8], strides = [1, 1, 1, 1, 1, 1]} : vector<4x2x4x2x4x8xf32> to vector<4x1x4x1x4x8xf32>
      %316 = vector.shape_cast %315 : vector<4x1x4x1x4x8xf32> to vector<4x4x4x8xf32>
      %317 = vector.extract_strided_slice %314 {offsets = [0, 0, 0, 1, 0, 0], sizes = [4, 1, 4, 1, 4, 8], strides = [1, 1, 1, 1, 1, 1]} : vector<4x2x4x2x4x8xf32> to vector<4x1x4x1x4x8xf32>
      %318 = vector.shape_cast %317 : vector<4x1x4x1x4x8xf32> to vector<4x4x4x8xf32>
      %319 = arith.maximumf %316, %318 : vector<4x4x4x8xf32>
      %320 = vector.extract_strided_slice %314 {offsets = [0, 1, 0, 0, 0, 0], sizes = [4, 1, 4, 1, 4, 8], strides = [1, 1, 1, 1, 1, 1]} : vector<4x2x4x2x4x8xf32> to vector<4x1x4x1x4x8xf32>
      %321 = vector.shape_cast %320 : vector<4x1x4x1x4x8xf32> to vector<4x4x4x8xf32>
      %322 = vector.extract_strided_slice %314 {offsets = [0, 1, 0, 1, 0, 0], sizes = [4, 1, 4, 1, 4, 8], strides = [1, 1, 1, 1, 1, 1]} : vector<4x2x4x2x4x8xf32> to vector<4x1x4x1x4x8xf32>
      %323 = vector.shape_cast %322 : vector<4x1x4x1x4x8xf32> to vector<4x4x4x8xf32>
      %324 = arith.maximumf %321, %323 : vector<4x4x4x8xf32>
      %325 = arith.maximumf %319, %324 : vector<4x4x4x8xf32>
      %326 = vector.extract_strided_slice %325 {offsets = [0, 0, 0, 0], sizes = [4, 4, 4, 4], strides = [1, 1, 1, 1]} : vector<4x4x4x8xf32> to vector<4x4x4x4xf32>
      %327 = vector.extract_strided_slice %325 {offsets = [0, 0, 0, 4], sizes = [4, 4, 4, 4], strides = [1, 1, 1, 1]} : vector<4x4x4x8xf32> to vector<4x4x4x4xf32>
      %328 = arith.maximumf %326, %327 : vector<4x4x4x4xf32>
      %cst_176 = arith.constant 0.000000e+00 : f32
      %329 = vector.broadcast %cst_176 : f32 to vector<6x6x6x4xf32>
      %c0_177 = arith.constant 0 : index
      %c0_178 = arith.constant 0 : index
      %c0_179 = arith.constant 0 : index
      %c0_180 = arith.constant 0 : index
      %330 = vector.load %arg12[%c0_177, %c0_178, %c0_179, %c0_180] : memref<6x6x6x4xf32, #tpu.memory_space<vmem>>, vector<6x6x6x4xf32>
      tpu.vector_store %arg12[%c0_177, %c0_178, %c0_179, %c0_180], %329 {strides = array<i32>} : memref<6x6x6x4xf32, #tpu.memory_space<vmem>>, vector<6x6x6x4xf32>,
      %c1_181 = arith.constant 1 : index
      %c1_182 = arith.constant 1 : index
      %c1_183 = arith.constant 1 : index
      %c0_184 = arith.constant 0 : index
      %331 = vector.load %arg12[%c1_181, %c1_182, %c1_183, %c0_184] : memref<6x6x6x4xf32, #tpu.memory_space<vmem>>, vector<4x4x4x4xf32>
      tpu.vector_store %arg12[%c1_181, %c1_182, %c1_183, %c0_184], %328 {strides = array<i32>} : memref<6x6x6x4xf32, #tpu.memory_space<vmem>>, vector<4x4x4x4xf32>,
      %cst_185 = arith.constant 0.000000e+00 : f32
      %332 = vector.broadcast %cst_185 : f32 to vector<6x6x6x8xf32>
      %c0_186 = arith.constant 0 : index
      %c0_187 = arith.constant 0 : index
      %c0_188 = arith.constant 0 : index
      %c0_189 = arith.constant 0 : index
      %333 = vector.load %arg13[%c0_186, %c0_187, %c0_188, %c0_189] : memref<6x6x6x8xf32, #tpu.memory_space<vmem>>, vector<6x6x6x8xf32>
      tpu.vector_store %arg13[%c0_186, %c0_187, %c0_188, %c0_189], %332 {strides = array<i32>} : memref<6x6x6x8xf32, #tpu.memory_space<vmem>>, vector<6x6x6x8xf32>,
      %c0_190 = arith.constant 0 : index
      %c0_191 = arith.constant 0 : index
      %c0_192 = arith.constant 0 : index
      %c0_193 = arith.constant 0 : index
      %334 = vector.load %arg12[%c0_190, %c0_191, %c0_192, %c0_193] : memref<6x6x6x4xf32, #tpu.memory_space<vmem>>, vector<1x1x6x4xf32>
      %335 = vector.shape_cast %334 : vector<1x1x6x4xf32> to vector<6x4xf32>
      %336 = vector.extract_strided_slice %335 {offsets = [0, 0], sizes = [4, 4], strides = [1, 1]} : vector<6x4xf32> to vector<4x4xf32>
      %337 = vector.extract_strided_slice %335 {offsets = [1, 0], sizes = [4, 4], strides = [1, 1]} : vector<6x4xf32> to vector<4x4xf32>
      %338 = vector.extract_strided_slice %335 {offsets = [2, 0], sizes = [4, 4], strides = [1, 1]} : vector<6x4xf32> to vector<4x4xf32>
      %c0_194 = arith.constant 0 : index
      %c1_195 = arith.constant 1 : index
      %c0_196 = arith.constant 0 : index
      %c0_197 = arith.constant 0 : index
      %339 = vector.load %arg12[%c0_194, %c1_195, %c0_196, %c0_197] : memref<6x6x6x4xf32, #tpu.memory_space<vmem>>, vector<1x1x6x4xf32>
      %340 = vector.shape_cast %339 : vector<1x1x6x4xf32> to vector<6x4xf32>
      %341 = vector.extract_strided_slice %340 {offsets = [0, 0], sizes = [4, 4], strides = [1, 1]} : vector<6x4xf32> to vector<4x4xf32>
      %342 = vector.extract_strided_slice %340 {offsets = [1, 0], sizes = [4, 4], strides = [1, 1]} : vector<6x4xf32> to vector<4x4xf32>
      %343 = vector.extract_strided_slice %340 {offsets = [2, 0], sizes = [4, 4], strides = [1, 1]} : vector<6x4xf32> to vector<4x4xf32>
      %c0_198 = arith.constant 0 : index
      %c2_199 = arith.constant 2 : index
      %c0_200 = arith.constant 0 : index
      %c0_201 = arith.constant 0 : index
      %344 = vector.load %arg12[%c0_198, %c2_199, %c0_200, %c0_201] : memref<6x6x6x4xf32, #tpu.memory_space<vmem>>, vector<1x1x6x4xf32>
      %345 = vector.shape_cast %344 : vector<1x1x6x4xf32> to vector<6x4xf32>
      %346 = vector.extract_strided_slice %345 {offsets = [0, 0], sizes = [4, 4], strides = [1, 1]} : vector<6x4xf32> to vector<4x4xf32>
      %347 = vector.extract_strided_slice %345 {offsets = [1, 0], sizes = [4, 4], strides = [1, 1]} : vector<6x4xf32> to vector<4x4xf32>
      %348 = vector.extract_strided_slice %345 {offsets = [2, 0], sizes = [4, 4], strides = [1, 1]} : vector<6x4xf32> to vector<4x4xf32>
      %c1_202 = arith.constant 1 : index
      %c0_203 = arith.constant 0 : index
      %c0_204 = arith.constant 0 : index
      %c0_205 = arith.constant 0 : index
      %349 = vector.load %arg12[%c1_202, %c0_203, %c0_204, %c0_205] : memref<6x6x6x4xf32, #tpu.memory_space<vmem>>, vector<1x1x6x4xf32>
      %350 = vector.shape_cast %349 : vector<1x1x6x4xf32> to vector<6x4xf32>
      %351 = vector.extract_strided_slice %350 {offsets = [0, 0], sizes = [4, 4], strides = [1, 1]} : vector<6x4xf32> to vector<4x4xf32>
      %352 = vector.extract_strided_slice %350 {offsets = [1, 0], sizes = [4, 4], strides = [1, 1]} : vector<6x4xf32> to vector<4x4xf32>
      %353 = vector.extract_strided_slice %350 {offsets = [2, 0], sizes = [4, 4], strides = [1, 1]} : vector<6x4xf32> to vector<4x4xf32>
      %c1_206 = arith.constant 1 : index
      %c1_207 = arith.constant 1 : index
      %c0_208 = arith.constant 0 : index
      %c0_209 = arith.constant 0 : index
      %354 = vector.load %arg12[%c1_206, %c1_207, %c0_208, %c0_209] : memref<6x6x6x4xf32, #tpu.memory_space<vmem>>, vector<1x1x6x4xf32>
      %355 = vector.shape_cast %354 : vector<1x1x6x4xf32> to vector<6x4xf32>
      %356 = vector.extract_strided_slice %355 {offsets = [0, 0], sizes = [4, 4], strides = [1, 1]} : vector<6x4xf32> to vector<4x4xf32>
      %357 = vector.extract_strided_slice %355 {offsets = [1, 0], sizes = [4, 4], strides = [1, 1]} : vector<6x4xf32> to vector<4x4xf32>
      %358 = vector.extract_strided_slice %355 {offsets = [2, 0], sizes = [4, 4], strides = [1, 1]} : vector<6x4xf32> to vector<4x4xf32>
      %c1_210 = arith.constant 1 : index
      %c2_211 = arith.constant 2 : index
      %c0_212 = arith.constant 0 : index
      %c0_213 = arith.constant 0 : index
      %359 = vector.load %arg12[%c1_210, %c2_211, %c0_212, %c0_213] : memref<6x6x6x4xf32, #tpu.memory_space<vmem>>, vector<1x1x6x4xf32>
      %360 = vector.shape_cast %359 : vector<1x1x6x4xf32> to vector<6x4xf32>
      %361 = vector.extract_strided_slice %360 {offsets = [0, 0], sizes = [4, 4], strides = [1, 1]} : vector<6x4xf32> to vector<4x4xf32>
      %362 = vector.extract_strided_slice %360 {offsets = [1, 0], sizes = [4, 4], strides = [1, 1]} : vector<6x4xf32> to vector<4x4xf32>
      %363 = vector.extract_strided_slice %360 {offsets = [2, 0], sizes = [4, 4], strides = [1, 1]} : vector<6x4xf32> to vector<4x4xf32>
      %c2_214 = arith.constant 2 : index
      %c0_215 = arith.constant 0 : index
      %c0_216 = arith.constant 0 : index
      %c0_217 = arith.constant 0 : index
      %364 = vector.load %arg12[%c2_214, %c0_215, %c0_216, %c0_217] : memref<6x6x6x4xf32, #tpu.memory_space<vmem>>, vector<1x1x6x4xf32>
      %365 = vector.shape_cast %364 : vector<1x1x6x4xf32> to vector<6x4xf32>
      %366 = vector.extract_strided_slice %365 {offsets = [0, 0], sizes = [4, 4], strides = [1, 1]} : vector<6x4xf32> to vector<4x4xf32>
      %367 = vector.extract_strided_slice %365 {offsets = [1, 0], sizes = [4, 4], strides = [1, 1]} : vector<6x4xf32> to vector<4x4xf32>
      %368 = vector.extract_strided_slice %365 {offsets = [2, 0], sizes = [4, 4], strides = [1, 1]} : vector<6x4xf32> to vector<4x4xf32>
      %c2_218 = arith.constant 2 : index
      %c1_219 = arith.constant 1 : index
      %c0_220 = arith.constant 0 : index
      %c0_221 = arith.constant 0 : index
      %369 = vector.load %arg12[%c2_218, %c1_219, %c0_220, %c0_221] : memref<6x6x6x4xf32, #tpu.memory_space<vmem>>, vector<1x1x6x4xf32>
      %370 = vector.shape_cast %369 : vector<1x1x6x4xf32> to vector<6x4xf32>
      %371 = vector.extract_strided_slice %370 {offsets = [0, 0], sizes = [4, 4], strides = [1, 1]} : vector<6x4xf32> to vector<4x4xf32>
      %372 = vector.extract_strided_slice %370 {offsets = [1, 0], sizes = [4, 4], strides = [1, 1]} : vector<6x4xf32> to vector<4x4xf32>
      %373 = vector.extract_strided_slice %370 {offsets = [2, 0], sizes = [4, 4], strides = [1, 1]} : vector<6x4xf32> to vector<4x4xf32>
      %c2_222 = arith.constant 2 : index
      %c2_223 = arith.constant 2 : index
      %c0_224 = arith.constant 0 : index
      %c0_225 = arith.constant 0 : index
      %374 = vector.load %arg12[%c2_222, %c2_223, %c0_224, %c0_225] : memref<6x6x6x4xf32, #tpu.memory_space<vmem>>, vector<1x1x6x4xf32>
      %375 = vector.shape_cast %374 : vector<1x1x6x4xf32> to vector<6x4xf32>
      %376 = vector.extract_strided_slice %375 {offsets = [0, 0], sizes = [4, 4], strides = [1, 1]} : vector<6x4xf32> to vector<4x4xf32>
      %377 = vector.extract_strided_slice %375 {offsets = [1, 0], sizes = [4, 4], strides = [1, 1]} : vector<6x4xf32> to vector<4x4xf32>
      %378 = vector.extract_strided_slice %375 {offsets = [2, 0], sizes = [4, 4], strides = [1, 1]} : vector<6x4xf32> to vector<4x4xf32>
      %379 = tpu.concatenate %336, %337, %338, %341, %342, %343, %346, %347, %348, %351, %352, %353, %356, %357, %358, %361 in 1 : vector<4x4xf32>, vector<4x4xf32>, vector<4x4xf32>, vector<4x4xf32>, vector<4x4xf32>, vector<4x4xf32>, vector<4x4xf32>, vector<4x4xf32>, vector<4x4xf32>, vector<4x4xf32>, vector<4x4xf32>, vector<4x4xf32>, vector<4x4xf32>, vector<4x4xf32>, vector<4x4xf32>, vector<4x4xf32> -> vector<4x64xf32>
      %380 = tpu.concatenate %362, %363, %366, %367, %368, %371, %372, %373, %376, %377, %378 in 1 : vector<4x4xf32>, vector<4x4xf32>, vector<4x4xf32>, vector<4x4xf32>, vector<4x4xf32>, vector<4x4xf32>, vector<4x4xf32>, vector<4x4xf32>, vector<4x4xf32>, vector<4x4xf32>, vector<4x4xf32> -> vector<4x44xf32>
      %381 = tpu.concatenate %379, %380 in 1 : vector<4x64xf32>, vector<4x44xf32> -> vector<4x108xf32>
      %c0_226 = arith.constant 0 : index
      %c1_227 = arith.constant 1 : index
      %c0_228 = arith.constant 0 : index
      %c0_229 = arith.constant 0 : index
      %382 = vector.load %arg12[%c0_226, %c1_227, %c0_228, %c0_229] : memref<6x6x6x4xf32, #tpu.memory_space<vmem>>, vector<1x1x6x4xf32>
      %383 = vector.shape_cast %382 : vector<1x1x6x4xf32> to vector<6x4xf32>
      %384 = vector.extract_strided_slice %383 {offsets = [0, 0], sizes = [4, 4], strides = [1, 1]} : vector<6x4xf32> to vector<4x4xf32>
      %385 = vector.extract_strided_slice %383 {offsets = [1, 0], sizes = [4, 4], strides = [1, 1]} : vector<6x4xf32> to vector<4x4xf32>
      %386 = vector.extract_strided_slice %383 {offsets = [2, 0], sizes = [4, 4], strides = [1, 1]} : vector<6x4xf32> to vector<4x4xf32>
      %c0_230 = arith.constant 0 : index
      %c2_231 = arith.constant 2 : index
      %c0_232 = arith.constant 0 : index
      %c0_233 = arith.constant 0 : index
      %387 = vector.load %arg12[%c0_230, %c2_231, %c0_232, %c0_233] : memref<6x6x6x4xf32, #tpu.memory_space<vmem>>, vector<1x1x6x4xf32>
      %388 = vector.shape_cast %387 : vector<1x1x6x4xf32> to vector<6x4xf32>
      %389 = vector.extract_strided_slice %388 {offsets = [0, 0], sizes = [4, 4], strides = [1, 1]} : vector<6x4xf32> to vector<4x4xf32>
      %390 = vector.extract_strided_slice %388 {offsets = [1, 0], sizes = [4, 4], strides = [1, 1]} : vector<6x4xf32> to vector<4x4xf32>
      %391 = vector.extract_strided_slice %388 {offsets = [2, 0], sizes = [4, 4], strides = [1, 1]} : vector<6x4xf32> to vector<4x4xf32>
      %c0_234 = arith.constant 0 : index
      %c3_235 = arith.constant 3 : index
      %c0_236 = arith.constant 0 : index
      %c0_237 = arith.constant 0 : index
      %392 = vector.load %arg12[%c0_234, %c3_235, %c0_236, %c0_237] : memref<6x6x6x4xf32, #tpu.memory_space<vmem>>, vector<1x1x6x4xf32>
      %393 = vector.shape_cast %392 : vector<1x1x6x4xf32> to vector<6x4xf32>
      %394 = vector.extract_strided_slice %393 {offsets = [0, 0], sizes = [4, 4], strides = [1, 1]} : vector<6x4xf32> to vector<4x4xf32>
      %395 = vector.extract_strided_slice %393 {offsets = [1, 0], sizes = [4, 4], strides = [1, 1]} : vector<6x4xf32> to vector<4x4xf32>
      %396 = vector.extract_strided_slice %393 {offsets = [2, 0], sizes = [4, 4], strides = [1, 1]} : vector<6x4xf32> to vector<4x4xf32>
      %c1_238 = arith.constant 1 : index
      %c1_239 = arith.constant 1 : index
      %c0_240 = arith.constant 0 : index
      %c0_241 = arith.constant 0 : index
      %397 = vector.load %arg12[%c1_238, %c1_239, %c0_240, %c0_241] : memref<6x6x6x4xf32, #tpu.memory_space<vmem>>, vector<1x1x6x4xf32>
      %398 = vector.shape_cast %397 : vector<1x1x6x4xf32> to vector<6x4xf32>
      %399 = vector.extract_strided_slice %398 {offsets = [0, 0], sizes = [4, 4], strides = [1, 1]} : vector<6x4xf32> to vector<4x4xf32>
      %400 = vector.extract_strided_slice %398 {offsets = [1, 0], sizes = [4, 4], strides = [1, 1]} : vector<6x4xf32> to vector<4x4xf32>
      %401 = vector.extract_strided_slice %398 {offsets = [2, 0], sizes = [4, 4], strides = [1, 1]} : vector<6x4xf32> to vector<4x4xf32>
      %c1_242 = arith.constant 1 : index
      %c2_243 = arith.constant 2 : index
      %c0_244 = arith.constant 0 : index
      %c0_245 = arith.constant 0 : index
      %402 = vector.load %arg12[%c1_242, %c2_243, %c0_244, %c0_245] : memref<6x6x6x4xf32, #tpu.memory_space<vmem>>, vector<1x1x6x4xf32>
      %403 = vector.shape_cast %402 : vector<1x1x6x4xf32> to vector<6x4xf32>
      %404 = vector.extract_strided_slice %403 {offsets = [0, 0], sizes = [4, 4], strides = [1, 1]} : vector<6x4xf32> to vector<4x4xf32>
      %405 = vector.extract_strided_slice %403 {offsets = [1, 0], sizes = [4, 4], strides = [1, 1]} : vector<6x4xf32> to vector<4x4xf32>
      %406 = vector.extract_strided_slice %403 {offsets = [2, 0], sizes = [4, 4], strides = [1, 1]} : vector<6x4xf32> to vector<4x4xf32>
      %c1_246 = arith.constant 1 : index
      %c3_247 = arith.constant 3 : index
      %c0_248 = arith.constant 0 : index
      %c0_249 = arith.constant 0 : index
      %407 = vector.load %arg12[%c1_246, %c3_247, %c0_248, %c0_249] : memref<6x6x6x4xf32, #tpu.memory_space<vmem>>, vector<1x1x6x4xf32>
      %408 = vector.shape_cast %407 : vector<1x1x6x4xf32> to vector<6x4xf32>
      %409 = vector.extract_strided_slice %408 {offsets = [0, 0], sizes = [4, 4], strides = [1, 1]} : vector<6x4xf32> to vector<4x4xf32>
      %410 = vector.extract_strided_slice %408 {offsets = [1, 0], sizes = [4, 4], strides = [1, 1]} : vector<6x4xf32> to vector<4x4xf32>
      %411 = vector.extract_strided_slice %408 {offsets = [2, 0], sizes = [4, 4], strides = [1, 1]} : vector<6x4xf32> to vector<4x4xf32>
      %c2_250 = arith.constant 2 : index
      %c1_251 = arith.constant 1 : index
      %c0_252 = arith.constant 0 : index
      %c0_253 = arith.constant 0 : index
      %412 = vector.load %arg12[%c2_250, %c1_251, %c0_252, %c0_253] : memref<6x6x6x4xf32, #tpu.memory_space<vmem>>, vector<1x1x6x4xf32>
      %413 = vector.shape_cast %412 : vector<1x1x6x4xf32> to vector<6x4xf32>
      %414 = vector.extract_strided_slice %413 {offsets = [0, 0], sizes = [4, 4], strides = [1, 1]} : vector<6x4xf32> to vector<4x4xf32>
      %415 = vector.extract_strided_slice %413 {offsets = [1, 0], sizes = [4, 4], strides = [1, 1]} : vector<6x4xf32> to vector<4x4xf32>
      %416 = vector.extract_strided_slice %413 {offsets = [2, 0], sizes = [4, 4], strides = [1, 1]} : vector<6x4xf32> to vector<4x4xf32>
      %c2_254 = arith.constant 2 : index
      %c2_255 = arith.constant 2 : index
      %c0_256 = arith.constant 0 : index
      %c0_257 = arith.constant 0 : index
      %417 = vector.load %arg12[%c2_254, %c2_255, %c0_256, %c0_257] : memref<6x6x6x4xf32, #tpu.memory_space<vmem>>, vector<1x1x6x4xf32>
      %418 = vector.shape_cast %417 : vector<1x1x6x4xf32> to vector<6x4xf32>
      %419 = vector.extract_strided_slice %418 {offsets = [0, 0], sizes = [4, 4], strides = [1, 1]} : vector<6x4xf32> to vector<4x4xf32>
      %420 = vector.extract_strided_slice %418 {offsets = [1, 0], sizes = [4, 4], strides = [1, 1]} : vector<6x4xf32> to vector<4x4xf32>
      %421 = vector.extract_strided_slice %418 {offsets = [2, 0], sizes = [4, 4], strides = [1, 1]} : vector<6x4xf32> to vector<4x4xf32>
      %c2_258 = arith.constant 2 : index
      %c3_259 = arith.constant 3 : index
      %c0_260 = arith.constant 0 : index
      %c0_261 = arith.constant 0 : index
      %422 = vector.load %arg12[%c2_258, %c3_259, %c0_260, %c0_261] : memref<6x6x6x4xf32, #tpu.memory_space<vmem>>, vector<1x1x6x4xf32>
      %423 = vector.shape_cast %422 : vector<1x1x6x4xf32> to vector<6x4xf32>
      %424 = vector.extract_strided_slice %423 {offsets = [0, 0], sizes = [4, 4], strides = [1, 1]} : vector<6x4xf32> to vector<4x4xf32>
      %425 = vector.extract_strided_slice %423 {offsets = [1, 0], sizes = [4, 4], strides = [1, 1]} : vector<6x4xf32> to vector<4x4xf32>
      %426 = vector.extract_strided_slice %423 {offsets = [2, 0], sizes = [4, 4], strides = [1, 1]} : vector<6x4xf32> to vector<4x4xf32>
      %427 = tpu.concatenate %384, %385, %386, %389, %390, %391, %394, %395, %396, %399, %400, %401, %404, %405, %406, %409 in 1 : vector<4x4xf32>, vector<4x4xf32>, vector<4x4xf32>, vector<4x4xf32>, vector<4x4xf32>, vector<4x4xf32>, vector<4x4xf32>, vector<4x4xf32>, vector<4x4xf32>, vector<4x4xf32>, vector<4x4xf32>, vector<4x4xf32>, vector<4x4xf32>, vector<4x4xf32>, vector<4x4xf32>, vector<4x4xf32> -> vector<4x64xf32>
      %428 = tpu.concatenate %410, %411, %414, %415, %416, %419, %420, %421, %424, %425, %426 in 1 : vector<4x4xf32>, vector<4x4xf32>, vector<4x4xf32>, vector<4x4xf32>, vector<4x4xf32>, vector<4x4xf32>, vector<4x4xf32>, vector<4x4xf32>, vector<4x4xf32>, vector<4x4xf32>, vector<4x4xf32> -> vector<4x44xf32>
      %429 = tpu.concatenate %427, %428 in 1 : vector<4x64xf32>, vector<4x44xf32> -> vector<4x108xf32>
      %c0_262 = arith.constant 0 : index
      %c2_263 = arith.constant 2 : index
      %c0_264 = arith.constant 0 : index
      %c0_265 = arith.constant 0 : index
      %430 = vector.load %arg12[%c0_262, %c2_263, %c0_264, %c0_265] : memref<6x6x6x4xf32, #tpu.memory_space<vmem>>, vector<1x1x6x4xf32>
      %431 = vector.shape_cast %430 : vector<1x1x6x4xf32> to vector<6x4xf32>
      %432 = vector.extract_strided_slice %431 {offsets = [0, 0], sizes = [4, 4], strides = [1, 1]} : vector<6x4xf32> to vector<4x4xf32>
      %433 = vector.extract_strided_slice %431 {offsets = [1, 0], sizes = [4, 4], strides = [1, 1]} : vector<6x4xf32> to vector<4x4xf32>
      %434 = vector.extract_strided_slice %431 {offsets = [2, 0], sizes = [4, 4], strides = [1, 1]} : vector<6x4xf32> to vector<4x4xf32>
      %c0_266 = arith.constant 0 : index
      %c3_267 = arith.constant 3 : index
      %c0_268 = arith.constant 0 : index
      %c0_269 = arith.constant 0 : index
      %435 = vector.load %arg12[%c0_266, %c3_267, %c0_268, %c0_269] : memref<6x6x6x4xf32, #tpu.memory_space<vmem>>, vector<1x1x6x4xf32>
      %436 = vector.shape_cast %435 : vector<1x1x6x4xf32> to vector<6x4xf32>
      %437 = vector.extract_strided_slice %436 {offsets = [0, 0], sizes = [4, 4], strides = [1, 1]} : vector<6x4xf32> to vector<4x4xf32>
      %438 = vector.extract_strided_slice %436 {offsets = [1, 0], sizes = [4, 4], strides = [1, 1]} : vector<6x4xf32> to vector<4x4xf32>
      %439 = vector.extract_strided_slice %436 {offsets = [2, 0], sizes = [4, 4], strides = [1, 1]} : vector<6x4xf32> to vector<4x4xf32>
      %c0_270 = arith.constant 0 : index
      %c4_271 = arith.constant 4 : index
      %c0_272 = arith.constant 0 : index
      %c0_273 = arith.constant 0 : index
      %440 = vector.load %arg12[%c0_270, %c4_271, %c0_272, %c0_273] : memref<6x6x6x4xf32, #tpu.memory_space<vmem>>, vector<1x1x6x4xf32>
      %441 = vector.shape_cast %440 : vector<1x1x6x4xf32> to vector<6x4xf32>
      %442 = vector.extract_strided_slice %441 {offsets = [0, 0], sizes = [4, 4], strides = [1, 1]} : vector<6x4xf32> to vector<4x4xf32>
      %443 = vector.extract_strided_slice %441 {offsets = [1, 0], sizes = [4, 4], strides = [1, 1]} : vector<6x4xf32> to vector<4x4xf32>
      %444 = vector.extract_strided_slice %441 {offsets = [2, 0], sizes = [4, 4], strides = [1, 1]} : vector<6x4xf32> to vector<4x4xf32>
      %c1_274 = arith.constant 1 : index
      %c2_275 = arith.constant 2 : index
      %c0_276 = arith.constant 0 : index
      %c0_277 = arith.constant 0 : index
      %445 = vector.load %arg12[%c1_274, %c2_275, %c0_276, %c0_277] : memref<6x6x6x4xf32, #tpu.memory_space<vmem>>, vector<1x1x6x4xf32>
      %446 = vector.shape_cast %445 : vector<1x1x6x4xf32> to vector<6x4xf32>
      %447 = vector.extract_strided_slice %446 {offsets = [0, 0], sizes = [4, 4], strides = [1, 1]} : vector<6x4xf32> to vector<4x4xf32>
      %448 = vector.extract_strided_slice %446 {offsets = [1, 0], sizes = [4, 4], strides = [1, 1]} : vector<6x4xf32> to vector<4x4xf32>
      %449 = vector.extract_strided_slice %446 {offsets = [2, 0], sizes = [4, 4], strides = [1, 1]} : vector<6x4xf32> to vector<4x4xf32>
      %c1_278 = arith.constant 1 : index
      %c3_279 = arith.constant 3 : index
      %c0_280 = arith.constant 0 : index
      %c0_281 = arith.constant 0 : index
      %450 = vector.load %arg12[%c1_278, %c3_279, %c0_280, %c0_281] : memref<6x6x6x4xf32, #tpu.memory_space<vmem>>, vector<1x1x6x4xf32>
      %451 = vector.shape_cast %450 : vector<1x1x6x4xf32> to vector<6x4xf32>
      %452 = vector.extract_strided_slice %451 {offsets = [0, 0], sizes = [4, 4], strides = [1, 1]} : vector<6x4xf32> to vector<4x4xf32>
      %453 = vector.extract_strided_slice %451 {offsets = [1, 0], sizes = [4, 4], strides = [1, 1]} : vector<6x4xf32> to vector<4x4xf32>
      %454 = vector.extract_strided_slice %451 {offsets = [2, 0], sizes = [4, 4], strides = [1, 1]} : vector<6x4xf32> to vector<4x4xf32>
      %c1_282 = arith.constant 1 : index
      %c4_283 = arith.constant 4 : index
      %c0_284 = arith.constant 0 : index
      %c0_285 = arith.constant 0 : index
      %455 = vector.load %arg12[%c1_282, %c4_283, %c0_284, %c0_285] : memref<6x6x6x4xf32, #tpu.memory_space<vmem>>, vector<1x1x6x4xf32>
      %456 = vector.shape_cast %455 : vector<1x1x6x4xf32> to vector<6x4xf32>
      %457 = vector.extract_strided_slice %456 {offsets = [0, 0], sizes = [4, 4], strides = [1, 1]} : vector<6x4xf32> to vector<4x4xf32>
      %458 = vector.extract_strided_slice %456 {offsets = [1, 0], sizes = [4, 4], strides = [1, 1]} : vector<6x4xf32> to vector<4x4xf32>
      %459 = vector.extract_strided_slice %456 {offsets = [2, 0], sizes = [4, 4], strides = [1, 1]} : vector<6x4xf32> to vector<4x4xf32>
      %c2_286 = arith.constant 2 : index
      %c2_287 = arith.constant 2 : index
      %c0_288 = arith.constant 0 : index
      %c0_289 = arith.constant 0 : index
      %460 = vector.load %arg12[%c2_286, %c2_287, %c0_288, %c0_289] : memref<6x6x6x4xf32, #tpu.memory_space<vmem>>, vector<1x1x6x4xf32>
      %461 = vector.shape_cast %460 : vector<1x1x6x4xf32> to vector<6x4xf32>
      %462 = vector.extract_strided_slice %461 {offsets = [0, 0], sizes = [4, 4], strides = [1, 1]} : vector<6x4xf32> to vector<4x4xf32>
      %463 = vector.extract_strided_slice %461 {offsets = [1, 0], sizes = [4, 4], strides = [1, 1]} : vector<6x4xf32> to vector<4x4xf32>
      %464 = vector.extract_strided_slice %461 {offsets = [2, 0], sizes = [4, 4], strides = [1, 1]} : vector<6x4xf32> to vector<4x4xf32>
      %c2_290 = arith.constant 2 : index
      %c3_291 = arith.constant 3 : index
      %c0_292 = arith.constant 0 : index
      %c0_293 = arith.constant 0 : index
      %465 = vector.load %arg12[%c2_290, %c3_291, %c0_292, %c0_293] : memref<6x6x6x4xf32, #tpu.memory_space<vmem>>, vector<1x1x6x4xf32>
      %466 = vector.shape_cast %465 : vector<1x1x6x4xf32> to vector<6x4xf32>
      %467 = vector.extract_strided_slice %466 {offsets = [0, 0], sizes = [4, 4], strides = [1, 1]} : vector<6x4xf32> to vector<4x4xf32>
      %468 = vector.extract_strided_slice %466 {offsets = [1, 0], sizes = [4, 4], strides = [1, 1]} : vector<6x4xf32> to vector<4x4xf32>
      %469 = vector.extract_strided_slice %466 {offsets = [2, 0], sizes = [4, 4], strides = [1, 1]} : vector<6x4xf32> to vector<4x4xf32>
      %c2_294 = arith.constant 2 : index
      %c4_295 = arith.constant 4 : index
      %c0_296 = arith.constant 0 : index
      %c0_297 = arith.constant 0 : index
      %470 = vector.load %arg12[%c2_294, %c4_295, %c0_296, %c0_297] : memref<6x6x6x4xf32, #tpu.memory_space<vmem>>, vector<1x1x6x4xf32>
      %471 = vector.shape_cast %470 : vector<1x1x6x4xf32> to vector<6x4xf32>
      %472 = vector.extract_strided_slice %471 {offsets = [0, 0], sizes = [4, 4], strides = [1, 1]} : vector<6x4xf32> to vector<4x4xf32>
      %473 = vector.extract_strided_slice %471 {offsets = [1, 0], sizes = [4, 4], strides = [1, 1]} : vector<6x4xf32> to vector<4x4xf32>
      %474 = vector.extract_strided_slice %471 {offsets = [2, 0], sizes = [4, 4], strides = [1, 1]} : vector<6x4xf32> to vector<4x4xf32>
      %475 = tpu.concatenate %432, %433, %434, %437, %438, %439, %442, %443, %444, %447, %448, %449, %452, %453, %454, %457 in 1 : vector<4x4xf32>, vector<4x4xf32>, vector<4x4xf32>, vector<4x4xf32>, vector<4x4xf32>, vector<4x4xf32>, vector<4x4xf32>, vector<4x4xf32>, vector<4x4xf32>, vector<4x4xf32>, vector<4x4xf32>, vector<4x4xf32>, vector<4x4xf32>, vector<4x4xf32>, vector<4x4xf32>, vector<4x4xf32> -> vector<4x64xf32>
      %476 = tpu.concatenate %458, %459, %462, %463, %464, %467, %468, %469, %472, %473, %474 in 1 : vector<4x4xf32>, vector<4x4xf32>, vector<4x4xf32>, vector<4x4xf32>, vector<4x4xf32>, vector<4x4xf32>, vector<4x4xf32>, vector<4x4xf32>, vector<4x4xf32>, vector<4x4xf32>, vector<4x4xf32> -> vector<4x44xf32>
      %477 = tpu.concatenate %475, %476 in 1 : vector<4x64xf32>, vector<4x44xf32> -> vector<4x108xf32>
      %c0_298 = arith.constant 0 : index
      %c3_299 = arith.constant 3 : index
      %c0_300 = arith.constant 0 : index
      %c0_301 = arith.constant 0 : index
      %478 = vector.load %arg12[%c0_298, %c3_299, %c0_300, %c0_301] : memref<6x6x6x4xf32, #tpu.memory_space<vmem>>, vector<1x1x6x4xf32>
      %479 = vector.shape_cast %478 : vector<1x1x6x4xf32> to vector<6x4xf32>
      %480 = vector.extract_strided_slice %479 {offsets = [0, 0], sizes = [4, 4], strides = [1, 1]} : vector<6x4xf32> to vector<4x4xf32>
      %481 = vector.extract_strided_slice %479 {offsets = [1, 0], sizes = [4, 4], strides = [1, 1]} : vector<6x4xf32> to vector<4x4xf32>
      %482 = vector.extract_strided_slice %479 {offsets = [2, 0], sizes = [4, 4], strides = [1, 1]} : vector<6x4xf32> to vector<4x4xf32>
      %c0_302 = arith.constant 0 : index
      %c4_303 = arith.constant 4 : index
      %c0_304 = arith.constant 0 : index
      %c0_305 = arith.constant 0 : index
      %483 = vector.load %arg12[%c0_302, %c4_303, %c0_304, %c0_305] : memref<6x6x6x4xf32, #tpu.memory_space<vmem>>, vector<1x1x6x4xf32>
      %484 = vector.shape_cast %483 : vector<1x1x6x4xf32> to vector<6x4xf32>
      %485 = vector.extract_strided_slice %484 {offsets = [0, 0], sizes = [4, 4], strides = [1, 1]} : vector<6x4xf32> to vector<4x4xf32>
      %486 = vector.extract_strided_slice %484 {offsets = [1, 0], sizes = [4, 4], strides = [1, 1]} : vector<6x4xf32> to vector<4x4xf32>
      %487 = vector.extract_strided_slice %484 {offsets = [2, 0], sizes = [4, 4], strides = [1, 1]} : vector<6x4xf32> to vector<4x4xf32>
      %c0_306 = arith.constant 0 : index
      %c5_307 = arith.constant 5 : index
      %c0_308 = arith.constant 0 : index
      %c0_309 = arith.constant 0 : index
      %488 = vector.load %arg12[%c0_306, %c5_307, %c0_308, %c0_309] : memref<6x6x6x4xf32, #tpu.memory_space<vmem>>, vector<1x1x6x4xf32>
      %489 = vector.shape_cast %488 : vector<1x1x6x4xf32> to vector<6x4xf32>
      %490 = vector.extract_strided_slice %489 {offsets = [0, 0], sizes = [4, 4], strides = [1, 1]} : vector<6x4xf32> to vector<4x4xf32>
      %491 = vector.extract_strided_slice %489 {offsets = [1, 0], sizes = [4, 4], strides = [1, 1]} : vector<6x4xf32> to vector<4x4xf32>
      %492 = vector.extract_strided_slice %489 {offsets = [2, 0], sizes = [4, 4], strides = [1, 1]} : vector<6x4xf32> to vector<4x4xf32>
      %c1_310 = arith.constant 1 : index
      %c3_311 = arith.constant 3 : index
      %c0_312 = arith.constant 0 : index
      %c0_313 = arith.constant 0 : index
      %493 = vector.load %arg12[%c1_310, %c3_311, %c0_312, %c0_313] : memref<6x6x6x4xf32, #tpu.memory_space<vmem>>, vector<1x1x6x4xf32>
      %494 = vector.shape_cast %493 : vector<1x1x6x4xf32> to vector<6x4xf32>
      %495 = vector.extract_strided_slice %494 {offsets = [0, 0], sizes = [4, 4], strides = [1, 1]} : vector<6x4xf32> to vector<4x4xf32>
      %496 = vector.extract_strided_slice %494 {offsets = [1, 0], sizes = [4, 4], strides = [1, 1]} : vector<6x4xf32> to vector<4x4xf32>
      %497 = vector.extract_strided_slice %494 {offsets = [2, 0], sizes = [4, 4], strides = [1, 1]} : vector<6x4xf32> to vector<4x4xf32>
      %c1_314 = arith.constant 1 : index
      %c4_315 = arith.constant 4 : index
      %c0_316 = arith.constant 0 : index
      %c0_317 = arith.constant 0 : index
      %498 = vector.load %arg12[%c1_314, %c4_315, %c0_316, %c0_317] : memref<6x6x6x4xf32, #tpu.memory_space<vmem>>, vector<1x1x6x4xf32>
      %499 = vector.shape_cast %498 : vector<1x1x6x4xf32> to vector<6x4xf32>
      %500 = vector.extract_strided_slice %499 {offsets = [0, 0], sizes = [4, 4], strides = [1, 1]} : vector<6x4xf32> to vector<4x4xf32>
      %501 = vector.extract_strided_slice %499 {offsets = [1, 0], sizes = [4, 4], strides = [1, 1]} : vector<6x4xf32> to vector<4x4xf32>
      %502 = vector.extract_strided_slice %499 {offsets = [2, 0], sizes = [4, 4], strides = [1, 1]} : vector<6x4xf32> to vector<4x4xf32>
      %c1_318 = arith.constant 1 : index
      %c5_319 = arith.constant 5 : index
      %c0_320 = arith.constant 0 : index
      %c0_321 = arith.constant 0 : index
      %503 = vector.load %arg12[%c1_318, %c5_319, %c0_320, %c0_321] : memref<6x6x6x4xf32, #tpu.memory_space<vmem>>, vector<1x1x6x4xf32>
      %504 = vector.shape_cast %503 : vector<1x1x6x4xf32> to vector<6x4xf32>
      %505 = vector.extract_strided_slice %504 {offsets = [0, 0], sizes = [4, 4], strides = [1, 1]} : vector<6x4xf32> to vector<4x4xf32>
      %506 = vector.extract_strided_slice %504 {offsets = [1, 0], sizes = [4, 4], strides = [1, 1]} : vector<6x4xf32> to vector<4x4xf32>
      %507 = vector.extract_strided_slice %504 {offsets = [2, 0], sizes = [4, 4], strides = [1, 1]} : vector<6x4xf32> to vector<4x4xf32>
      %c2_322 = arith.constant 2 : index
      %c3_323 = arith.constant 3 : index
      %c0_324 = arith.constant 0 : index
      %c0_325 = arith.constant 0 : index
      %508 = vector.load %arg12[%c2_322, %c3_323, %c0_324, %c0_325] : memref<6x6x6x4xf32, #tpu.memory_space<vmem>>, vector<1x1x6x4xf32>
      %509 = vector.shape_cast %508 : vector<1x1x6x4xf32> to vector<6x4xf32>
      %510 = vector.extract_strided_slice %509 {offsets = [0, 0], sizes = [4, 4], strides = [1, 1]} : vector<6x4xf32> to vector<4x4xf32>
      %511 = vector.extract_strided_slice %509 {offsets = [1, 0], sizes = [4, 4], strides = [1, 1]} : vector<6x4xf32> to vector<4x4xf32>
      %512 = vector.extract_strided_slice %509 {offsets = [2, 0], sizes = [4, 4], strides = [1, 1]} : vector<6x4xf32> to vector<4x4xf32>
      %c2_326 = arith.constant 2 : index
      %c4_327 = arith.constant 4 : index
      %c0_328 = arith.constant 0 : index
      %c0_329 = arith.constant 0 : index
      %513 = vector.load %arg12[%c2_326, %c4_327, %c0_328, %c0_329] : memref<6x6x6x4xf32, #tpu.memory_space<vmem>>, vector<1x1x6x4xf32>
      %514 = vector.shape_cast %513 : vector<1x1x6x4xf32> to vector<6x4xf32>
      %515 = vector.extract_strided_slice %514 {offsets = [0, 0], sizes = [4, 4], strides = [1, 1]} : vector<6x4xf32> to vector<4x4xf32>
      %516 = vector.extract_strided_slice %514 {offsets = [1, 0], sizes = [4, 4], strides = [1, 1]} : vector<6x4xf32> to vector<4x4xf32>
      %517 = vector.extract_strided_slice %514 {offsets = [2, 0], sizes = [4, 4], strides = [1, 1]} : vector<6x4xf32> to vector<4x4xf32>
      %c2_330 = arith.constant 2 : index
      %c5_331 = arith.constant 5 : index
      %c0_332 = arith.constant 0 : index
      %c0_333 = arith.constant 0 : index
      %518 = vector.load %arg12[%c2_330, %c5_331, %c0_332, %c0_333] : memref<6x6x6x4xf32, #tpu.memory_space<vmem>>, vector<1x1x6x4xf32>
      %519 = vector.shape_cast %518 : vector<1x1x6x4xf32> to vector<6x4xf32>
      %520 = vector.extract_strided_slice %519 {offsets = [0, 0], sizes = [4, 4], strides = [1, 1]} : vector<6x4xf32> to vector<4x4xf32>
      %521 = vector.extract_strided_slice %519 {offsets = [1, 0], sizes = [4, 4], strides = [1, 1]} : vector<6x4xf32> to vector<4x4xf32>
      %522 = vector.extract_strided_slice %519 {offsets = [2, 0], sizes = [4, 4], strides = [1, 1]} : vector<6x4xf32> to vector<4x4xf32>
      %523 = tpu.concatenate %480, %481, %482, %485, %486, %487, %490, %491, %492, %495, %496, %497, %500, %501, %502, %505 in 1 : vector<4x4xf32>, vector<4x4xf32>, vector<4x4xf32>, vector<4x4xf32>, vector<4x4xf32>, vector<4x4xf32>, vector<4x4xf32>, vector<4x4xf32>, vector<4x4xf32>, vector<4x4xf32>, vector<4x4xf32>, vector<4x4xf32>, vector<4x4xf32>, vector<4x4xf32>, vector<4x4xf32>, vector<4x4xf32> -> vector<4x64xf32>
      %524 = tpu.concatenate %506, %507, %510, %511, %512, %515, %516, %517, %520, %521, %522 in 1 : vector<4x4xf32>, vector<4x4xf32>, vector<4x4xf32>, vector<4x4xf32>, vector<4x4xf32>, vector<4x4xf32>, vector<4x4xf32>, vector<4x4xf32>, vector<4x4xf32>, vector<4x4xf32>, vector<4x4xf32> -> vector<4x44xf32>
      %525 = tpu.concatenate %523, %524 in 1 : vector<4x64xf32>, vector<4x44xf32> -> vector<4x108xf32>
      %526 = tpu.concatenate %381, %429, %477, %525 in 0 : vector<4x108xf32>, vector<4x108xf32>, vector<4x108xf32>, vector<4x108xf32> -> vector<16x108xf32>
      %527 = arith.truncf %526 : vector<16x108xf32> to vector<16x108xbf16>
      %c0_334 = arith.constant 0 : index
      %c0_335 = arith.constant 0 : index
      %528 = vector.load %arg3[%c0_334, %c0_335] : memref<108x8xbf16, #tpu.memory_space<vmem>>, vector<108x8xbf16>
      %cst_336 = arith.constant dense<0.000000e+00> : vector<16x8xf32>
      %529 = tpu.matmul %527, %528, %cst_336 {dimension_numbers = #tpu.dot_dimension_numbers<[1], [0], [0], [1], [0, 0, 1, 1], [], []>} : vector<16x108xbf16>, vector<108x8xbf16>, vector<16x8xf32> -> vector<16x8xf32>
      %c0_337 = arith.constant 0 : index
      %c0_338 = arith.constant 0 : index
      %530 = vector.load %arg4[%c0_337, %c0_338] : memref<1x8xf32, #tpu.memory_space<vmem>>, vector<1x8xf32>
      %531 = vector.broadcast %530 : vector<1x8xf32> to vector<16x8xf32>
      %532 = arith.mulf %529, %531 : vector<16x8xf32>
      %c0_339 = arith.constant 0 : index
      %c0_340 = arith.constant 0 : index
      %533 = vector.load %arg5[%c0_339, %c0_340] : memref<1x8xf32, #tpu.memory_space<vmem>>, vector<1x8xf32>
      %534 = vector.broadcast %533 : vector<1x8xf32> to vector<16x8xf32>
      %535 = arith.addf %532, %534 : vector<16x8xf32>
      %cst_341 = arith.constant 0.000000e+00 : f32
      %536 = vector.broadcast %cst_341 : f32 to vector<16x8xf32>
      %537 = arith.maximumf %535, %536 : vector<16x8xf32>
      %538 = vector.extract_strided_slice %537 {offsets = [0, 0], sizes = [4, 8], strides = [1, 1]} : vector<16x8xf32> to vector<4x8xf32>
      %c1_342 = arith.constant 1 : index
      %c1_343 = arith.constant 1 : index
      %c1_344 = arith.constant 1 : index
      %c0_345 = arith.constant 0 : index
      %539 = vector.load %arg13[%c1_342, %c1_343, %c1_344, %c0_345] : memref<6x6x6x8xf32, #tpu.memory_space<vmem>>, vector<1x1x4x8xf32>
      %540 = vector.shape_cast %539 : vector<1x1x4x8xf32> to vector<4x8xf32>
      %541 = vector.shape_cast %538 : vector<4x8xf32> to vector<1x1x4x8xf32>
      tpu.vector_store %arg13[%c1_342, %c1_343, %c1_344, %c0_345], %541 {strides = array<i32>} : memref<6x6x6x8xf32, #tpu.memory_space<vmem>>, vector<1x1x4x8xf32>,
      %542 = vector.extract_strided_slice %537 {offsets = [4, 0], sizes = [4, 8], strides = [1, 1]} : vector<16x8xf32> to vector<4x8xf32>
      %c1_346 = arith.constant 1 : index
      %c2_347 = arith.constant 2 : index
      %c1_348 = arith.constant 1 : index
      %c0_349 = arith.constant 0 : index
      %543 = vector.load %arg13[%c1_346, %c2_347, %c1_348, %c0_349] : memref<6x6x6x8xf32, #tpu.memory_space<vmem>>, vector<1x1x4x8xf32>
      %544 = vector.shape_cast %543 : vector<1x1x4x8xf32> to vector<4x8xf32>
      %545 = vector.shape_cast %542 : vector<4x8xf32> to vector<1x1x4x8xf32>
      tpu.vector_store %arg13[%c1_346, %c2_347, %c1_348, %c0_349], %545 {strides = array<i32>} : memref<6x6x6x8xf32, #tpu.memory_space<vmem>>, vector<1x1x4x8xf32>,
      %546 = vector.extract_strided_slice %537 {offsets = [8, 0], sizes = [4, 8], strides = [1, 1]} : vector<16x8xf32> to vector<4x8xf32>
      %c1_350 = arith.constant 1 : index
      %c3_351 = arith.constant 3 : index
      %c1_352 = arith.constant 1 : index
      %c0_353 = arith.constant 0 : index
      %547 = vector.load %arg13[%c1_350, %c3_351, %c1_352, %c0_353] : memref<6x6x6x8xf32, #tpu.memory_space<vmem>>, vector<1x1x4x8xf32>
      %548 = vector.shape_cast %547 : vector<1x1x4x8xf32> to vector<4x8xf32>
      %549 = vector.shape_cast %546 : vector<4x8xf32> to vector<1x1x4x8xf32>
      tpu.vector_store %arg13[%c1_350, %c3_351, %c1_352, %c0_353], %549 {strides = array<i32>} : memref<6x6x6x8xf32, #tpu.memory_space<vmem>>, vector<1x1x4x8xf32>,
      %550 = vector.extract_strided_slice %537 {offsets = [12, 0], sizes = [4, 8], strides = [1, 1]} : vector<16x8xf32> to vector<4x8xf32>
      %c1_354 = arith.constant 1 : index
      %c4_355 = arith.constant 4 : index
      %c1_356 = arith.constant 1 : index
      %c0_357 = arith.constant 0 : index
      %551 = vector.load %arg13[%c1_354, %c4_355, %c1_356, %c0_357] : memref<6x6x6x8xf32, #tpu.memory_space<vmem>>, vector<1x1x4x8xf32>
      %552 = vector.shape_cast %551 : vector<1x1x4x8xf32> to vector<4x8xf32>
      %553 = vector.shape_cast %550 : vector<4x8xf32> to vector<1x1x4x8xf32>
      tpu.vector_store %arg13[%c1_354, %c4_355, %c1_356, %c0_357], %553 {strides = array<i32>} : memref<6x6x6x8xf32, #tpu.memory_space<vmem>>, vector<1x1x4x8xf32>,
    } else {
    }
    %c1_i32 = arith.constant 1 : i32
    %3 = arith.addi %arg1, %c1_i32 : i32
    %c4_i32 = arith.constant 4 : i32
    %4 = arith.cmpi slt, %3, %c4_i32 : i32
    %5 = arith.extui %4 : i1 to i32
    %c0_i32_1 = arith.constant 0 : i32
    %6 = arith.cmpi ne, %5, %c0_i32_1 : i32
    scf.if %6 {
      %c1_i32_171 = arith.constant 1 : i32
      %311 = arith.addi %arg1, %c1_i32_171 : i32
      %c0_i32_172 = arith.constant 0 : i32
      %312 = arith.addi %311, %c0_i32_172 : i32
      %313 = arith.index_cast %312 : i32 to index
      %c0_173 = arith.constant 0 : index
      %c0_174 = arith.constant 0 : index
      %c0_175 = arith.constant 0 : index
      %314 = vector.load %arg12[%313, %c0_173, %c0_174, %c0_175] : memref<6x6x6x4xf32, #tpu.memory_space<vmem>>, vector<1x1x6x4xf32>
      %315 = vector.shape_cast %314 : vector<1x1x6x4xf32> to vector<6x4xf32>
      %316 = vector.extract_strided_slice %315 {offsets = [0, 0], sizes = [4, 4], strides = [1, 1]} : vector<6x4xf32> to vector<4x4xf32>
      %317 = vector.extract_strided_slice %315 {offsets = [1, 0], sizes = [4, 4], strides = [1, 1]} : vector<6x4xf32> to vector<4x4xf32>
      %318 = vector.extract_strided_slice %315 {offsets = [2, 0], sizes = [4, 4], strides = [1, 1]} : vector<6x4xf32> to vector<4x4xf32>
      %c0_i32_176 = arith.constant 0 : i32
      %319 = arith.addi %311, %c0_i32_176 : i32
      %320 = arith.index_cast %319 : i32 to index
      %c1_177 = arith.constant 1 : index
      %c0_178 = arith.constant 0 : index
      %c0_179 = arith.constant 0 : index
      %321 = vector.load %arg12[%320, %c1_177, %c0_178, %c0_179] : memref<6x6x6x4xf32, #tpu.memory_space<vmem>>, vector<1x1x6x4xf32>
      %322 = vector.shape_cast %321 : vector<1x1x6x4xf32> to vector<6x4xf32>
      %323 = vector.extract_strided_slice %322 {offsets = [0, 0], sizes = [4, 4], strides = [1, 1]} : vector<6x4xf32> to vector<4x4xf32>
      %324 = vector.extract_strided_slice %322 {offsets = [1, 0], sizes = [4, 4], strides = [1, 1]} : vector<6x4xf32> to vector<4x4xf32>
      %325 = vector.extract_strided_slice %322 {offsets = [2, 0], sizes = [4, 4], strides = [1, 1]} : vector<6x4xf32> to vector<4x4xf32>
      %c0_i32_180 = arith.constant 0 : i32
      %326 = arith.addi %311, %c0_i32_180 : i32
      %327 = arith.index_cast %326 : i32 to index
      %c2_181 = arith.constant 2 : index
      %c0_182 = arith.constant 0 : index
      %c0_183 = arith.constant 0 : index
      %328 = vector.load %arg12[%327, %c2_181, %c0_182, %c0_183] : memref<6x6x6x4xf32, #tpu.memory_space<vmem>>, vector<1x1x6x4xf32>
      %329 = vector.shape_cast %328 : vector<1x1x6x4xf32> to vector<6x4xf32>
      %330 = vector.extract_strided_slice %329 {offsets = [0, 0], sizes = [4, 4], strides = [1, 1]} : vector<6x4xf32> to vector<4x4xf32>
      %331 = vector.extract_strided_slice %329 {offsets = [1, 0], sizes = [4, 4], strides = [1, 1]} : vector<6x4xf32> to vector<4x4xf32>
      %332 = vector.extract_strided_slice %329 {offsets = [2, 0], sizes = [4, 4], strides = [1, 1]} : vector<6x4xf32> to vector<4x4xf32>
      %c1_i32_184 = arith.constant 1 : i32
      %333 = arith.addi %311, %c1_i32_184 : i32
      %334 = arith.index_cast %333 : i32 to index
      %c0_185 = arith.constant 0 : index
      %c0_186 = arith.constant 0 : index
      %c0_187 = arith.constant 0 : index
      %335 = vector.load %arg12[%334, %c0_185, %c0_186, %c0_187] : memref<6x6x6x4xf32, #tpu.memory_space<vmem>>, vector<1x1x6x4xf32>
      %336 = vector.shape_cast %335 : vector<1x1x6x4xf32> to vector<6x4xf32>
      %337 = vector.extract_strided_slice %336 {offsets = [0, 0], sizes = [4, 4], strides = [1, 1]} : vector<6x4xf32> to vector<4x4xf32>
      %338 = vector.extract_strided_slice %336 {offsets = [1, 0], sizes = [4, 4], strides = [1, 1]} : vector<6x4xf32> to vector<4x4xf32>
      %339 = vector.extract_strided_slice %336 {offsets = [2, 0], sizes = [4, 4], strides = [1, 1]} : vector<6x4xf32> to vector<4x4xf32>
      %c1_i32_188 = arith.constant 1 : i32
      %340 = arith.addi %311, %c1_i32_188 : i32
      %341 = arith.index_cast %340 : i32 to index
      %c1_189 = arith.constant 1 : index
      %c0_190 = arith.constant 0 : index
      %c0_191 = arith.constant 0 : index
      %342 = vector.load %arg12[%341, %c1_189, %c0_190, %c0_191] : memref<6x6x6x4xf32, #tpu.memory_space<vmem>>, vector<1x1x6x4xf32>
      %343 = vector.shape_cast %342 : vector<1x1x6x4xf32> to vector<6x4xf32>
      %344 = vector.extract_strided_slice %343 {offsets = [0, 0], sizes = [4, 4], strides = [1, 1]} : vector<6x4xf32> to vector<4x4xf32>
      %345 = vector.extract_strided_slice %343 {offsets = [1, 0], sizes = [4, 4], strides = [1, 1]} : vector<6x4xf32> to vector<4x4xf32>
      %346 = vector.extract_strided_slice %343 {offsets = [2, 0], sizes = [4, 4], strides = [1, 1]} : vector<6x4xf32> to vector<4x4xf32>
      %c1_i32_192 = arith.constant 1 : i32
      %347 = arith.addi %311, %c1_i32_192 : i32
      %348 = arith.index_cast %347 : i32 to index
      %c2_193 = arith.constant 2 : index
      %c0_194 = arith.constant 0 : index
      %c0_195 = arith.constant 0 : index
      %349 = vector.load %arg12[%348, %c2_193, %c0_194, %c0_195] : memref<6x6x6x4xf32, #tpu.memory_space<vmem>>, vector<1x1x6x4xf32>
      %350 = vector.shape_cast %349 : vector<1x1x6x4xf32> to vector<6x4xf32>
      %351 = vector.extract_strided_slice %350 {offsets = [0, 0], sizes = [4, 4], strides = [1, 1]} : vector<6x4xf32> to vector<4x4xf32>
      %352 = vector.extract_strided_slice %350 {offsets = [1, 0], sizes = [4, 4], strides = [1, 1]} : vector<6x4xf32> to vector<4x4xf32>
      %353 = vector.extract_strided_slice %350 {offsets = [2, 0], sizes = [4, 4], strides = [1, 1]} : vector<6x4xf32> to vector<4x4xf32>
      %c2_i32_196 = arith.constant 2 : i32
      %354 = arith.addi %311, %c2_i32_196 : i32
      %355 = arith.index_cast %354 : i32 to index
      %c0_197 = arith.constant 0 : index
      %c0_198 = arith.constant 0 : index
      %c0_199 = arith.constant 0 : index
      %356 = vector.load %arg12[%355, %c0_197, %c0_198, %c0_199] : memref<6x6x6x4xf32, #tpu.memory_space<vmem>>, vector<1x1x6x4xf32>
      %357 = vector.shape_cast %356 : vector<1x1x6x4xf32> to vector<6x4xf32>
      %358 = vector.extract_strided_slice %357 {offsets = [0, 0], sizes = [4, 4], strides = [1, 1]} : vector<6x4xf32> to vector<4x4xf32>
      %359 = vector.extract_strided_slice %357 {offsets = [1, 0], sizes = [4, 4], strides = [1, 1]} : vector<6x4xf32> to vector<4x4xf32>
      %360 = vector.extract_strided_slice %357 {offsets = [2, 0], sizes = [4, 4], strides = [1, 1]} : vector<6x4xf32> to vector<4x4xf32>
      %c2_i32_200 = arith.constant 2 : i32
      %361 = arith.addi %311, %c2_i32_200 : i32
      %362 = arith.index_cast %361 : i32 to index
      %c1_201 = arith.constant 1 : index
      %c0_202 = arith.constant 0 : index
      %c0_203 = arith.constant 0 : index
      %363 = vector.load %arg12[%362, %c1_201, %c0_202, %c0_203] : memref<6x6x6x4xf32, #tpu.memory_space<vmem>>, vector<1x1x6x4xf32>
      %364 = vector.shape_cast %363 : vector<1x1x6x4xf32> to vector<6x4xf32>
      %365 = vector.extract_strided_slice %364 {offsets = [0, 0], sizes = [4, 4], strides = [1, 1]} : vector<6x4xf32> to vector<4x4xf32>
      %366 = vector.extract_strided_slice %364 {offsets = [1, 0], sizes = [4, 4], strides = [1, 1]} : vector<6x4xf32> to vector<4x4xf32>
      %367 = vector.extract_strided_slice %364 {offsets = [2, 0], sizes = [4, 4], strides = [1, 1]} : vector<6x4xf32> to vector<4x4xf32>
      %c2_i32_204 = arith.constant 2 : i32
      %368 = arith.addi %311, %c2_i32_204 : i32
      %369 = arith.index_cast %368 : i32 to index
      %c2_205 = arith.constant 2 : index
      %c0_206 = arith.constant 0 : index
      %c0_207 = arith.constant 0 : index
      %370 = vector.load %arg12[%369, %c2_205, %c0_206, %c0_207] : memref<6x6x6x4xf32, #tpu.memory_space<vmem>>, vector<1x1x6x4xf32>
      %371 = vector.shape_cast %370 : vector<1x1x6x4xf32> to vector<6x4xf32>
      %372 = vector.extract_strided_slice %371 {offsets = [0, 0], sizes = [4, 4], strides = [1, 1]} : vector<6x4xf32> to vector<4x4xf32>
      %373 = vector.extract_strided_slice %371 {offsets = [1, 0], sizes = [4, 4], strides = [1, 1]} : vector<6x4xf32> to vector<4x4xf32>
      %374 = vector.extract_strided_slice %371 {offsets = [2, 0], sizes = [4, 4], strides = [1, 1]} : vector<6x4xf32> to vector<4x4xf32>
      %375 = tpu.concatenate %316, %317, %318, %323, %324, %325, %330, %331, %332, %337, %338, %339, %344, %345, %346, %351 in 1 : vector<4x4xf32>, vector<4x4xf32>, vector<4x4xf32>, vector<4x4xf32>, vector<4x4xf32>, vector<4x4xf32>, vector<4x4xf32>, vector<4x4xf32>, vector<4x4xf32>, vector<4x4xf32>, vector<4x4xf32>, vector<4x4xf32>, vector<4x4xf32>, vector<4x4xf32>, vector<4x4xf32>, vector<4x4xf32> -> vector<4x64xf32>
      %376 = tpu.concatenate %352, %353, %358, %359, %360, %365, %366, %367, %372, %373, %374 in 1 : vector<4x4xf32>, vector<4x4xf32>, vector<4x4xf32>, vector<4x4xf32>, vector<4x4xf32>, vector<4x4xf32>, vector<4x4xf32>, vector<4x4xf32>, vector<4x4xf32>, vector<4x4xf32>, vector<4x4xf32> -> vector<4x44xf32>
      %377 = tpu.concatenate %375, %376 in 1 : vector<4x64xf32>, vector<4x44xf32> -> vector<4x108xf32>
      %c0_i32_208 = arith.constant 0 : i32
      %378 = arith.addi %311, %c0_i32_208 : i32
      %379 = arith.index_cast %378 : i32 to index
      %c1_209 = arith.constant 1 : index
      %c0_210 = arith.constant 0 : index
      %c0_211 = arith.constant 0 : index
      %380 = vector.load %arg12[%379, %c1_209, %c0_210, %c0_211] : memref<6x6x6x4xf32, #tpu.memory_space<vmem>>, vector<1x1x6x4xf32>
      %381 = vector.shape_cast %380 : vector<1x1x6x4xf32> to vector<6x4xf32>
      %382 = vector.extract_strided_slice %381 {offsets = [0, 0], sizes = [4, 4], strides = [1, 1]} : vector<6x4xf32> to vector<4x4xf32>
      %383 = vector.extract_strided_slice %381 {offsets = [1, 0], sizes = [4, 4], strides = [1, 1]} : vector<6x4xf32> to vector<4x4xf32>
      %384 = vector.extract_strided_slice %381 {offsets = [2, 0], sizes = [4, 4], strides = [1, 1]} : vector<6x4xf32> to vector<4x4xf32>
      %c0_i32_212 = arith.constant 0 : i32
      %385 = arith.addi %311, %c0_i32_212 : i32
      %386 = arith.index_cast %385 : i32 to index
      %c2_213 = arith.constant 2 : index
      %c0_214 = arith.constant 0 : index
      %c0_215 = arith.constant 0 : index
      %387 = vector.load %arg12[%386, %c2_213, %c0_214, %c0_215] : memref<6x6x6x4xf32, #tpu.memory_space<vmem>>, vector<1x1x6x4xf32>
      %388 = vector.shape_cast %387 : vector<1x1x6x4xf32> to vector<6x4xf32>
      %389 = vector.extract_strided_slice %388 {offsets = [0, 0], sizes = [4, 4], strides = [1, 1]} : vector<6x4xf32> to vector<4x4xf32>
      %390 = vector.extract_strided_slice %388 {offsets = [1, 0], sizes = [4, 4], strides = [1, 1]} : vector<6x4xf32> to vector<4x4xf32>
      %391 = vector.extract_strided_slice %388 {offsets = [2, 0], sizes = [4, 4], strides = [1, 1]} : vector<6x4xf32> to vector<4x4xf32>
      %c0_i32_216 = arith.constant 0 : i32
      %392 = arith.addi %311, %c0_i32_216 : i32
      %393 = arith.index_cast %392 : i32 to index
      %c3_217 = arith.constant 3 : index
      %c0_218 = arith.constant 0 : index
      %c0_219 = arith.constant 0 : index
      %394 = vector.load %arg12[%393, %c3_217, %c0_218, %c0_219] : memref<6x6x6x4xf32, #tpu.memory_space<vmem>>, vector<1x1x6x4xf32>
      %395 = vector.shape_cast %394 : vector<1x1x6x4xf32> to vector<6x4xf32>
      %396 = vector.extract_strided_slice %395 {offsets = [0, 0], sizes = [4, 4], strides = [1, 1]} : vector<6x4xf32> to vector<4x4xf32>
      %397 = vector.extract_strided_slice %395 {offsets = [1, 0], sizes = [4, 4], strides = [1, 1]} : vector<6x4xf32> to vector<4x4xf32>
      %398 = vector.extract_strided_slice %395 {offsets = [2, 0], sizes = [4, 4], strides = [1, 1]} : vector<6x4xf32> to vector<4x4xf32>
      %c1_i32_220 = arith.constant 1 : i32
      %399 = arith.addi %311, %c1_i32_220 : i32
      %400 = arith.index_cast %399 : i32 to index
      %c1_221 = arith.constant 1 : index
      %c0_222 = arith.constant 0 : index
      %c0_223 = arith.constant 0 : index
      %401 = vector.load %arg12[%400, %c1_221, %c0_222, %c0_223] : memref<6x6x6x4xf32, #tpu.memory_space<vmem>>, vector<1x1x6x4xf32>
      %402 = vector.shape_cast %401 : vector<1x1x6x4xf32> to vector<6x4xf32>
      %403 = vector.extract_strided_slice %402 {offsets = [0, 0], sizes = [4, 4], strides = [1, 1]} : vector<6x4xf32> to vector<4x4xf32>
      %404 = vector.extract_strided_slice %402 {offsets = [1, 0], sizes = [4, 4], strides = [1, 1]} : vector<6x4xf32> to vector<4x4xf32>
      %405 = vector.extract_strided_slice %402 {offsets = [2, 0], sizes = [4, 4], strides = [1, 1]} : vector<6x4xf32> to vector<4x4xf32>
      %c1_i32_224 = arith.constant 1 : i32
      %406 = arith.addi %311, %c1_i32_224 : i32
      %407 = arith.index_cast %406 : i32 to index
      %c2_225 = arith.constant 2 : index
      %c0_226 = arith.constant 0 : index
      %c0_227 = arith.constant 0 : index
      %408 = vector.load %arg12[%407, %c2_225, %c0_226, %c0_227] : memref<6x6x6x4xf32, #tpu.memory_space<vmem>>, vector<1x1x6x4xf32>
      %409 = vector.shape_cast %408 : vector<1x1x6x4xf32> to vector<6x4xf32>
      %410 = vector.extract_strided_slice %409 {offsets = [0, 0], sizes = [4, 4], strides = [1, 1]} : vector<6x4xf32> to vector<4x4xf32>
      %411 = vector.extract_strided_slice %409 {offsets = [1, 0], sizes = [4, 4], strides = [1, 1]} : vector<6x4xf32> to vector<4x4xf32>
      %412 = vector.extract_strided_slice %409 {offsets = [2, 0], sizes = [4, 4], strides = [1, 1]} : vector<6x4xf32> to vector<4x4xf32>
      %c1_i32_228 = arith.constant 1 : i32
      %413 = arith.addi %311, %c1_i32_228 : i32
      %414 = arith.index_cast %413 : i32 to index
      %c3_229 = arith.constant 3 : index
      %c0_230 = arith.constant 0 : index
      %c0_231 = arith.constant 0 : index
      %415 = vector.load %arg12[%414, %c3_229, %c0_230, %c0_231] : memref<6x6x6x4xf32, #tpu.memory_space<vmem>>, vector<1x1x6x4xf32>
      %416 = vector.shape_cast %415 : vector<1x1x6x4xf32> to vector<6x4xf32>
      %417 = vector.extract_strided_slice %416 {offsets = [0, 0], sizes = [4, 4], strides = [1, 1]} : vector<6x4xf32> to vector<4x4xf32>
      %418 = vector.extract_strided_slice %416 {offsets = [1, 0], sizes = [4, 4], strides = [1, 1]} : vector<6x4xf32> to vector<4x4xf32>
      %419 = vector.extract_strided_slice %416 {offsets = [2, 0], sizes = [4, 4], strides = [1, 1]} : vector<6x4xf32> to vector<4x4xf32>
      %c2_i32_232 = arith.constant 2 : i32
      %420 = arith.addi %311, %c2_i32_232 : i32
      %421 = arith.index_cast %420 : i32 to index
      %c1_233 = arith.constant 1 : index
      %c0_234 = arith.constant 0 : index
      %c0_235 = arith.constant 0 : index
      %422 = vector.load %arg12[%421, %c1_233, %c0_234, %c0_235] : memref<6x6x6x4xf32, #tpu.memory_space<vmem>>, vector<1x1x6x4xf32>
      %423 = vector.shape_cast %422 : vector<1x1x6x4xf32> to vector<6x4xf32>
      %424 = vector.extract_strided_slice %423 {offsets = [0, 0], sizes = [4, 4], strides = [1, 1]} : vector<6x4xf32> to vector<4x4xf32>
      %425 = vector.extract_strided_slice %423 {offsets = [1, 0], sizes = [4, 4], strides = [1, 1]} : vector<6x4xf32> to vector<4x4xf32>
      %426 = vector.extract_strided_slice %423 {offsets = [2, 0], sizes = [4, 4], strides = [1, 1]} : vector<6x4xf32> to vector<4x4xf32>
      %c2_i32_236 = arith.constant 2 : i32
      %427 = arith.addi %311, %c2_i32_236 : i32
      %428 = arith.index_cast %427 : i32 to index
      %c2_237 = arith.constant 2 : index
      %c0_238 = arith.constant 0 : index
      %c0_239 = arith.constant 0 : index
      %429 = vector.load %arg12[%428, %c2_237, %c0_238, %c0_239] : memref<6x6x6x4xf32, #tpu.memory_space<vmem>>, vector<1x1x6x4xf32>
      %430 = vector.shape_cast %429 : vector<1x1x6x4xf32> to vector<6x4xf32>
      %431 = vector.extract_strided_slice %430 {offsets = [0, 0], sizes = [4, 4], strides = [1, 1]} : vector<6x4xf32> to vector<4x4xf32>
      %432 = vector.extract_strided_slice %430 {offsets = [1, 0], sizes = [4, 4], strides = [1, 1]} : vector<6x4xf32> to vector<4x4xf32>
      %433 = vector.extract_strided_slice %430 {offsets = [2, 0], sizes = [4, 4], strides = [1, 1]} : vector<6x4xf32> to vector<4x4xf32>
      %c2_i32_240 = arith.constant 2 : i32
      %434 = arith.addi %311, %c2_i32_240 : i32
      %435 = arith.index_cast %434 : i32 to index
      %c3_241 = arith.constant 3 : index
      %c0_242 = arith.constant 0 : index
      %c0_243 = arith.constant 0 : index
      %436 = vector.load %arg12[%435, %c3_241, %c0_242, %c0_243] : memref<6x6x6x4xf32, #tpu.memory_space<vmem>>, vector<1x1x6x4xf32>
      %437 = vector.shape_cast %436 : vector<1x1x6x4xf32> to vector<6x4xf32>
      %438 = vector.extract_strided_slice %437 {offsets = [0, 0], sizes = [4, 4], strides = [1, 1]} : vector<6x4xf32> to vector<4x4xf32>
      %439 = vector.extract_strided_slice %437 {offsets = [1, 0], sizes = [4, 4], strides = [1, 1]} : vector<6x4xf32> to vector<4x4xf32>
      %440 = vector.extract_strided_slice %437 {offsets = [2, 0], sizes = [4, 4], strides = [1, 1]} : vector<6x4xf32> to vector<4x4xf32>
      %441 = tpu.concatenate %382, %383, %384, %389, %390, %391, %396, %397, %398, %403, %404, %405, %410, %411, %412, %417 in 1 : vector<4x4xf32>, vector<4x4xf32>, vector<4x4xf32>, vector<4x4xf32>, vector<4x4xf32>, vector<4x4xf32>, vector<4x4xf32>, vector<4x4xf32>, vector<4x4xf32>, vector<4x4xf32>, vector<4x4xf32>, vector<4x4xf32>, vector<4x4xf32>, vector<4x4xf32>, vector<4x4xf32>, vector<4x4xf32> -> vector<4x64xf32>
      %442 = tpu.concatenate %418, %419, %424, %425, %426, %431, %432, %433, %438, %439, %440 in 1 : vector<4x4xf32>, vector<4x4xf32>, vector<4x4xf32>, vector<4x4xf32>, vector<4x4xf32>, vector<4x4xf32>, vector<4x4xf32>, vector<4x4xf32>, vector<4x4xf32>, vector<4x4xf32>, vector<4x4xf32> -> vector<4x44xf32>
      %443 = tpu.concatenate %441, %442 in 1 : vector<4x64xf32>, vector<4x44xf32> -> vector<4x108xf32>
      %c0_i32_244 = arith.constant 0 : i32
      %444 = arith.addi %311, %c0_i32_244 : i32
      %445 = arith.index_cast %444 : i32 to index
      %c2_245 = arith.constant 2 : index
      %c0_246 = arith.constant 0 : index
      %c0_247 = arith.constant 0 : index
      %446 = vector.load %arg12[%445, %c2_245, %c0_246, %c0_247] : memref<6x6x6x4xf32, #tpu.memory_space<vmem>>, vector<1x1x6x4xf32>
      %447 = vector.shape_cast %446 : vector<1x1x6x4xf32> to vector<6x4xf32>
      %448 = vector.extract_strided_slice %447 {offsets = [0, 0], sizes = [4, 4], strides = [1, 1]} : vector<6x4xf32> to vector<4x4xf32>
      %449 = vector.extract_strided_slice %447 {offsets = [1, 0], sizes = [4, 4], strides = [1, 1]} : vector<6x4xf32> to vector<4x4xf32>
      %450 = vector.extract_strided_slice %447 {offsets = [2, 0], sizes = [4, 4], strides = [1, 1]} : vector<6x4xf32> to vector<4x4xf32>
      %c0_i32_248 = arith.constant 0 : i32
      %451 = arith.addi %311, %c0_i32_248 : i32
      %452 = arith.index_cast %451 : i32 to index
      %c3_249 = arith.constant 3 : index
      %c0_250 = arith.constant 0 : index
      %c0_251 = arith.constant 0 : index
      %453 = vector.load %arg12[%452, %c3_249, %c0_250, %c0_251] : memref<6x6x6x4xf32, #tpu.memory_space<vmem>>, vector<1x1x6x4xf32>
      %454 = vector.shape_cast %453 : vector<1x1x6x4xf32> to vector<6x4xf32>
      %455 = vector.extract_strided_slice %454 {offsets = [0, 0], sizes = [4, 4], strides = [1, 1]} : vector<6x4xf32> to vector<4x4xf32>
      %456 = vector.extract_strided_slice %454 {offsets = [1, 0], sizes = [4, 4], strides = [1, 1]} : vector<6x4xf32> to vector<4x4xf32>
      %457 = vector.extract_strided_slice %454 {offsets = [2, 0], sizes = [4, 4], strides = [1, 1]} : vector<6x4xf32> to vector<4x4xf32>
      %c0_i32_252 = arith.constant 0 : i32
      %458 = arith.addi %311, %c0_i32_252 : i32
      %459 = arith.index_cast %458 : i32 to index
      %c4_253 = arith.constant 4 : index
      %c0_254 = arith.constant 0 : index
      %c0_255 = arith.constant 0 : index
      %460 = vector.load %arg12[%459, %c4_253, %c0_254, %c0_255] : memref<6x6x6x4xf32, #tpu.memory_space<vmem>>, vector<1x1x6x4xf32>
      %461 = vector.shape_cast %460 : vector<1x1x6x4xf32> to vector<6x4xf32>
      %462 = vector.extract_strided_slice %461 {offsets = [0, 0], sizes = [4, 4], strides = [1, 1]} : vector<6x4xf32> to vector<4x4xf32>
      %463 = vector.extract_strided_slice %461 {offsets = [1, 0], sizes = [4, 4], strides = [1, 1]} : vector<6x4xf32> to vector<4x4xf32>
      %464 = vector.extract_strided_slice %461 {offsets = [2, 0], sizes = [4, 4], strides = [1, 1]} : vector<6x4xf32> to vector<4x4xf32>
      %c1_i32_256 = arith.constant 1 : i32
      %465 = arith.addi %311, %c1_i32_256 : i32
      %466 = arith.index_cast %465 : i32 to index
      %c2_257 = arith.constant 2 : index
      %c0_258 = arith.constant 0 : index
      %c0_259 = arith.constant 0 : index
      %467 = vector.load %arg12[%466, %c2_257, %c0_258, %c0_259] : memref<6x6x6x4xf32, #tpu.memory_space<vmem>>, vector<1x1x6x4xf32>
      %468 = vector.shape_cast %467 : vector<1x1x6x4xf32> to vector<6x4xf32>
      %469 = vector.extract_strided_slice %468 {offsets = [0, 0], sizes = [4, 4], strides = [1, 1]} : vector<6x4xf32> to vector<4x4xf32>
      %470 = vector.extract_strided_slice %468 {offsets = [1, 0], sizes = [4, 4], strides = [1, 1]} : vector<6x4xf32> to vector<4x4xf32>
      %471 = vector.extract_strided_slice %468 {offsets = [2, 0], sizes = [4, 4], strides = [1, 1]} : vector<6x4xf32> to vector<4x4xf32>
      %c1_i32_260 = arith.constant 1 : i32
      %472 = arith.addi %311, %c1_i32_260 : i32
      %473 = arith.index_cast %472 : i32 to index
      %c3_261 = arith.constant 3 : index
      %c0_262 = arith.constant 0 : index
      %c0_263 = arith.constant 0 : index
      %474 = vector.load %arg12[%473, %c3_261, %c0_262, %c0_263] : memref<6x6x6x4xf32, #tpu.memory_space<vmem>>, vector<1x1x6x4xf32>
      %475 = vector.shape_cast %474 : vector<1x1x6x4xf32> to vector<6x4xf32>
      %476 = vector.extract_strided_slice %475 {offsets = [0, 0], sizes = [4, 4], strides = [1, 1]} : vector<6x4xf32> to vector<4x4xf32>
      %477 = vector.extract_strided_slice %475 {offsets = [1, 0], sizes = [4, 4], strides = [1, 1]} : vector<6x4xf32> to vector<4x4xf32>
      %478 = vector.extract_strided_slice %475 {offsets = [2, 0], sizes = [4, 4], strides = [1, 1]} : vector<6x4xf32> to vector<4x4xf32>
      %c1_i32_264 = arith.constant 1 : i32
      %479 = arith.addi %311, %c1_i32_264 : i32
      %480 = arith.index_cast %479 : i32 to index
      %c4_265 = arith.constant 4 : index
      %c0_266 = arith.constant 0 : index
      %c0_267 = arith.constant 0 : index
      %481 = vector.load %arg12[%480, %c4_265, %c0_266, %c0_267] : memref<6x6x6x4xf32, #tpu.memory_space<vmem>>, vector<1x1x6x4xf32>
      %482 = vector.shape_cast %481 : vector<1x1x6x4xf32> to vector<6x4xf32>
      %483 = vector.extract_strided_slice %482 {offsets = [0, 0], sizes = [4, 4], strides = [1, 1]} : vector<6x4xf32> to vector<4x4xf32>
      %484 = vector.extract_strided_slice %482 {offsets = [1, 0], sizes = [4, 4], strides = [1, 1]} : vector<6x4xf32> to vector<4x4xf32>
      %485 = vector.extract_strided_slice %482 {offsets = [2, 0], sizes = [4, 4], strides = [1, 1]} : vector<6x4xf32> to vector<4x4xf32>
      %c2_i32_268 = arith.constant 2 : i32
      %486 = arith.addi %311, %c2_i32_268 : i32
      %487 = arith.index_cast %486 : i32 to index
      %c2_269 = arith.constant 2 : index
      %c0_270 = arith.constant 0 : index
      %c0_271 = arith.constant 0 : index
      %488 = vector.load %arg12[%487, %c2_269, %c0_270, %c0_271] : memref<6x6x6x4xf32, #tpu.memory_space<vmem>>, vector<1x1x6x4xf32>
      %489 = vector.shape_cast %488 : vector<1x1x6x4xf32> to vector<6x4xf32>
      %490 = vector.extract_strided_slice %489 {offsets = [0, 0], sizes = [4, 4], strides = [1, 1]} : vector<6x4xf32> to vector<4x4xf32>
      %491 = vector.extract_strided_slice %489 {offsets = [1, 0], sizes = [4, 4], strides = [1, 1]} : vector<6x4xf32> to vector<4x4xf32>
      %492 = vector.extract_strided_slice %489 {offsets = [2, 0], sizes = [4, 4], strides = [1, 1]} : vector<6x4xf32> to vector<4x4xf32>
      %c2_i32_272 = arith.constant 2 : i32
      %493 = arith.addi %311, %c2_i32_272 : i32
      %494 = arith.index_cast %493 : i32 to index
      %c3_273 = arith.constant 3 : index
      %c0_274 = arith.constant 0 : index
      %c0_275 = arith.constant 0 : index
      %495 = vector.load %arg12[%494, %c3_273, %c0_274, %c0_275] : memref<6x6x6x4xf32, #tpu.memory_space<vmem>>, vector<1x1x6x4xf32>
      %496 = vector.shape_cast %495 : vector<1x1x6x4xf32> to vector<6x4xf32>
      %497 = vector.extract_strided_slice %496 {offsets = [0, 0], sizes = [4, 4], strides = [1, 1]} : vector<6x4xf32> to vector<4x4xf32>
      %498 = vector.extract_strided_slice %496 {offsets = [1, 0], sizes = [4, 4], strides = [1, 1]} : vector<6x4xf32> to vector<4x4xf32>
      %499 = vector.extract_strided_slice %496 {offsets = [2, 0], sizes = [4, 4], strides = [1, 1]} : vector<6x4xf32> to vector<4x4xf32>
      %c2_i32_276 = arith.constant 2 : i32
      %500 = arith.addi %311, %c2_i32_276 : i32
      %501 = arith.index_cast %500 : i32 to index
      %c4_277 = arith.constant 4 : index
      %c0_278 = arith.constant 0 : index
      %c0_279 = arith.constant 0 : index
      %502 = vector.load %arg12[%501, %c4_277, %c0_278, %c0_279] : memref<6x6x6x4xf32, #tpu.memory_space<vmem>>, vector<1x1x6x4xf32>
      %503 = vector.shape_cast %502 : vector<1x1x6x4xf32> to vector<6x4xf32>
      %504 = vector.extract_strided_slice %503 {offsets = [0, 0], sizes = [4, 4], strides = [1, 1]} : vector<6x4xf32> to vector<4x4xf32>
      %505 = vector.extract_strided_slice %503 {offsets = [1, 0], sizes = [4, 4], strides = [1, 1]} : vector<6x4xf32> to vector<4x4xf32>
      %506 = vector.extract_strided_slice %503 {offsets = [2, 0], sizes = [4, 4], strides = [1, 1]} : vector<6x4xf32> to vector<4x4xf32>
      %507 = tpu.concatenate %448, %449, %450, %455, %456, %457, %462, %463, %464, %469, %470, %471, %476, %477, %478, %483 in 1 : vector<4x4xf32>, vector<4x4xf32>, vector<4x4xf32>, vector<4x4xf32>, vector<4x4xf32>, vector<4x4xf32>, vector<4x4xf32>, vector<4x4xf32>, vector<4x4xf32>, vector<4x4xf32>, vector<4x4xf32>, vector<4x4xf32>, vector<4x4xf32>, vector<4x4xf32>, vector<4x4xf32>, vector<4x4xf32> -> vector<4x64xf32>
      %508 = tpu.concatenate %484, %485, %490, %491, %492, %497, %498, %499, %504, %505, %506 in 1 : vector<4x4xf32>, vector<4x4xf32>, vector<4x4xf32>, vector<4x4xf32>, vector<4x4xf32>, vector<4x4xf32>, vector<4x4xf32>, vector<4x4xf32>, vector<4x4xf32>, vector<4x4xf32>, vector<4x4xf32> -> vector<4x44xf32>
      %509 = tpu.concatenate %507, %508 in 1 : vector<4x64xf32>, vector<4x44xf32> -> vector<4x108xf32>
      %c0_i32_280 = arith.constant 0 : i32
      %510 = arith.addi %311, %c0_i32_280 : i32
      %511 = arith.index_cast %510 : i32 to index
      %c3_281 = arith.constant 3 : index
      %c0_282 = arith.constant 0 : index
      %c0_283 = arith.constant 0 : index
      %512 = vector.load %arg12[%511, %c3_281, %c0_282, %c0_283] : memref<6x6x6x4xf32, #tpu.memory_space<vmem>>, vector<1x1x6x4xf32>
      %513 = vector.shape_cast %512 : vector<1x1x6x4xf32> to vector<6x4xf32>
      %514 = vector.extract_strided_slice %513 {offsets = [0, 0], sizes = [4, 4], strides = [1, 1]} : vector<6x4xf32> to vector<4x4xf32>
      %515 = vector.extract_strided_slice %513 {offsets = [1, 0], sizes = [4, 4], strides = [1, 1]} : vector<6x4xf32> to vector<4x4xf32>
      %516 = vector.extract_strided_slice %513 {offsets = [2, 0], sizes = [4, 4], strides = [1, 1]} : vector<6x4xf32> to vector<4x4xf32>
      %c0_i32_284 = arith.constant 0 : i32
      %517 = arith.addi %311, %c0_i32_284 : i32
      %518 = arith.index_cast %517 : i32 to index
      %c4_285 = arith.constant 4 : index
      %c0_286 = arith.constant 0 : index
      %c0_287 = arith.constant 0 : index
      %519 = vector.load %arg12[%518, %c4_285, %c0_286, %c0_287] : memref<6x6x6x4xf32, #tpu.memory_space<vmem>>, vector<1x1x6x4xf32>
      %520 = vector.shape_cast %519 : vector<1x1x6x4xf32> to vector<6x4xf32>
      %521 = vector.extract_strided_slice %520 {offsets = [0, 0], sizes = [4, 4], strides = [1, 1]} : vector<6x4xf32> to vector<4x4xf32>
      %522 = vector.extract_strided_slice %520 {offsets = [1, 0], sizes = [4, 4], strides = [1, 1]} : vector<6x4xf32> to vector<4x4xf32>
      %523 = vector.extract_strided_slice %520 {offsets = [2, 0], sizes = [4, 4], strides = [1, 1]} : vector<6x4xf32> to vector<4x4xf32>
      %c0_i32_288 = arith.constant 0 : i32
      %524 = arith.addi %311, %c0_i32_288 : i32
      %525 = arith.index_cast %524 : i32 to index
      %c5_289 = arith.constant 5 : index
      %c0_290 = arith.constant 0 : index
      %c0_291 = arith.constant 0 : index
      %526 = vector.load %arg12[%525, %c5_289, %c0_290, %c0_291] : memref<6x6x6x4xf32, #tpu.memory_space<vmem>>, vector<1x1x6x4xf32>
      %527 = vector.shape_cast %526 : vector<1x1x6x4xf32> to vector<6x4xf32>
      %528 = vector.extract_strided_slice %527 {offsets = [0, 0], sizes = [4, 4], strides = [1, 1]} : vector<6x4xf32> to vector<4x4xf32>
      %529 = vector.extract_strided_slice %527 {offsets = [1, 0], sizes = [4, 4], strides = [1, 1]} : vector<6x4xf32> to vector<4x4xf32>
      %530 = vector.extract_strided_slice %527 {offsets = [2, 0], sizes = [4, 4], strides = [1, 1]} : vector<6x4xf32> to vector<4x4xf32>
      %c1_i32_292 = arith.constant 1 : i32
      %531 = arith.addi %311, %c1_i32_292 : i32
      %532 = arith.index_cast %531 : i32 to index
      %c3_293 = arith.constant 3 : index
      %c0_294 = arith.constant 0 : index
      %c0_295 = arith.constant 0 : index
      %533 = vector.load %arg12[%532, %c3_293, %c0_294, %c0_295] : memref<6x6x6x4xf32, #tpu.memory_space<vmem>>, vector<1x1x6x4xf32>
      %534 = vector.shape_cast %533 : vector<1x1x6x4xf32> to vector<6x4xf32>
      %535 = vector.extract_strided_slice %534 {offsets = [0, 0], sizes = [4, 4], strides = [1, 1]} : vector<6x4xf32> to vector<4x4xf32>
      %536 = vector.extract_strided_slice %534 {offsets = [1, 0], sizes = [4, 4], strides = [1, 1]} : vector<6x4xf32> to vector<4x4xf32>
      %537 = vector.extract_strided_slice %534 {offsets = [2, 0], sizes = [4, 4], strides = [1, 1]} : vector<6x4xf32> to vector<4x4xf32>
      %c1_i32_296 = arith.constant 1 : i32
      %538 = arith.addi %311, %c1_i32_296 : i32
      %539 = arith.index_cast %538 : i32 to index
      %c4_297 = arith.constant 4 : index
      %c0_298 = arith.constant 0 : index
      %c0_299 = arith.constant 0 : index
      %540 = vector.load %arg12[%539, %c4_297, %c0_298, %c0_299] : memref<6x6x6x4xf32, #tpu.memory_space<vmem>>, vector<1x1x6x4xf32>
      %541 = vector.shape_cast %540 : vector<1x1x6x4xf32> to vector<6x4xf32>
      %542 = vector.extract_strided_slice %541 {offsets = [0, 0], sizes = [4, 4], strides = [1, 1]} : vector<6x4xf32> to vector<4x4xf32>
      %543 = vector.extract_strided_slice %541 {offsets = [1, 0], sizes = [4, 4], strides = [1, 1]} : vector<6x4xf32> to vector<4x4xf32>
      %544 = vector.extract_strided_slice %541 {offsets = [2, 0], sizes = [4, 4], strides = [1, 1]} : vector<6x4xf32> to vector<4x4xf32>
      %c1_i32_300 = arith.constant 1 : i32
      %545 = arith.addi %311, %c1_i32_300 : i32
      %546 = arith.index_cast %545 : i32 to index
      %c5_301 = arith.constant 5 : index
      %c0_302 = arith.constant 0 : index
      %c0_303 = arith.constant 0 : index
      %547 = vector.load %arg12[%546, %c5_301, %c0_302, %c0_303] : memref<6x6x6x4xf32, #tpu.memory_space<vmem>>, vector<1x1x6x4xf32>
      %548 = vector.shape_cast %547 : vector<1x1x6x4xf32> to vector<6x4xf32>
      %549 = vector.extract_strided_slice %548 {offsets = [0, 0], sizes = [4, 4], strides = [1, 1]} : vector<6x4xf32> to vector<4x4xf32>
      %550 = vector.extract_strided_slice %548 {offsets = [1, 0], sizes = [4, 4], strides = [1, 1]} : vector<6x4xf32> to vector<4x4xf32>
      %551 = vector.extract_strided_slice %548 {offsets = [2, 0], sizes = [4, 4], strides = [1, 1]} : vector<6x4xf32> to vector<4x4xf32>
      %c2_i32_304 = arith.constant 2 : i32
      %552 = arith.addi %311, %c2_i32_304 : i32
      %553 = arith.index_cast %552 : i32 to index
      %c3_305 = arith.constant 3 : index
      %c0_306 = arith.constant 0 : index
      %c0_307 = arith.constant 0 : index
      %554 = vector.load %arg12[%553, %c3_305, %c0_306, %c0_307] : memref<6x6x6x4xf32, #tpu.memory_space<vmem>>, vector<1x1x6x4xf32>
      %555 = vector.shape_cast %554 : vector<1x1x6x4xf32> to vector<6x4xf32>
      %556 = vector.extract_strided_slice %555 {offsets = [0, 0], sizes = [4, 4], strides = [1, 1]} : vector<6x4xf32> to vector<4x4xf32>
      %557 = vector.extract_strided_slice %555 {offsets = [1, 0], sizes = [4, 4], strides = [1, 1]} : vector<6x4xf32> to vector<4x4xf32>
      %558 = vector.extract_strided_slice %555 {offsets = [2, 0], sizes = [4, 4], strides = [1, 1]} : vector<6x4xf32> to vector<4x4xf32>
      %c2_i32_308 = arith.constant 2 : i32
      %559 = arith.addi %311, %c2_i32_308 : i32
      %560 = arith.index_cast %559 : i32 to index
      %c4_309 = arith.constant 4 : index
      %c0_310 = arith.constant 0 : index
      %c0_311 = arith.constant 0 : index
      %561 = vector.load %arg12[%560, %c4_309, %c0_310, %c0_311] : memref<6x6x6x4xf32, #tpu.memory_space<vmem>>, vector<1x1x6x4xf32>
      %562 = vector.shape_cast %561 : vector<1x1x6x4xf32> to vector<6x4xf32>
      %563 = vector.extract_strided_slice %562 {offsets = [0, 0], sizes = [4, 4], strides = [1, 1]} : vector<6x4xf32> to vector<4x4xf32>
      %564 = vector.extract_strided_slice %562 {offsets = [1, 0], sizes = [4, 4], strides = [1, 1]} : vector<6x4xf32> to vector<4x4xf32>
      %565 = vector.extract_strided_slice %562 {offsets = [2, 0], sizes = [4, 4], strides = [1, 1]} : vector<6x4xf32> to vector<4x4xf32>
      %c2_i32_312 = arith.constant 2 : i32
      %566 = arith.addi %311, %c2_i32_312 : i32
      %567 = arith.index_cast %566 : i32 to index
      %c5_313 = arith.constant 5 : index
      %c0_314 = arith.constant 0 : index
      %c0_315 = arith.constant 0 : index
      %568 = vector.load %arg12[%567, %c5_313, %c0_314, %c0_315] : memref<6x6x6x4xf32, #tpu.memory_space<vmem>>, vector<1x1x6x4xf32>
      %569 = vector.shape_cast %568 : vector<1x1x6x4xf32> to vector<6x4xf32>
      %570 = vector.extract_strided_slice %569 {offsets = [0, 0], sizes = [4, 4], strides = [1, 1]} : vector<6x4xf32> to vector<4x4xf32>
      %571 = vector.extract_strided_slice %569 {offsets = [1, 0], sizes = [4, 4], strides = [1, 1]} : vector<6x4xf32> to vector<4x4xf32>
      %572 = vector.extract_strided_slice %569 {offsets = [2, 0], sizes = [4, 4], strides = [1, 1]} : vector<6x4xf32> to vector<4x4xf32>
      %573 = tpu.concatenate %514, %515, %516, %521, %522, %523, %528, %529, %530, %535, %536, %537, %542, %543, %544, %549 in 1 : vector<4x4xf32>, vector<4x4xf32>, vector<4x4xf32>, vector<4x4xf32>, vector<4x4xf32>, vector<4x4xf32>, vector<4x4xf32>, vector<4x4xf32>, vector<4x4xf32>, vector<4x4xf32>, vector<4x4xf32>, vector<4x4xf32>, vector<4x4xf32>, vector<4x4xf32>, vector<4x4xf32>, vector<4x4xf32> -> vector<4x64xf32>
      %574 = tpu.concatenate %550, %551, %556, %557, %558, %563, %564, %565, %570, %571, %572 in 1 : vector<4x4xf32>, vector<4x4xf32>, vector<4x4xf32>, vector<4x4xf32>, vector<4x4xf32>, vector<4x4xf32>, vector<4x4xf32>, vector<4x4xf32>, vector<4x4xf32>, vector<4x4xf32>, vector<4x4xf32> -> vector<4x44xf32>
      %575 = tpu.concatenate %573, %574 in 1 : vector<4x64xf32>, vector<4x44xf32> -> vector<4x108xf32>
      %576 = tpu.concatenate %377, %443, %509, %575 in 0 : vector<4x108xf32>, vector<4x108xf32>, vector<4x108xf32>, vector<4x108xf32> -> vector<16x108xf32>
      %577 = arith.truncf %576 : vector<16x108xf32> to vector<16x108xbf16>
      %c0_316 = arith.constant 0 : index
      %c0_317 = arith.constant 0 : index
      %578 = vector.load %arg3[%c0_316, %c0_317] : memref<108x8xbf16, #tpu.memory_space<vmem>>, vector<108x8xbf16>
      %cst_318 = arith.constant dense<0.000000e+00> : vector<16x8xf32>
      %579 = tpu.matmul %577, %578, %cst_318 {dimension_numbers = #tpu.dot_dimension_numbers<[1], [0], [0], [1], [0, 0, 1, 1], [], []>} : vector<16x108xbf16>, vector<108x8xbf16>, vector<16x8xf32> -> vector<16x8xf32>
      %c0_319 = arith.constant 0 : index
      %c0_320 = arith.constant 0 : index
      %580 = vector.load %arg4[%c0_319, %c0_320] : memref<1x8xf32, #tpu.memory_space<vmem>>, vector<1x8xf32>
      %581 = vector.broadcast %580 : vector<1x8xf32> to vector<16x8xf32>
      %582 = arith.mulf %579, %581 : vector<16x8xf32>
      %c0_321 = arith.constant 0 : index
      %c0_322 = arith.constant 0 : index
      %583 = vector.load %arg5[%c0_321, %c0_322] : memref<1x8xf32, #tpu.memory_space<vmem>>, vector<1x8xf32>
      %584 = vector.broadcast %583 : vector<1x8xf32> to vector<16x8xf32>
      %585 = arith.addf %582, %584 : vector<16x8xf32>
      %cst_323 = arith.constant 0.000000e+00 : f32
      %586 = vector.broadcast %cst_323 : f32 to vector<16x8xf32>
      %587 = arith.maximumf %585, %586 : vector<16x8xf32>
      %588 = vector.extract_strided_slice %587 {offsets = [0, 0], sizes = [4, 8], strides = [1, 1]} : vector<16x8xf32> to vector<4x8xf32>
      %c1_i32_324 = arith.constant 1 : i32
      %589 = arith.addi %311, %c1_i32_324 : i32
      %590 = arith.index_cast %589 : i32 to index
      %c1_325 = arith.constant 1 : index
      %c1_326 = arith.constant 1 : index
      %c0_327 = arith.constant 0 : index
      %591 = vector.load %arg13[%590, %c1_325, %c1_326, %c0_327] : memref<6x6x6x8xf32, #tpu.memory_space<vmem>>, vector<1x1x4x8xf32>
      %592 = vector.shape_cast %591 : vector<1x1x4x8xf32> to vector<4x8xf32>
      %593 = vector.shape_cast %588 : vector<4x8xf32> to vector<1x1x4x8xf32>
      tpu.vector_store %arg13[%590, %c1_325, %c1_326, %c0_327], %593 {strides = array<i32>} : memref<6x6x6x8xf32, #tpu.memory_space<vmem>>, vector<1x1x4x8xf32>,
      %594 = vector.extract_strided_slice %587 {offsets = [4, 0], sizes = [4, 8], strides = [1, 1]} : vector<16x8xf32> to vector<4x8xf32>
      %c1_i32_328 = arith.constant 1 : i32
      %595 = arith.addi %311, %c1_i32_328 : i32
      %596 = arith.index_cast %595 : i32 to index
      %c2_329 = arith.constant 2 : index
      %c1_330 = arith.constant 1 : index
      %c0_331 = arith.constant 0 : index
      %597 = vector.load %arg13[%596, %c2_329, %c1_330, %c0_331] : memref<6x6x6x8xf32, #tpu.memory_space<vmem>>, vector<1x1x4x8xf32>
      %598 = vector.shape_cast %597 : vector<1x1x4x8xf32> to vector<4x8xf32>
      %599 = vector.shape_cast %594 : vector<4x8xf32> to vector<1x1x4x8xf32>
      tpu.vector_store %arg13[%596, %c2_329, %c1_330, %c0_331], %599 {strides = array<i32>} : memref<6x6x6x8xf32, #tpu.memory_space<vmem>>, vector<1x1x4x8xf32>,
      %600 = vector.extract_strided_slice %587 {offsets = [8, 0], sizes = [4, 8], strides = [1, 1]} : vector<16x8xf32> to vector<4x8xf32>
      %c1_i32_332 = arith.constant 1 : i32
      %601 = arith.addi %311, %c1_i32_332 : i32
      %602 = arith.index_cast %601 : i32 to index
      %c3_333 = arith.constant 3 : index
      %c1_334 = arith.constant 1 : index
      %c0_335 = arith.constant 0 : index
      %603 = vector.load %arg13[%602, %c3_333, %c1_334, %c0_335] : memref<6x6x6x8xf32, #tpu.memory_space<vmem>>, vector<1x1x4x8xf32>
      %604 = vector.shape_cast %603 : vector<1x1x4x8xf32> to vector<4x8xf32>
      %605 = vector.shape_cast %600 : vector<4x8xf32> to vector<1x1x4x8xf32>
      tpu.vector_store %arg13[%602, %c3_333, %c1_334, %c0_335], %605 {strides = array<i32>} : memref<6x6x6x8xf32, #tpu.memory_space<vmem>>, vector<1x1x4x8xf32>,
      %606 = vector.extract_strided_slice %587 {offsets = [12, 0], sizes = [4, 8], strides = [1, 1]} : vector<16x8xf32> to vector<4x8xf32>
      %c1_i32_336 = arith.constant 1 : i32
      %607 = arith.addi %311, %c1_i32_336 : i32
      %608 = arith.index_cast %607 : i32 to index
      %c4_337 = arith.constant 4 : index
      %c1_338 = arith.constant 1 : index
      %c0_339 = arith.constant 0 : index
      %609 = vector.load %arg13[%608, %c4_337, %c1_338, %c0_339] : memref<6x6x6x8xf32, #tpu.memory_space<vmem>>, vector<1x1x4x8xf32>
      %610 = vector.shape_cast %609 : vector<1x1x4x8xf32> to vector<4x8xf32>
      %611 = vector.shape_cast %606 : vector<4x8xf32> to vector<1x1x4x8xf32>
      tpu.vector_store %arg13[%608, %c4_337, %c1_338, %c0_339], %611 {strides = array<i32>} : memref<6x6x6x8xf32, #tpu.memory_space<vmem>>, vector<1x1x4x8xf32>,
    } else {
    }
    %c0_i32_2 = arith.constant 0 : i32
    %7 = arith.addi %arg1, %c0_i32_2 : i32
    %8 = arith.index_cast %7 : i32 to index
    %c0 = arith.constant 0 : index
    %c0_3 = arith.constant 0 : index
    %c0_4 = arith.constant 0 : index
    %9 = vector.load %arg13[%8, %c0, %c0_3, %c0_4] : memref<6x6x6x8xf32, #tpu.memory_space<vmem>>, vector<1x1x6x8xf32>
    %10 = vector.shape_cast %9 : vector<1x1x6x8xf32> to vector<6x8xf32>
    %11 = vector.extract_strided_slice %10 {offsets = [0, 0], sizes = [4, 8], strides = [1, 1]} : vector<6x8xf32> to vector<4x8xf32>
    %12 = vector.extract_strided_slice %10 {offsets = [1, 0], sizes = [4, 8], strides = [1, 1]} : vector<6x8xf32> to vector<4x8xf32>
    %13 = vector.extract_strided_slice %10 {offsets = [2, 0], sizes = [4, 8], strides = [1, 1]} : vector<6x8xf32> to vector<4x8xf32>
    %c0_i32_5 = arith.constant 0 : i32
    %14 = arith.addi %arg1, %c0_i32_5 : i32
    %15 = arith.index_cast %14 : i32 to index
    %c1 = arith.constant 1 : index
    %c0_6 = arith.constant 0 : index
    %c0_7 = arith.constant 0 : index
    %16 = vector.load %arg13[%15, %c1, %c0_6, %c0_7] : memref<6x6x6x8xf32, #tpu.memory_space<vmem>>, vector<1x1x6x8xf32>
    %17 = vector.shape_cast %16 : vector<1x1x6x8xf32> to vector<6x8xf32>
    %18 = vector.extract_strided_slice %17 {offsets = [0, 0], sizes = [4, 8], strides = [1, 1]} : vector<6x8xf32> to vector<4x8xf32>
    %19 = vector.extract_strided_slice %17 {offsets = [1, 0], sizes = [4, 8], strides = [1, 1]} : vector<6x8xf32> to vector<4x8xf32>
    %20 = vector.extract_strided_slice %17 {offsets = [2, 0], sizes = [4, 8], strides = [1, 1]} : vector<6x8xf32> to vector<4x8xf32>
    %c0_i32_8 = arith.constant 0 : i32
    %21 = arith.addi %arg1, %c0_i32_8 : i32
    %22 = arith.index_cast %21 : i32 to index
    %c2 = arith.constant 2 : index
    %c0_9 = arith.constant 0 : index
    %c0_10 = arith.constant 0 : index
    %23 = vector.load %arg13[%22, %c2, %c0_9, %c0_10] : memref<6x6x6x8xf32, #tpu.memory_space<vmem>>, vector<1x1x6x8xf32>
    %24 = vector.shape_cast %23 : vector<1x1x6x8xf32> to vector<6x8xf32>
    %25 = vector.extract_strided_slice %24 {offsets = [0, 0], sizes = [4, 8], strides = [1, 1]} : vector<6x8xf32> to vector<4x8xf32>
    %26 = vector.extract_strided_slice %24 {offsets = [1, 0], sizes = [4, 8], strides = [1, 1]} : vector<6x8xf32> to vector<4x8xf32>
    %27 = vector.extract_strided_slice %24 {offsets = [2, 0], sizes = [4, 8], strides = [1, 1]} : vector<6x8xf32> to vector<4x8xf32>
    %c1_i32_11 = arith.constant 1 : i32
    %28 = arith.addi %arg1, %c1_i32_11 : i32
    %29 = arith.index_cast %28 : i32 to index
    %c0_12 = arith.constant 0 : index
    %c0_13 = arith.constant 0 : index
    %c0_14 = arith.constant 0 : index
    %30 = vector.load %arg13[%29, %c0_12, %c0_13, %c0_14] : memref<6x6x6x8xf32, #tpu.memory_space<vmem>>, vector<1x1x6x8xf32>
    %31 = vector.shape_cast %30 : vector<1x1x6x8xf32> to vector<6x8xf32>
    %32 = vector.extract_strided_slice %31 {offsets = [0, 0], sizes = [4, 8], strides = [1, 1]} : vector<6x8xf32> to vector<4x8xf32>
    %33 = vector.extract_strided_slice %31 {offsets = [1, 0], sizes = [4, 8], strides = [1, 1]} : vector<6x8xf32> to vector<4x8xf32>
    %34 = vector.extract_strided_slice %31 {offsets = [2, 0], sizes = [4, 8], strides = [1, 1]} : vector<6x8xf32> to vector<4x8xf32>
    %c1_i32_15 = arith.constant 1 : i32
    %35 = arith.addi %arg1, %c1_i32_15 : i32
    %36 = arith.index_cast %35 : i32 to index
    %c1_16 = arith.constant 1 : index
    %c0_17 = arith.constant 0 : index
    %c0_18 = arith.constant 0 : index
    %37 = vector.load %arg13[%36, %c1_16, %c0_17, %c0_18] : memref<6x6x6x8xf32, #tpu.memory_space<vmem>>, vector<1x1x6x8xf32>
    %38 = vector.shape_cast %37 : vector<1x1x6x8xf32> to vector<6x8xf32>
    %39 = vector.extract_strided_slice %38 {offsets = [0, 0], sizes = [4, 8], strides = [1, 1]} : vector<6x8xf32> to vector<4x8xf32>
    %40 = vector.extract_strided_slice %38 {offsets = [1, 0], sizes = [4, 8], strides = [1, 1]} : vector<6x8xf32> to vector<4x8xf32>
    %41 = vector.extract_strided_slice %38 {offsets = [2, 0], sizes = [4, 8], strides = [1, 1]} : vector<6x8xf32> to vector<4x8xf32>
    %c1_i32_19 = arith.constant 1 : i32
    %42 = arith.addi %arg1, %c1_i32_19 : i32
    %43 = arith.index_cast %42 : i32 to index
    %c2_20 = arith.constant 2 : index
    %c0_21 = arith.constant 0 : index
    %c0_22 = arith.constant 0 : index
    %44 = vector.load %arg13[%43, %c2_20, %c0_21, %c0_22] : memref<6x6x6x8xf32, #tpu.memory_space<vmem>>, vector<1x1x6x8xf32>
    %45 = vector.shape_cast %44 : vector<1x1x6x8xf32> to vector<6x8xf32>
    %46 = vector.extract_strided_slice %45 {offsets = [0, 0], sizes = [4, 8], strides = [1, 1]} : vector<6x8xf32> to vector<4x8xf32>
    %47 = vector.extract_strided_slice %45 {offsets = [1, 0], sizes = [4, 8], strides = [1, 1]} : vector<6x8xf32> to vector<4x8xf32>
    %48 = vector.extract_strided_slice %45 {offsets = [2, 0], sizes = [4, 8], strides = [1, 1]} : vector<6x8xf32> to vector<4x8xf32>
    %c2_i32 = arith.constant 2 : i32
    %49 = arith.addi %arg1, %c2_i32 : i32
    %50 = arith.index_cast %49 : i32 to index
    %c0_23 = arith.constant 0 : index
    %c0_24 = arith.constant 0 : index
    %c0_25 = arith.constant 0 : index
    %51 = vector.load %arg13[%50, %c0_23, %c0_24, %c0_25] : memref<6x6x6x8xf32, #tpu.memory_space<vmem>>, vector<1x1x6x8xf32>
    %52 = vector.shape_cast %51 : vector<1x1x6x8xf32> to vector<6x8xf32>
    %53 = vector.extract_strided_slice %52 {offsets = [0, 0], sizes = [4, 8], strides = [1, 1]} : vector<6x8xf32> to vector<4x8xf32>
    %54 = vector.extract_strided_slice %52 {offsets = [1, 0], sizes = [4, 8], strides = [1, 1]} : vector<6x8xf32> to vector<4x8xf32>
    %55 = vector.extract_strided_slice %52 {offsets = [2, 0], sizes = [4, 8], strides = [1, 1]} : vector<6x8xf32> to vector<4x8xf32>
    %c2_i32_26 = arith.constant 2 : i32
    %56 = arith.addi %arg1, %c2_i32_26 : i32
    %57 = arith.index_cast %56 : i32 to index
    %c1_27 = arith.constant 1 : index
    %c0_28 = arith.constant 0 : index
    %c0_29 = arith.constant 0 : index
    %58 = vector.load %arg13[%57, %c1_27, %c0_28, %c0_29] : memref<6x6x6x8xf32, #tpu.memory_space<vmem>>, vector<1x1x6x8xf32>
    %59 = vector.shape_cast %58 : vector<1x1x6x8xf32> to vector<6x8xf32>
    %60 = vector.extract_strided_slice %59 {offsets = [0, 0], sizes = [4, 8], strides = [1, 1]} : vector<6x8xf32> to vector<4x8xf32>
    %61 = vector.extract_strided_slice %59 {offsets = [1, 0], sizes = [4, 8], strides = [1, 1]} : vector<6x8xf32> to vector<4x8xf32>
    %62 = vector.extract_strided_slice %59 {offsets = [2, 0], sizes = [4, 8], strides = [1, 1]} : vector<6x8xf32> to vector<4x8xf32>
    %c2_i32_30 = arith.constant 2 : i32
    %63 = arith.addi %arg1, %c2_i32_30 : i32
    %64 = arith.index_cast %63 : i32 to index
    %c2_31 = arith.constant 2 : index
    %c0_32 = arith.constant 0 : index
    %c0_33 = arith.constant 0 : index
    %65 = vector.load %arg13[%64, %c2_31, %c0_32, %c0_33] : memref<6x6x6x8xf32, #tpu.memory_space<vmem>>, vector<1x1x6x8xf32>
    %66 = vector.shape_cast %65 : vector<1x1x6x8xf32> to vector<6x8xf32>
    %67 = vector.extract_strided_slice %66 {offsets = [0, 0], sizes = [4, 8], strides = [1, 1]} : vector<6x8xf32> to vector<4x8xf32>
    %68 = vector.extract_strided_slice %66 {offsets = [1, 0], sizes = [4, 8], strides = [1, 1]} : vector<6x8xf32> to vector<4x8xf32>
    %69 = vector.extract_strided_slice %66 {offsets = [2, 0], sizes = [4, 8], strides = [1, 1]} : vector<6x8xf32> to vector<4x8xf32>
    %70 = tpu.concatenate %11, %12, %13, %18, %19, %20, %25, %26, %27, %32, %33, %34, %39, %40, %41, %46 in 1 : vector<4x8xf32>, vector<4x8xf32>, vector<4x8xf32>, vector<4x8xf32>, vector<4x8xf32>, vector<4x8xf32>, vector<4x8xf32>, vector<4x8xf32>, vector<4x8xf32>, vector<4x8xf32>, vector<4x8xf32>, vector<4x8xf32>, vector<4x8xf32>, vector<4x8xf32>, vector<4x8xf32>, vector<4x8xf32> -> vector<4x128xf32>
    %71 = tpu.concatenate %47, %48, %53, %54, %55, %60, %61, %62, %67, %68, %69 in 1 : vector<4x8xf32>, vector<4x8xf32>, vector<4x8xf32>, vector<4x8xf32>, vector<4x8xf32>, vector<4x8xf32>, vector<4x8xf32>, vector<4x8xf32>, vector<4x8xf32>, vector<4x8xf32>, vector<4x8xf32> -> vector<4x88xf32>
    %72 = tpu.concatenate %70, %71 in 1 : vector<4x128xf32>, vector<4x88xf32> -> vector<4x216xf32>
    %c0_i32_34 = arith.constant 0 : i32
    %73 = arith.addi %arg1, %c0_i32_34 : i32
    %74 = arith.index_cast %73 : i32 to index
    %c1_35 = arith.constant 1 : index
    %c0_36 = arith.constant 0 : index
    %c0_37 = arith.constant 0 : index
    %75 = vector.load %arg13[%74, %c1_35, %c0_36, %c0_37] : memref<6x6x6x8xf32, #tpu.memory_space<vmem>>, vector<1x1x6x8xf32>
    %76 = vector.shape_cast %75 : vector<1x1x6x8xf32> to vector<6x8xf32>
    %77 = vector.extract_strided_slice %76 {offsets = [0, 0], sizes = [4, 8], strides = [1, 1]} : vector<6x8xf32> to vector<4x8xf32>
    %78 = vector.extract_strided_slice %76 {offsets = [1, 0], sizes = [4, 8], strides = [1, 1]} : vector<6x8xf32> to vector<4x8xf32>
    %79 = vector.extract_strided_slice %76 {offsets = [2, 0], sizes = [4, 8], strides = [1, 1]} : vector<6x8xf32> to vector<4x8xf32>
    %c0_i32_38 = arith.constant 0 : i32
    %80 = arith.addi %arg1, %c0_i32_38 : i32
    %81 = arith.index_cast %80 : i32 to index
    %c2_39 = arith.constant 2 : index
    %c0_40 = arith.constant 0 : index
    %c0_41 = arith.constant 0 : index
    %82 = vector.load %arg13[%81, %c2_39, %c0_40, %c0_41] : memref<6x6x6x8xf32, #tpu.memory_space<vmem>>, vector<1x1x6x8xf32>
    %83 = vector.shape_cast %82 : vector<1x1x6x8xf32> to vector<6x8xf32>
    %84 = vector.extract_strided_slice %83 {offsets = [0, 0], sizes = [4, 8], strides = [1, 1]} : vector<6x8xf32> to vector<4x8xf32>
    %85 = vector.extract_strided_slice %83 {offsets = [1, 0], sizes = [4, 8], strides = [1, 1]} : vector<6x8xf32> to vector<4x8xf32>
    %86 = vector.extract_strided_slice %83 {offsets = [2, 0], sizes = [4, 8], strides = [1, 1]} : vector<6x8xf32> to vector<4x8xf32>
    %c0_i32_42 = arith.constant 0 : i32
    %87 = arith.addi %arg1, %c0_i32_42 : i32
    %88 = arith.index_cast %87 : i32 to index
    %c3 = arith.constant 3 : index
    %c0_43 = arith.constant 0 : index
    %c0_44 = arith.constant 0 : index
    %89 = vector.load %arg13[%88, %c3, %c0_43, %c0_44] : memref<6x6x6x8xf32, #tpu.memory_space<vmem>>, vector<1x1x6x8xf32>
    %90 = vector.shape_cast %89 : vector<1x1x6x8xf32> to vector<6x8xf32>
    %91 = vector.extract_strided_slice %90 {offsets = [0, 0], sizes = [4, 8], strides = [1, 1]} : vector<6x8xf32> to vector<4x8xf32>
    %92 = vector.extract_strided_slice %90 {offsets = [1, 0], sizes = [4, 8], strides = [1, 1]} : vector<6x8xf32> to vector<4x8xf32>
    %93 = vector.extract_strided_slice %90 {offsets = [2, 0], sizes = [4, 8], strides = [1, 1]} : vector<6x8xf32> to vector<4x8xf32>
    %c1_i32_45 = arith.constant 1 : i32
    %94 = arith.addi %arg1, %c1_i32_45 : i32
    %95 = arith.index_cast %94 : i32 to index
    %c1_46 = arith.constant 1 : index
    %c0_47 = arith.constant 0 : index
    %c0_48 = arith.constant 0 : index
    %96 = vector.load %arg13[%95, %c1_46, %c0_47, %c0_48] : memref<6x6x6x8xf32, #tpu.memory_space<vmem>>, vector<1x1x6x8xf32>
    %97 = vector.shape_cast %96 : vector<1x1x6x8xf32> to vector<6x8xf32>
    %98 = vector.extract_strided_slice %97 {offsets = [0, 0], sizes = [4, 8], strides = [1, 1]} : vector<6x8xf32> to vector<4x8xf32>
    %99 = vector.extract_strided_slice %97 {offsets = [1, 0], sizes = [4, 8], strides = [1, 1]} : vector<6x8xf32> to vector<4x8xf32>
    %100 = vector.extract_strided_slice %97 {offsets = [2, 0], sizes = [4, 8], strides = [1, 1]} : vector<6x8xf32> to vector<4x8xf32>
    %c1_i32_49 = arith.constant 1 : i32
    %101 = arith.addi %arg1, %c1_i32_49 : i32
    %102 = arith.index_cast %101 : i32 to index
    %c2_50 = arith.constant 2 : index
    %c0_51 = arith.constant 0 : index
    %c0_52 = arith.constant 0 : index
    %103 = vector.load %arg13[%102, %c2_50, %c0_51, %c0_52] : memref<6x6x6x8xf32, #tpu.memory_space<vmem>>, vector<1x1x6x8xf32>
    %104 = vector.shape_cast %103 : vector<1x1x6x8xf32> to vector<6x8xf32>
    %105 = vector.extract_strided_slice %104 {offsets = [0, 0], sizes = [4, 8], strides = [1, 1]} : vector<6x8xf32> to vector<4x8xf32>
    %106 = vector.extract_strided_slice %104 {offsets = [1, 0], sizes = [4, 8], strides = [1, 1]} : vector<6x8xf32> to vector<4x8xf32>
    %107 = vector.extract_strided_slice %104 {offsets = [2, 0], sizes = [4, 8], strides = [1, 1]} : vector<6x8xf32> to vector<4x8xf32>
    %c1_i32_53 = arith.constant 1 : i32
    %108 = arith.addi %arg1, %c1_i32_53 : i32
    %109 = arith.index_cast %108 : i32 to index
    %c3_54 = arith.constant 3 : index
    %c0_55 = arith.constant 0 : index
    %c0_56 = arith.constant 0 : index
    %110 = vector.load %arg13[%109, %c3_54, %c0_55, %c0_56] : memref<6x6x6x8xf32, #tpu.memory_space<vmem>>, vector<1x1x6x8xf32>
    %111 = vector.shape_cast %110 : vector<1x1x6x8xf32> to vector<6x8xf32>
    %112 = vector.extract_strided_slice %111 {offsets = [0, 0], sizes = [4, 8], strides = [1, 1]} : vector<6x8xf32> to vector<4x8xf32>
    %113 = vector.extract_strided_slice %111 {offsets = [1, 0], sizes = [4, 8], strides = [1, 1]} : vector<6x8xf32> to vector<4x8xf32>
    %114 = vector.extract_strided_slice %111 {offsets = [2, 0], sizes = [4, 8], strides = [1, 1]} : vector<6x8xf32> to vector<4x8xf32>
    %c2_i32_57 = arith.constant 2 : i32
    %115 = arith.addi %arg1, %c2_i32_57 : i32
    %116 = arith.index_cast %115 : i32 to index
    %c1_58 = arith.constant 1 : index
    %c0_59 = arith.constant 0 : index
    %c0_60 = arith.constant 0 : index
    %117 = vector.load %arg13[%116, %c1_58, %c0_59, %c0_60] : memref<6x6x6x8xf32, #tpu.memory_space<vmem>>, vector<1x1x6x8xf32>
    %118 = vector.shape_cast %117 : vector<1x1x6x8xf32> to vector<6x8xf32>
    %119 = vector.extract_strided_slice %118 {offsets = [0, 0], sizes = [4, 8], strides = [1, 1]} : vector<6x8xf32> to vector<4x8xf32>
    %120 = vector.extract_strided_slice %118 {offsets = [1, 0], sizes = [4, 8], strides = [1, 1]} : vector<6x8xf32> to vector<4x8xf32>
    %121 = vector.extract_strided_slice %118 {offsets = [2, 0], sizes = [4, 8], strides = [1, 1]} : vector<6x8xf32> to vector<4x8xf32>
    %c2_i32_61 = arith.constant 2 : i32
    %122 = arith.addi %arg1, %c2_i32_61 : i32
    %123 = arith.index_cast %122 : i32 to index
    %c2_62 = arith.constant 2 : index
    %c0_63 = arith.constant 0 : index
    %c0_64 = arith.constant 0 : index
    %124 = vector.load %arg13[%123, %c2_62, %c0_63, %c0_64] : memref<6x6x6x8xf32, #tpu.memory_space<vmem>>, vector<1x1x6x8xf32>
    %125 = vector.shape_cast %124 : vector<1x1x6x8xf32> to vector<6x8xf32>
    %126 = vector.extract_strided_slice %125 {offsets = [0, 0], sizes = [4, 8], strides = [1, 1]} : vector<6x8xf32> to vector<4x8xf32>
    %127 = vector.extract_strided_slice %125 {offsets = [1, 0], sizes = [4, 8], strides = [1, 1]} : vector<6x8xf32> to vector<4x8xf32>
    %128 = vector.extract_strided_slice %125 {offsets = [2, 0], sizes = [4, 8], strides = [1, 1]} : vector<6x8xf32> to vector<4x8xf32>
    %c2_i32_65 = arith.constant 2 : i32
    %129 = arith.addi %arg1, %c2_i32_65 : i32
    %130 = arith.index_cast %129 : i32 to index
    %c3_66 = arith.constant 3 : index
    %c0_67 = arith.constant 0 : index
    %c0_68 = arith.constant 0 : index
    %131 = vector.load %arg13[%130, %c3_66, %c0_67, %c0_68] : memref<6x6x6x8xf32, #tpu.memory_space<vmem>>, vector<1x1x6x8xf32>
    %132 = vector.shape_cast %131 : vector<1x1x6x8xf32> to vector<6x8xf32>
    %133 = vector.extract_strided_slice %132 {offsets = [0, 0], sizes = [4, 8], strides = [1, 1]} : vector<6x8xf32> to vector<4x8xf32>
    %134 = vector.extract_strided_slice %132 {offsets = [1, 0], sizes = [4, 8], strides = [1, 1]} : vector<6x8xf32> to vector<4x8xf32>
    %135 = vector.extract_strided_slice %132 {offsets = [2, 0], sizes = [4, 8], strides = [1, 1]} : vector<6x8xf32> to vector<4x8xf32>
    %136 = tpu.concatenate %77, %78, %79, %84, %85, %86, %91, %92, %93, %98, %99, %100, %105, %106, %107, %112 in 1 : vector<4x8xf32>, vector<4x8xf32>, vector<4x8xf32>, vector<4x8xf32>, vector<4x8xf32>, vector<4x8xf32>, vector<4x8xf32>, vector<4x8xf32>, vector<4x8xf32>, vector<4x8xf32>, vector<4x8xf32>, vector<4x8xf32>, vector<4x8xf32>, vector<4x8xf32>, vector<4x8xf32>, vector<4x8xf32> -> vector<4x128xf32>
    %137 = tpu.concatenate %113, %114, %119, %120, %121, %126, %127, %128, %133, %134, %135 in 1 : vector<4x8xf32>, vector<4x8xf32>, vector<4x8xf32>, vector<4x8xf32>, vector<4x8xf32>, vector<4x8xf32>, vector<4x8xf32>, vector<4x8xf32>, vector<4x8xf32>, vector<4x8xf32>, vector<4x8xf32> -> vector<4x88xf32>
    %138 = tpu.concatenate %136, %137 in 1 : vector<4x128xf32>, vector<4x88xf32> -> vector<4x216xf32>
    %c0_i32_69 = arith.constant 0 : i32
    %139 = arith.addi %arg1, %c0_i32_69 : i32
    %140 = arith.index_cast %139 : i32 to index
    %c2_70 = arith.constant 2 : index
    %c0_71 = arith.constant 0 : index
    %c0_72 = arith.constant 0 : index
    %141 = vector.load %arg13[%140, %c2_70, %c0_71, %c0_72] : memref<6x6x6x8xf32, #tpu.memory_space<vmem>>, vector<1x1x6x8xf32>
    %142 = vector.shape_cast %141 : vector<1x1x6x8xf32> to vector<6x8xf32>
    %143 = vector.extract_strided_slice %142 {offsets = [0, 0], sizes = [4, 8], strides = [1, 1]} : vector<6x8xf32> to vector<4x8xf32>
    %144 = vector.extract_strided_slice %142 {offsets = [1, 0], sizes = [4, 8], strides = [1, 1]} : vector<6x8xf32> to vector<4x8xf32>
    %145 = vector.extract_strided_slice %142 {offsets = [2, 0], sizes = [4, 8], strides = [1, 1]} : vector<6x8xf32> to vector<4x8xf32>
    %c0_i32_73 = arith.constant 0 : i32
    %146 = arith.addi %arg1, %c0_i32_73 : i32
    %147 = arith.index_cast %146 : i32 to index
    %c3_74 = arith.constant 3 : index
    %c0_75 = arith.constant 0 : index
    %c0_76 = arith.constant 0 : index
    %148 = vector.load %arg13[%147, %c3_74, %c0_75, %c0_76] : memref<6x6x6x8xf32, #tpu.memory_space<vmem>>, vector<1x1x6x8xf32>
    %149 = vector.shape_cast %148 : vector<1x1x6x8xf32> to vector<6x8xf32>
    %150 = vector.extract_strided_slice %149 {offsets = [0, 0], sizes = [4, 8], strides = [1, 1]} : vector<6x8xf32> to vector<4x8xf32>
    %151 = vector.extract_strided_slice %149 {offsets = [1, 0], sizes = [4, 8], strides = [1, 1]} : vector<6x8xf32> to vector<4x8xf32>
    %152 = vector.extract_strided_slice %149 {offsets = [2, 0], sizes = [4, 8], strides = [1, 1]} : vector<6x8xf32> to vector<4x8xf32>
    %c0_i32_77 = arith.constant 0 : i32
    %153 = arith.addi %arg1, %c0_i32_77 : i32
    %154 = arith.index_cast %153 : i32 to index
    %c4 = arith.constant 4 : index
    %c0_78 = arith.constant 0 : index
    %c0_79 = arith.constant 0 : index
    %155 = vector.load %arg13[%154, %c4, %c0_78, %c0_79] : memref<6x6x6x8xf32, #tpu.memory_space<vmem>>, vector<1x1x6x8xf32>
    %156 = vector.shape_cast %155 : vector<1x1x6x8xf32> to vector<6x8xf32>
    %157 = vector.extract_strided_slice %156 {offsets = [0, 0], sizes = [4, 8], strides = [1, 1]} : vector<6x8xf32> to vector<4x8xf32>
    %158 = vector.extract_strided_slice %156 {offsets = [1, 0], sizes = [4, 8], strides = [1, 1]} : vector<6x8xf32> to vector<4x8xf32>
    %159 = vector.extract_strided_slice %156 {offsets = [2, 0], sizes = [4, 8], strides = [1, 1]} : vector<6x8xf32> to vector<4x8xf32>
    %c1_i32_80 = arith.constant 1 : i32
    %160 = arith.addi %arg1, %c1_i32_80 : i32
    %161 = arith.index_cast %160 : i32 to index
    %c2_81 = arith.constant 2 : index
    %c0_82 = arith.constant 0 : index
    %c0_83 = arith.constant 0 : index
    %162 = vector.load %arg13[%161, %c2_81, %c0_82, %c0_83] : memref<6x6x6x8xf32, #tpu.memory_space<vmem>>, vector<1x1x6x8xf32>
    %163 = vector.shape_cast %162 : vector<1x1x6x8xf32> to vector<6x8xf32>
    %164 = vector.extract_strided_slice %163 {offsets = [0, 0], sizes = [4, 8], strides = [1, 1]} : vector<6x8xf32> to vector<4x8xf32>
    %165 = vector.extract_strided_slice %163 {offsets = [1, 0], sizes = [4, 8], strides = [1, 1]} : vector<6x8xf32> to vector<4x8xf32>
    %166 = vector.extract_strided_slice %163 {offsets = [2, 0], sizes = [4, 8], strides = [1, 1]} : vector<6x8xf32> to vector<4x8xf32>
    %c1_i32_84 = arith.constant 1 : i32
    %167 = arith.addi %arg1, %c1_i32_84 : i32
    %168 = arith.index_cast %167 : i32 to index
    %c3_85 = arith.constant 3 : index
    %c0_86 = arith.constant 0 : index
    %c0_87 = arith.constant 0 : index
    %169 = vector.load %arg13[%168, %c3_85, %c0_86, %c0_87] : memref<6x6x6x8xf32, #tpu.memory_space<vmem>>, vector<1x1x6x8xf32>
    %170 = vector.shape_cast %169 : vector<1x1x6x8xf32> to vector<6x8xf32>
    %171 = vector.extract_strided_slice %170 {offsets = [0, 0], sizes = [4, 8], strides = [1, 1]} : vector<6x8xf32> to vector<4x8xf32>
    %172 = vector.extract_strided_slice %170 {offsets = [1, 0], sizes = [4, 8], strides = [1, 1]} : vector<6x8xf32> to vector<4x8xf32>
    %173 = vector.extract_strided_slice %170 {offsets = [2, 0], sizes = [4, 8], strides = [1, 1]} : vector<6x8xf32> to vector<4x8xf32>
    %c1_i32_88 = arith.constant 1 : i32
    %174 = arith.addi %arg1, %c1_i32_88 : i32
    %175 = arith.index_cast %174 : i32 to index
    %c4_89 = arith.constant 4 : index
    %c0_90 = arith.constant 0 : index
    %c0_91 = arith.constant 0 : index
    %176 = vector.load %arg13[%175, %c4_89, %c0_90, %c0_91] : memref<6x6x6x8xf32, #tpu.memory_space<vmem>>, vector<1x1x6x8xf32>
    %177 = vector.shape_cast %176 : vector<1x1x6x8xf32> to vector<6x8xf32>
    %178 = vector.extract_strided_slice %177 {offsets = [0, 0], sizes = [4, 8], strides = [1, 1]} : vector<6x8xf32> to vector<4x8xf32>
    %179 = vector.extract_strided_slice %177 {offsets = [1, 0], sizes = [4, 8], strides = [1, 1]} : vector<6x8xf32> to vector<4x8xf32>
    %180 = vector.extract_strided_slice %177 {offsets = [2, 0], sizes = [4, 8], strides = [1, 1]} : vector<6x8xf32> to vector<4x8xf32>
    %c2_i32_92 = arith.constant 2 : i32
    %181 = arith.addi %arg1, %c2_i32_92 : i32
    %182 = arith.index_cast %181 : i32 to index
    %c2_93 = arith.constant 2 : index
    %c0_94 = arith.constant 0 : index
    %c0_95 = arith.constant 0 : index
    %183 = vector.load %arg13[%182, %c2_93, %c0_94, %c0_95] : memref<6x6x6x8xf32, #tpu.memory_space<vmem>>, vector<1x1x6x8xf32>
    %184 = vector.shape_cast %183 : vector<1x1x6x8xf32> to vector<6x8xf32>
    %185 = vector.extract_strided_slice %184 {offsets = [0, 0], sizes = [4, 8], strides = [1, 1]} : vector<6x8xf32> to vector<4x8xf32>
    %186 = vector.extract_strided_slice %184 {offsets = [1, 0], sizes = [4, 8], strides = [1, 1]} : vector<6x8xf32> to vector<4x8xf32>
    %187 = vector.extract_strided_slice %184 {offsets = [2, 0], sizes = [4, 8], strides = [1, 1]} : vector<6x8xf32> to vector<4x8xf32>
    %c2_i32_96 = arith.constant 2 : i32
    %188 = arith.addi %arg1, %c2_i32_96 : i32
    %189 = arith.index_cast %188 : i32 to index
    %c3_97 = arith.constant 3 : index
    %c0_98 = arith.constant 0 : index
    %c0_99 = arith.constant 0 : index
    %190 = vector.load %arg13[%189, %c3_97, %c0_98, %c0_99] : memref<6x6x6x8xf32, #tpu.memory_space<vmem>>, vector<1x1x6x8xf32>
    %191 = vector.shape_cast %190 : vector<1x1x6x8xf32> to vector<6x8xf32>
    %192 = vector.extract_strided_slice %191 {offsets = [0, 0], sizes = [4, 8], strides = [1, 1]} : vector<6x8xf32> to vector<4x8xf32>
    %193 = vector.extract_strided_slice %191 {offsets = [1, 0], sizes = [4, 8], strides = [1, 1]} : vector<6x8xf32> to vector<4x8xf32>
    %194 = vector.extract_strided_slice %191 {offsets = [2, 0], sizes = [4, 8], strides = [1, 1]} : vector<6x8xf32> to vector<4x8xf32>
    %c2_i32_100 = arith.constant 2 : i32
    %195 = arith.addi %arg1, %c2_i32_100 : i32
    %196 = arith.index_cast %195 : i32 to index
    %c4_101 = arith.constant 4 : index
    %c0_102 = arith.constant 0 : index
    %c0_103 = arith.constant 0 : index
    %197 = vector.load %arg13[%196, %c4_101, %c0_102, %c0_103] : memref<6x6x6x8xf32, #tpu.memory_space<vmem>>, vector<1x1x6x8xf32>
    %198 = vector.shape_cast %197 : vector<1x1x6x8xf32> to vector<6x8xf32>
    %199 = vector.extract_strided_slice %198 {offsets = [0, 0], sizes = [4, 8], strides = [1, 1]} : vector<6x8xf32> to vector<4x8xf32>
    %200 = vector.extract_strided_slice %198 {offsets = [1, 0], sizes = [4, 8], strides = [1, 1]} : vector<6x8xf32> to vector<4x8xf32>
    %201 = vector.extract_strided_slice %198 {offsets = [2, 0], sizes = [4, 8], strides = [1, 1]} : vector<6x8xf32> to vector<4x8xf32>
    %202 = tpu.concatenate %143, %144, %145, %150, %151, %152, %157, %158, %159, %164, %165, %166, %171, %172, %173, %178 in 1 : vector<4x8xf32>, vector<4x8xf32>, vector<4x8xf32>, vector<4x8xf32>, vector<4x8xf32>, vector<4x8xf32>, vector<4x8xf32>, vector<4x8xf32>, vector<4x8xf32>, vector<4x8xf32>, vector<4x8xf32>, vector<4x8xf32>, vector<4x8xf32>, vector<4x8xf32>, vector<4x8xf32>, vector<4x8xf32> -> vector<4x128xf32>
    %203 = tpu.concatenate %179, %180, %185, %186, %187, %192, %193, %194, %199, %200, %201 in 1 : vector<4x8xf32>, vector<4x8xf32>, vector<4x8xf32>, vector<4x8xf32>, vector<4x8xf32>, vector<4x8xf32>, vector<4x8xf32>, vector<4x8xf32>, vector<4x8xf32>, vector<4x8xf32>, vector<4x8xf32> -> vector<4x88xf32>
    %204 = tpu.concatenate %202, %203 in 1 : vector<4x128xf32>, vector<4x88xf32> -> vector<4x216xf32>
    %c0_i32_104 = arith.constant 0 : i32
    %205 = arith.addi %arg1, %c0_i32_104 : i32
    %206 = arith.index_cast %205 : i32 to index
    %c3_105 = arith.constant 3 : index
    %c0_106 = arith.constant 0 : index
    %c0_107 = arith.constant 0 : index
    %207 = vector.load %arg13[%206, %c3_105, %c0_106, %c0_107] : memref<6x6x6x8xf32, #tpu.memory_space<vmem>>, vector<1x1x6x8xf32>
    %208 = vector.shape_cast %207 : vector<1x1x6x8xf32> to vector<6x8xf32>
    %209 = vector.extract_strided_slice %208 {offsets = [0, 0], sizes = [4, 8], strides = [1, 1]} : vector<6x8xf32> to vector<4x8xf32>
    %210 = vector.extract_strided_slice %208 {offsets = [1, 0], sizes = [4, 8], strides = [1, 1]} : vector<6x8xf32> to vector<4x8xf32>
    %211 = vector.extract_strided_slice %208 {offsets = [2, 0], sizes = [4, 8], strides = [1, 1]} : vector<6x8xf32> to vector<4x8xf32>
    %c0_i32_108 = arith.constant 0 : i32
    %212 = arith.addi %arg1, %c0_i32_108 : i32
    %213 = arith.index_cast %212 : i32 to index
    %c4_109 = arith.constant 4 : index
    %c0_110 = arith.constant 0 : index
    %c0_111 = arith.constant 0 : index
    %214 = vector.load %arg13[%213, %c4_109, %c0_110, %c0_111] : memref<6x6x6x8xf32, #tpu.memory_space<vmem>>, vector<1x1x6x8xf32>
    %215 = vector.shape_cast %214 : vector<1x1x6x8xf32> to vector<6x8xf32>
    %216 = vector.extract_strided_slice %215 {offsets = [0, 0], sizes = [4, 8], strides = [1, 1]} : vector<6x8xf32> to vector<4x8xf32>
    %217 = vector.extract_strided_slice %215 {offsets = [1, 0], sizes = [4, 8], strides = [1, 1]} : vector<6x8xf32> to vector<4x8xf32>
    %218 = vector.extract_strided_slice %215 {offsets = [2, 0], sizes = [4, 8], strides = [1, 1]} : vector<6x8xf32> to vector<4x8xf32>
    %c0_i32_112 = arith.constant 0 : i32
    %219 = arith.addi %arg1, %c0_i32_112 : i32
    %220 = arith.index_cast %219 : i32 to index
    %c5 = arith.constant 5 : index
    %c0_113 = arith.constant 0 : index
    %c0_114 = arith.constant 0 : index
    %221 = vector.load %arg13[%220, %c5, %c0_113, %c0_114] : memref<6x6x6x8xf32, #tpu.memory_space<vmem>>, vector<1x1x6x8xf32>
    %222 = vector.shape_cast %221 : vector<1x1x6x8xf32> to vector<6x8xf32>
    %223 = vector.extract_strided_slice %222 {offsets = [0, 0], sizes = [4, 8], strides = [1, 1]} : vector<6x8xf32> to vector<4x8xf32>
    %224 = vector.extract_strided_slice %222 {offsets = [1, 0], sizes = [4, 8], strides = [1, 1]} : vector<6x8xf32> to vector<4x8xf32>
    %225 = vector.extract_strided_slice %222 {offsets = [2, 0], sizes = [4, 8], strides = [1, 1]} : vector<6x8xf32> to vector<4x8xf32>
    %c1_i32_115 = arith.constant 1 : i32
    %226 = arith.addi %arg1, %c1_i32_115 : i32
    %227 = arith.index_cast %226 : i32 to index
    %c3_116 = arith.constant 3 : index
    %c0_117 = arith.constant 0 : index
    %c0_118 = arith.constant 0 : index
    %228 = vector.load %arg13[%227, %c3_116, %c0_117, %c0_118] : memref<6x6x6x8xf32, #tpu.memory_space<vmem>>, vector<1x1x6x8xf32>
    %229 = vector.shape_cast %228 : vector<1x1x6x8xf32> to vector<6x8xf32>
    %230 = vector.extract_strided_slice %229 {offsets = [0, 0], sizes = [4, 8], strides = [1, 1]} : vector<6x8xf32> to vector<4x8xf32>
    %231 = vector.extract_strided_slice %229 {offsets = [1, 0], sizes = [4, 8], strides = [1, 1]} : vector<6x8xf32> to vector<4x8xf32>
    %232 = vector.extract_strided_slice %229 {offsets = [2, 0], sizes = [4, 8], strides = [1, 1]} : vector<6x8xf32> to vector<4x8xf32>
    %c1_i32_119 = arith.constant 1 : i32
    %233 = arith.addi %arg1, %c1_i32_119 : i32
    %234 = arith.index_cast %233 : i32 to index
    %c4_120 = arith.constant 4 : index
    %c0_121 = arith.constant 0 : index
    %c0_122 = arith.constant 0 : index
    %235 = vector.load %arg13[%234, %c4_120, %c0_121, %c0_122] : memref<6x6x6x8xf32, #tpu.memory_space<vmem>>, vector<1x1x6x8xf32>
    %236 = vector.shape_cast %235 : vector<1x1x6x8xf32> to vector<6x8xf32>
    %237 = vector.extract_strided_slice %236 {offsets = [0, 0], sizes = [4, 8], strides = [1, 1]} : vector<6x8xf32> to vector<4x8xf32>
    %238 = vector.extract_strided_slice %236 {offsets = [1, 0], sizes = [4, 8], strides = [1, 1]} : vector<6x8xf32> to vector<4x8xf32>
    %239 = vector.extract_strided_slice %236 {offsets = [2, 0], sizes = [4, 8], strides = [1, 1]} : vector<6x8xf32> to vector<4x8xf32>
    %c1_i32_123 = arith.constant 1 : i32
    %240 = arith.addi %arg1, %c1_i32_123 : i32
    %241 = arith.index_cast %240 : i32 to index
    %c5_124 = arith.constant 5 : index
    %c0_125 = arith.constant 0 : index
    %c0_126 = arith.constant 0 : index
    %242 = vector.load %arg13[%241, %c5_124, %c0_125, %c0_126] : memref<6x6x6x8xf32, #tpu.memory_space<vmem>>, vector<1x1x6x8xf32>
    %243 = vector.shape_cast %242 : vector<1x1x6x8xf32> to vector<6x8xf32>
    %244 = vector.extract_strided_slice %243 {offsets = [0, 0], sizes = [4, 8], strides = [1, 1]} : vector<6x8xf32> to vector<4x8xf32>
    %245 = vector.extract_strided_slice %243 {offsets = [1, 0], sizes = [4, 8], strides = [1, 1]} : vector<6x8xf32> to vector<4x8xf32>
    %246 = vector.extract_strided_slice %243 {offsets = [2, 0], sizes = [4, 8], strides = [1, 1]} : vector<6x8xf32> to vector<4x8xf32>
    %c2_i32_127 = arith.constant 2 : i32
    %247 = arith.addi %arg1, %c2_i32_127 : i32
    %248 = arith.index_cast %247 : i32 to index
    %c3_128 = arith.constant 3 : index
    %c0_129 = arith.constant 0 : index
    %c0_130 = arith.constant 0 : index
    %249 = vector.load %arg13[%248, %c3_128, %c0_129, %c0_130] : memref<6x6x6x8xf32, #tpu.memory_space<vmem>>, vector<1x1x6x8xf32>
    %250 = vector.shape_cast %249 : vector<1x1x6x8xf32> to vector<6x8xf32>
    %251 = vector.extract_strided_slice %250 {offsets = [0, 0], sizes = [4, 8], strides = [1, 1]} : vector<6x8xf32> to vector<4x8xf32>
    %252 = vector.extract_strided_slice %250 {offsets = [1, 0], sizes = [4, 8], strides = [1, 1]} : vector<6x8xf32> to vector<4x8xf32>
    %253 = vector.extract_strided_slice %250 {offsets = [2, 0], sizes = [4, 8], strides = [1, 1]} : vector<6x8xf32> to vector<4x8xf32>
    %c2_i32_131 = arith.constant 2 : i32
    %254 = arith.addi %arg1, %c2_i32_131 : i32
    %255 = arith.index_cast %254 : i32 to index
    %c4_132 = arith.constant 4 : index
    %c0_133 = arith.constant 0 : index
    %c0_134 = arith.constant 0 : index
    %256 = vector.load %arg13[%255, %c4_132, %c0_133, %c0_134] : memref<6x6x6x8xf32, #tpu.memory_space<vmem>>, vector<1x1x6x8xf32>
    %257 = vector.shape_cast %256 : vector<1x1x6x8xf32> to vector<6x8xf32>
    %258 = vector.extract_strided_slice %257 {offsets = [0, 0], sizes = [4, 8], strides = [1, 1]} : vector<6x8xf32> to vector<4x8xf32>
    %259 = vector.extract_strided_slice %257 {offsets = [1, 0], sizes = [4, 8], strides = [1, 1]} : vector<6x8xf32> to vector<4x8xf32>
    %260 = vector.extract_strided_slice %257 {offsets = [2, 0], sizes = [4, 8], strides = [1, 1]} : vector<6x8xf32> to vector<4x8xf32>
    %c2_i32_135 = arith.constant 2 : i32
    %261 = arith.addi %arg1, %c2_i32_135 : i32
    %262 = arith.index_cast %261 : i32 to index
    %c5_136 = arith.constant 5 : index
    %c0_137 = arith.constant 0 : index
    %c0_138 = arith.constant 0 : index
    %263 = vector.load %arg13[%262, %c5_136, %c0_137, %c0_138] : memref<6x6x6x8xf32, #tpu.memory_space<vmem>>, vector<1x1x6x8xf32>
    %264 = vector.shape_cast %263 : vector<1x1x6x8xf32> to vector<6x8xf32>
    %265 = vector.extract_strided_slice %264 {offsets = [0, 0], sizes = [4, 8], strides = [1, 1]} : vector<6x8xf32> to vector<4x8xf32>
    %266 = vector.extract_strided_slice %264 {offsets = [1, 0], sizes = [4, 8], strides = [1, 1]} : vector<6x8xf32> to vector<4x8xf32>
    %267 = vector.extract_strided_slice %264 {offsets = [2, 0], sizes = [4, 8], strides = [1, 1]} : vector<6x8xf32> to vector<4x8xf32>
    %268 = tpu.concatenate %209, %210, %211, %216, %217, %218, %223, %224, %225, %230, %231, %232, %237, %238, %239, %244 in 1 : vector<4x8xf32>, vector<4x8xf32>, vector<4x8xf32>, vector<4x8xf32>, vector<4x8xf32>, vector<4x8xf32>, vector<4x8xf32>, vector<4x8xf32>, vector<4x8xf32>, vector<4x8xf32>, vector<4x8xf32>, vector<4x8xf32>, vector<4x8xf32>, vector<4x8xf32>, vector<4x8xf32>, vector<4x8xf32> -> vector<4x128xf32>
    %269 = tpu.concatenate %245, %246, %251, %252, %253, %258, %259, %260, %265, %266, %267 in 1 : vector<4x8xf32>, vector<4x8xf32>, vector<4x8xf32>, vector<4x8xf32>, vector<4x8xf32>, vector<4x8xf32>, vector<4x8xf32>, vector<4x8xf32>, vector<4x8xf32>, vector<4x8xf32>, vector<4x8xf32> -> vector<4x88xf32>
    %270 = tpu.concatenate %268, %269 in 1 : vector<4x128xf32>, vector<4x88xf32> -> vector<4x216xf32>
    %271 = tpu.concatenate %72, %138, %204, %270 in 0 : vector<4x216xf32>, vector<4x216xf32>, vector<4x216xf32>, vector<4x216xf32> -> vector<16x216xf32>
    %272 = arith.truncf %271 : vector<16x216xf32> to vector<16x216xbf16>
    %c0_139 = arith.constant 0 : index
    %c0_140 = arith.constant 0 : index
    %273 = vector.load %arg6[%c0_139, %c0_140] : memref<216x8xbf16, #tpu.memory_space<vmem>>, vector<216x8xbf16>
    %cst = arith.constant dense<0.000000e+00> : vector<16x8xf32>
    %274 = tpu.matmul %272, %273, %cst {dimension_numbers = #tpu.dot_dimension_numbers<[1], [0], [0], [1], [0, 0, 1, 1], [], []>} : vector<16x216xbf16>, vector<216x8xbf16>, vector<16x8xf32> -> vector<16x8xf32>
    %c0_141 = arith.constant 0 : index
    %c0_142 = arith.constant 0 : index
    %275 = vector.load %arg7[%c0_141, %c0_142] : memref<1x8xf32, #tpu.memory_space<vmem>>, vector<1x8xf32>
    %276 = vector.broadcast %275 : vector<1x8xf32> to vector<16x8xf32>
    %277 = arith.mulf %274, %276 : vector<16x8xf32>
    %c0_143 = arith.constant 0 : index
    %c0_144 = arith.constant 0 : index
    %278 = vector.load %arg8[%c0_143, %c0_144] : memref<1x8xf32, #tpu.memory_space<vmem>>, vector<1x8xf32>
    %279 = vector.broadcast %278 : vector<1x8xf32> to vector<16x8xf32>
    %280 = arith.addf %277, %279 : vector<16x8xf32>
    %c1_i32_145 = arith.constant 1 : i32
    %281 = arith.addi %arg1, %c1_i32_145 : i32
    %282 = arith.index_cast %281 : i32 to index
    %c1_146 = arith.constant 1 : index
    %c1_147 = arith.constant 1 : index
    %c0_148 = arith.constant 0 : index
    %283 = vector.load %arg12[%282, %c1_146, %c1_147, %c0_148] : memref<6x6x6x4xf32, #tpu.memory_space<vmem>>, vector<1x1x4x4xf32>
    %284 = vector.shape_cast %283 : vector<1x1x4x4xf32> to vector<4x4xf32>
    %c1_i32_149 = arith.constant 1 : i32
    %285 = arith.addi %arg1, %c1_i32_149 : i32
    %286 = arith.index_cast %285 : i32 to index
    %c2_150 = arith.constant 2 : index
    %c1_151 = arith.constant 1 : index
    %c0_152 = arith.constant 0 : index
    %287 = vector.load %arg12[%286, %c2_150, %c1_151, %c0_152] : memref<6x6x6x4xf32, #tpu.memory_space<vmem>>, vector<1x1x4x4xf32>
    %288 = vector.shape_cast %287 : vector<1x1x4x4xf32> to vector<4x4xf32>
    %c1_i32_153 = arith.constant 1 : i32
    %289 = arith.addi %arg1, %c1_i32_153 : i32
    %290 = arith.index_cast %289 : i32 to index
    %c3_154 = arith.constant 3 : index
    %c1_155 = arith.constant 1 : index
    %c0_156 = arith.constant 0 : index
    %291 = vector.load %arg12[%290, %c3_154, %c1_155, %c0_156] : memref<6x6x6x4xf32, #tpu.memory_space<vmem>>, vector<1x1x4x4xf32>
    %292 = vector.shape_cast %291 : vector<1x1x4x4xf32> to vector<4x4xf32>
    %c1_i32_157 = arith.constant 1 : i32
    %293 = arith.addi %arg1, %c1_i32_157 : i32
    %294 = arith.index_cast %293 : i32 to index
    %c4_158 = arith.constant 4 : index
    %c1_159 = arith.constant 1 : index
    %c0_160 = arith.constant 0 : index
    %295 = vector.load %arg12[%294, %c4_158, %c1_159, %c0_160] : memref<6x6x6x4xf32, #tpu.memory_space<vmem>>, vector<1x1x4x4xf32>
    %296 = vector.shape_cast %295 : vector<1x1x4x4xf32> to vector<4x4xf32>
    %297 = tpu.concatenate %284, %288, %292, %296 in 0 : vector<4x4xf32>, vector<4x4xf32>, vector<4x4xf32>, vector<4x4xf32> -> vector<16x4xf32>
    %298 = arith.truncf %297 : vector<16x4xf32> to vector<16x4xbf16>
    %c0_161 = arith.constant 0 : index
    %c0_162 = arith.constant 0 : index
    %299 = vector.load %arg9[%c0_161, %c0_162] : memref<4x8xbf16, #tpu.memory_space<vmem>>, vector<4x8xbf16>
    %cst_163 = arith.constant dense<0.000000e+00> : vector<16x8xf32>
    %300 = tpu.matmul %298, %299, %cst_163 {dimension_numbers = #tpu.dot_dimension_numbers<[1], [0], [0], [1], [0, 0, 1, 1], [], []>} : vector<16x4xbf16>, vector<4x8xbf16>, vector<16x8xf32> -> vector<16x8xf32>
    %c0_164 = arith.constant 0 : index
    %c0_165 = arith.constant 0 : index
    %301 = vector.load %arg10[%c0_164, %c0_165] : memref<1x8xf32, #tpu.memory_space<vmem>>, vector<1x8xf32>
    %302 = vector.broadcast %301 : vector<1x8xf32> to vector<16x8xf32>
    %303 = arith.addf %300, %302 : vector<16x8xf32>
    %304 = arith.addf %280, %303 : vector<16x8xf32>
    %cst_166 = arith.constant 0.000000e+00 : f32
    %305 = vector.broadcast %cst_166 : f32 to vector<16x8xf32>
    %306 = arith.maximumf %304, %305 : vector<16x8xf32>
    %307 = tpu.transpose %306, [1, 0] : vector<16x8xf32> -> vector<8x16xf32>
    %c0_167 = arith.constant 0 : index
    %c0_168 = arith.constant 0 : index
    %c0_169 = arith.constant 0 : index
    %c0_170 = arith.constant 0 : index
    %308 = vector.load %arg11[%c0_167, %c0_168, %c0_169, %c0_170] : memref<1x1x8x16xf32, #tpu.memory_space<vmem>>, vector<1x1x8x16xf32>
    %309 = vector.shape_cast %308 : vector<1x1x8x16xf32> to vector<8x16xf32>
    %310 = vector.shape_cast %307 : vector<8x16xf32> to vector<1x1x8x16xf32>
    tpu.vector_store %arg11[%c0_167, %c0_168, %c0_169, %c0_170], %310 {strides = array<i32>} : memref<1x1x8x16xf32, #tpu.memory_space<vmem>>, vector<1x1x8x16xf32>,
    return
  }
  func.func @transform_0(%arg0: i32, %arg1: i32) -> (i32, i32, i32, i32, i32) {
    %c0_i32 = arith.constant 0 : i32
    %c0_i32_0 = arith.constant 0 : i32
    %c0_i32_1 = arith.constant 0 : i32
    %c0_i32_2 = arith.constant 0 : i32
    %c0_i32_3 = arith.constant 0 : i32
    return %arg0, %c0_i32, %c0_i32_0, %c0_i32_1, %c0_i32_2 : i32, i32, i32, i32, i32
  }
  func.func @transform_1(%arg0: i32, %arg1: i32) -> (i32, i32) {
    %c0_i32 = arith.constant 0 : i32
    %c0_i32_0 = arith.constant 0 : i32
    %c0_i32_1 = arith.constant 0 : i32
    return %c0_i32, %c0_i32_0 : i32, i32
  }
  func.func @transform_2(%arg0: i32, %arg1: i32) -> (i32, i32) {
    %c0_i32 = arith.constant 0 : i32
    %c0_i32_0 = arith.constant 0 : i32
    %c0_i32_1 = arith.constant 0 : i32
    return %c0_i32, %c0_i32_0 : i32, i32
  }
  func.func @transform_3(%arg0: i32, %arg1: i32) -> (i32, i32) {
    %c0_i32 = arith.constant 0 : i32
    %c0_i32_0 = arith.constant 0 : i32
    %c0_i32_1 = arith.constant 0 : i32
    return %c0_i32, %c0_i32_0 : i32, i32
  }
  func.func @transform_4(%arg0: i32, %arg1: i32) -> (i32, i32) {
    %c0_i32 = arith.constant 0 : i32
    %c0_i32_0 = arith.constant 0 : i32
    %c0_i32_1 = arith.constant 0 : i32
    return %c0_i32, %c0_i32_0 : i32, i32
  }
  func.func @transform_5(%arg0: i32, %arg1: i32) -> (i32, i32) {
    %c0_i32 = arith.constant 0 : i32
    %c0_i32_0 = arith.constant 0 : i32
    %c0_i32_1 = arith.constant 0 : i32
    return %c0_i32, %c0_i32_0 : i32, i32
  }
  func.func @transform_6(%arg0: i32, %arg1: i32) -> (i32, i32) {
    %c0_i32 = arith.constant 0 : i32
    %c0_i32_0 = arith.constant 0 : i32
    %c0_i32_1 = arith.constant 0 : i32
    return %c0_i32, %c0_i32_0 : i32, i32
  }
  func.func @transform_7(%arg0: i32, %arg1: i32) -> (i32, i32) {
    %c0_i32 = arith.constant 0 : i32
    %c0_i32_0 = arith.constant 0 : i32
    %c0_i32_1 = arith.constant 0 : i32
    return %c0_i32, %c0_i32_0 : i32, i32
  }
  func.func @transform_8(%arg0: i32, %arg1: i32) -> (i32, i32) {
    %c0_i32 = arith.constant 0 : i32
    %c0_i32_0 = arith.constant 0 : i32
    %c0_i32_1 = arith.constant 0 : i32
    return %c0_i32, %c0_i32_0 : i32, i32
  }
  func.func @transform_9(%arg0: i32, %arg1: i32) -> (i32, i32, i32, i32) {
    %c0_i32 = arith.constant 0 : i32
    %c0_i32_0 = arith.constant 0 : i32
    %c0_i32_1 = arith.constant 0 : i32
    return %arg0, %arg1, %c0_i32, %c0_i32_0 : i32, i32, i32, i32
  }
}

</mosaic_0001>

<bundles_post_ra>
// kernel: down_forward.1
= control target key start
LH: loop header
LB: loop body
LE: loop exit
PB: predicated region body
PF: predicated region fallthrough
CT: control target
= control target key end

     0   :  { %s4239_s30 = smov 0   ;;  %s4241_s10 = smov 0   ;;  %s5907_s0 = inlined_call_operand.vmem [shape: bf16[2,8,8,4,8], index: 0, kind: input, shape index: {}]   ;;  %s5908_s1 = inlined_call_operand.vmem [shape: bf16[108,8], index: 1, kind: input, shape index: {}]   ;;  %s5909_s2 = inlined_call_operand.vmem [shape: f32[1,8], index: 2, kind: input, shape index: {}]   ;;  %s5910_s3 = inlined_call_operand.vmem [shape: f32[1,8], index: 3, kind: input, shape index: {}]   ;;  %s5911_s4 = inlined_call_operand.vmem [shape: bf16[216,8], index: 4, kind: input, shape index: {}]   ;;  %s5912_s5 = inlined_call_operand.vmem [shape: f32[1,8], index: 5, kind: input, shape index: {}]   ;;  %s5913_s6 = inlined_call_operand.vmem [shape: f32[1,8], index: 6, kind: input, shape index: {}]   ;;  %s5914_s7 = inlined_call_operand.vmem [shape: bf16[4,8], index: 7, kind: input, shape index: {}]   ;;  %s5915_s8 = inlined_call_operand.vmem [shape: f32[1,8], index: 8, kind: input, shape index: {}]   ;;  %s5916_s9 = inlined_call_operand.vmem [shape: f32[2,4,8,16], index: 9, kind: output, shape index: {}]  }
   0x1   :  { %s4243_s11 = smov 0   ;;  %s4245_s12 = smov 0  }
   0x2   :  { %s4247_s13 = smov 0  }
   0x3 LB: > { %s28_s14 = sadd.s32 1, %s4130_s11  ;;  %s31_s15 = sadd.s32 1, %s4134_s12  ;;  %s4138_s13 = sphi %s4247_s13, %s19_s13   ;;  %s4134_s12 = sphi %s4245_s12, %s5937_s12   ;;  %s4130_s11 = sphi %s4243_s11, %s5936_s11   ;;  %s4126_s10 = sphi %s4241_s10, %s5935_s10   ;;  %s4122_s30 = sphi %s4239_s30, %s5934_s30  }
   0x4   : > { %p29_p0 = scmp.ge.s32.totalorder %s28_s14, 4  ;;  %p3009_p1 = scmp.ge.s32.totalorder %s4138_s13, 1 }
   0x5   : > { %p301_p2 = scmp.lt.s32.totalorder %s4138_s13, 9 }
   0x6   : > { %s5939_s14 = smov (%p29_p0, %s28_s14), 0  ;;  %s5941_s15 = smov (!%p29_p0, %s31_s15), %s4134_s12 }
   0x7   : > { %p302_p3 = pnand %p3009_p1, %p301_p2  ;;  %p33_p4 = scmp.ge.s32.totalorder %s5941_s15, 2 }
   0x8   : > { %p340_p5 = scmp.lt.s32.totalorder (!%p302_p3), %s4126_s10, 1  ;;  %p347_p6 = scmp.lt.s32.totalorder (!%p302_p3), %s4122_s30, 3 }
   0x9   : > { %s5943_s15 = smov (%p33_p4, %s5941_s15), 0  ;;  %305 = sbr.rel (%p302_p3) target bundleno = 1671 (0x687), region = 56 }
   0xa   : > { %p3014_p7 = scmp.ne.s32.totalorder (!%p302_p3), %s4122_s30, 0 }
   0xe   : > { %s5945_s10 = smov (!%p340_p5, %s4126_s10), 1  ;;  %s4140_s27 = smov (!%p3014_p7), 124  }
   0xf   : > { %s348_s16 = scalar_select %p347_p6, %s4122_s30, 3 }
  0x10   : > { %s3175_s17 = sshll.u32 %s5945_s10, 7  ;;  %s3012_s18 = sshll.u32 %s5945_s10, 2 }
  0x11   : > { %s4276_s21 = scalar_lea.vmem %s5907_s0, %s3175_s17  ;;  %s350_s22 = sadd.s32 %s3012_s18, %s348_s16 }
  0x12   : > { %s3013_s23 = sshll.u32 %s350_s22, 3  ;;  %357 = sbr.rel (%p3014_p7) target bundleno = 635 (0x27b), region = 60 }
  0x13   : > { %s4281_s26 = scalar_lea.vmem %s5916_s9, %s3013_s23  ;;  %s4142_s28 = smov (!%p3014_p7), 16  }
  0x14   : > { %s4143_s29 = smov (!%p3014_p7), 12   ;;  %s4144_s10 = smov (!%p3014_p7), 4  }
  0x15   : > { %s4145_s16 = smov (!%p3014_p7), 8   ;;  %s4146_s17 = smov (!%p3014_p7), 24  }
  0x16   : > { %s4147_s18 = smov (!%p3014_p7), 36   ;;  %s4148_s19 = smov (!%p3014_p7), 20  }
  0x17   : > { %v374_v0 = vld [vmem:[%s4276_s21 + $0x20] sm:$0x3]  ;;  %v375_v1 = vld [vmem:[%s4276_s21 + $0x22] sm:$0x3]  ;;  %v376_v2 = vld [vmem:[%s4276_s21 + $0x24] sm:$0x3] }
  0x18   : > { %v377_v3 = vld [vmem:[%s4276_s21 + $0x26] sm:$0x3]  ;;  %v382_v4 = vld [vmem:[%s4276_s21 + $0x30] sm:$0x3]  ;;  %v383_v5 = vld [vmem:[%s4276_s21 + $0x32] sm:$0x3]  ;;  %v438_v6 = vunpack.c.l.bf16 %v374_v0  ;;  %v439_v7 = vunpack.c.l.bf16 %v375_v1  ;;  %v440_v8 = vunpack.c.l.bf16 %v376_v2 }
  0x19   : > { %v384_v9 = vld [vmem:[%s4276_s21 + $0x34] sm:$0x3]  ;;  %v385_v10 = vld [vmem:[%s4276_s21 + $0x36] sm:$0x3]  ;;  %v441_v11 = vunpack.c.l.bf16 %v377_v3  ;;  %v446_v12 = vunpack.c.l.bf16 %v382_v4  ;;  %v447_v13 = vunpack.c.l.bf16 %v383_v5  ;;  %v358_v17 = vld [vmem:[%s4276_s21] sm:$0x3] }
  0x1a   : > { %v448_v14 = vunpack.c.l.bf16 %v384_v9  ;;  %v449_v15 = vunpack.c.l.bf16 %v385_v10  ;;  %v490_v16 = vmax.f32 %v438_v6, %v439_v7  ;;  %v359_v18 = vld [vmem:[%s4276_s21 + $0x2] sm:$0x3]  ;;  %v360_v19 = vld [vmem:[%s4276_s21 + $0x4] sm:$0x3]  ;;  %v361_v22 = vld [vmem:[%s4276_s21 + $0x6] sm:$0x3]  ;;  %v422_v25 = vunpack.c.l.bf16 %v358_v17 }
  0x1b   : > { %v491_v20 = vmax.f32 %v440_v8, %v441_v11  ;;  %v506_v21 = vmax.f32 %v446_v12, %v447_v13  ;;  %v366_v23 = vld [vmem:[%s4276_s21 + $0x10] sm:$0x3]  ;;  %v367_v24 = vld [vmem:[%s4276_s21 + $0x12] sm:$0x3]  ;;  %v423_v26 = vunpack.c.l.bf16 %v359_v18  ;;  %v368_v28 = vld [vmem:[%s4276_s21 + $0x14] sm:$0x3]  ;;  %v424_v30 = vunpack.c.l.bf16 %v360_v19 }
  0x1c   : > { %v507_v27 = vmax.f32 %v448_v14, %v449_v15  ;;  %v369_v29 = vld [vmem:[%s4276_s21 + $0x16] sm:$0x3]  ;;  %v425_v31 = vunpack.c.l.bf16 %v361_v22  ;;  %v430_v32 = vunpack.c.l.bf16 %v366_v23  ;;  %v378_v33 = vld [vmem:[%s4276_s21 + $0x28] sm:$0x3]  ;;  %v431_v35 = vunpack.c.l.bf16 %v367_v24  ;;  %v379_v38 = vld [vmem:[%s4276_s21 + $0x2a] sm:$0x3] }
  0x1d   : > { %v4301_v34 = vmax.f32 %v490_v16, %v506_v21  ;;  %v432_v36 = vunpack.c.l.bf16 %v368_v28  ;;  %v433_v37 = vunpack.c.l.bf16 %v369_v29  ;;  %v380_v39 = vld [vmem:[%s4276_s21 + $0x2c] sm:$0x3]  ;;  %v381_v40 = vld [vmem:[%s4276_s21 + $0x2e] sm:$0x3]  ;;  %v486_v42 = vmax.f32 %v422_v25, %v423_v26  ;;  %v386_v44 = vld [vmem:[%s4276_s21 + $0x38] sm:$0x3] }
  0x1e   : > { %v4306_v41 = vmax.f32 %v491_v20, %v507_v27  ;;  %v487_v43 = vmax.f32 %v424_v30, %v425_v31  ;;  %v387_v45 = vld [vmem:[%s4276_s21 + $0x3a] sm:$0x3]  ;;  %v388_v46 = vld [vmem:[%s4276_s21 + $0x3c] sm:$0x3]  ;;  %v442_v47 = vunpack.c.l.bf16 %v378_v33  ;;  %v502_v48 = vmax.f32 %v430_v32, %v431_v35  ;;  %v389_v50 = vld [vmem:[%s4276_s21 + $0x3e] sm:$0x3] }
  0x1f   : > { %v503_v49 = vmax.f32 %v432_v36, %v433_v37  ;;  %v443_v51 = vunpack.c.l.bf16 %v379_v38  ;;  %v444_v52 = vunpack.c.l.bf16 %v380_v39  ;;  %v362_v53 = vld [vmem:[%s4276_s21 + $0x8] sm:$0x3]  ;;  %v445_v55 = vunpack.c.l.bf16 %v381_v40  ;;  %v363_v58 = vld [vmem:[%s4276_s21 + $0xa] sm:$0x3]  ;;  %v364_v59 = vld [vmem:[%s4276_s21 + $0xc] sm:$0x3] }
  0x20   : > { %v3303_v54 = vpack.i.bf16 %v4306_v41, %v4301_v34  ;;  %v450_v56 = vunpack.c.l.bf16 %v386_v44  ;;  %v451_v57 = vunpack.c.l.bf16 %v387_v45  ;;  %v4317_v60 = vmax.f32 %v486_v42, %v502_v48  ;;  %v365_v0 = vld [vmem:[%s4276_s21 + $0xe] sm:$0x3]  ;;  %v370_v1 = vld [vmem:[%s4276_s21 + $0x18] sm:$0x3]  ;;  %v371_v2 = vld [vmem:[%s4276_s21 + $0x1a] sm:$0x3] }
  0x21   : > { %v4319_v61 = vmax.f32 %v487_v43, %v503_v49  ;;  %v452_v62 = vunpack.c.l.bf16 %v388_v46  ;;  %v453_v63 = vunpack.c.l.bf16 %v389_v50  ;;  %v492_v3 = vmax.f32 %v442_v47, %v443_v51  ;;  %v372_v6 = vld [vmem:[%s4276_s21 + $0x1c] sm:$0x3]  ;;  %v373_v7 = vld [vmem:[%s4276_s21 + $0x1e] sm:$0x3]  ;;  %v390_v13 = vld [vmem:[%s4276_s21 + $0x40] sm:$0x3] }
  0x22   : > { %3304 = vrot.lane.b32.xlu1 %v3303_v54, %s4140_s27  ;;  %v493_v4 = vmax.f32 %v444_v52, %v445_v55  ;;  %v508_v5 = vmax.f32 %v450_v56, %v451_v57  ;;  %v426_v8 = vunpack.c.l.bf16 %v362_v53  ;;  %v427_v11 = vunpack.c.l.bf16 %v363_v58  ;;  %v391_v14 = vld [vmem:[%s4276_s21 + $0x42] sm:$0x3]  ;;  %v392_v19 = vld [vmem:[%s4276_s21 + $0x44] sm:$0x3]  ;;  %v393_v20 = vld [vmem:[%s4276_s21 + $0x46] sm:$0x3] }
  0x23   : > { %v3293_v9 = vpack.i.bf16 %v4319_v61, %v4317_v60  ;;  %v509_v10 = vmax.f32 %v452_v62, %v453_v63  ;;  %v428_v12 = vunpack.c.l.bf16 %v364_v59  ;;  %v429_v16 = vunpack.c.l.bf16 %v365_v0  ;;  %v398_v25 = vld [vmem:[%s4276_s21 + $0x50] sm:$0x3]  ;;  %v399_v26 = vld [vmem:[%s4276_s21 + $0x52] sm:$0x3]  ;;  %v400_v27 = vld [vmem:[%s4276_s21 + $0x54] sm:$0x3] }
  0x24   : > { %v4331_v15 = vmax.f32 %v492_v3, %v508_v5  ;;  %v434_v17 = vunpack.c.l.bf16 %v370_v1  ;;  %v435_v18 = vunpack.c.l.bf16 %v371_v2  ;;  %v436_v22 = vunpack.c.l.bf16 %v372_v6  ;;  %v401_v30 = vld [vmem:[%s4276_s21 + $0x56] sm:$0x3]  ;;  %v394_v38 = vld [vmem:[%s4276_s21 + $0x48] sm:$0x3]  ;;  %v395_v39 = vld [vmem:[%s4276_s21 + $0x4a] sm:$0x3] }
  0x25   : > { %3294 = vrot.lane.b32.xlu0 %v3293_v9, %s4140_s27  ;;  %v4336_v21 = vmax.f32 %v493_v4, %v509_v10  ;;  %v437_v23 = vunpack.c.l.bf16 %v373_v7  ;;  %v488_v24 = vmax.f32 %v426_v8, %v427_v11  ;;  %v489_v28 = vmax.f32 %v428_v12, %v429_v16  ;;  %v396_v40 = vld [vmem:[%s4276_s21 + $0x4c] sm:$0x3]  ;;  %v397_v46 = vld [vmem:[%s4276_s21 + $0x4e] sm:$0x3]  ;;  %v402_v47 = vld [vmem:[%s4276_s21 + $0x58] sm:$0x3] }
  0x26   : > { %v504_v29 = vmax.f32 %v434_v17, %v435_v18  ;;  %v454_v31 = vunpack.c.l.bf16 %v390_v13  ;;  %v455_v32 = vunpack.c.l.bf16 %v391_v14  ;;  %v456_v36 = vunpack.c.l.bf16 %v392_v19  ;;  %v403_v52 = vld [vmem:[%s4276_s21 + $0x5a] sm:$0x3]  ;;  %v404_v53 = vld [vmem:[%s4276_s21 + $0x5c] sm:$0x3]  ;;  %v405_v54 = vld [vmem:[%s4276_s21 + $0x5e] sm:$0x3] }
  0x27   : > { %v3308_v33 = vpack.i.bf16 %v4336_v21, %v4331_v15  ;;  %v505_v35 = vmax.f32 %v436_v22, %v437_v23  ;;  %v457_v37 = vunpack.c.l.bf16 %v393_v20  ;;  %v462_v43 = vunpack.c.l.bf16 %v398_v25  ;;  %v410_v59 = vld [vmem:[%s4276_s21 + $0x68] sm:$0x3]  ;;  %v411_v2 = vld [vmem:[%s4276_s21 + $0x6a] sm:$0x3]  ;;  %v412_v3 = vld [vmem:[%s4276_s21 + $0x6c] sm:$0x3] }
  0x28   : > { %v4347_v42 = vmax.f32 %v488_v24, %v504_v29  ;;  %v463_v44 = vunpack.c.l.bf16 %v399_v26  ;;  %v464_v45 = vunpack.c.l.bf16 %v400_v27  ;;  %v465_v49 = vunpack.c.l.bf16 %v401_v30  ;;  %v413_v8 = vld [vmem:[%s4276_s21 + $0x6e] sm:$0x3]  ;;  %v418_v9 = vld [vmem:[%s4276_s21 + $0x78] sm:$0x3]  ;;  %v419_v10 = vld [vmem:[%s4276_s21 + $0x7a] sm:$0x3] }
  0x29   : > { %v4351_v48 = vmax.f32 %v489_v28, %v505_v35  ;;  %v494_v50 = vmax.f32 %v454_v31, %v455_v32  ;;  %v495_v51 = vmax.f32 %v456_v36, %v457_v37  ;;  %vm614_vm0 = vcmask 29696   ;;  %v420_v14 = vld [vmem:[%s4276_s21 + $0x7c] sm:$0x3]  ;;  %v421_v16 = vld [vmem:[%s4276_s21 + $0x7e] sm:$0x3]  ;;  %s4149_s20 = smov 48  }
  0x2a   : > { %3309 = vrot.lane.b32.xlu1 %v3308_v33, %s4140_s27  ;;  %v510_v55 = vmax.f32 %v462_v43, %v463_v44  ;;  %v458_v56 = vunpack.c.l.bf16 %v394_v38  ;;  %v459_v57 = vunpack.c.l.bf16 %v395_v39  ;;  %v460_v58 = vunpack.c.l.bf16 %v396_v40  ;;  %v406_v43 = vld [vmem:[%s4276_s21 + $0x60] sm:$0x3]  ;;  %v407_v44 = vld [vmem:[%s4276_s21 + $0x62] sm:$0x3]  ;;  %s4151_s22 = smov 60   ;;  %s4152_s23 = smov 44  }
  0x2b   : > { %v3298_v62 = vpack.i.bf16 %v4351_v48, %v4347_v42  ;;  %v511_v63 = vmax.f32 %v464_v45, %v465_v49  ;;  %v461_v0 = vunpack.c.l.bf16 %v397_v46  ;;  %v466_v1 = vunpack.c.l.bf16 %v402_v47  ;;  %v408_v45 = vld [vmem:[%s4276_s21 + $0x64] sm:$0x3]  ;;  %v409_v46 = vld [vmem:[%s4276_s21 + $0x66] sm:$0x3]  ;;  %v414_v47 = vld [vmem:[%s4276_s21 + $0x70] sm:$0x3] }
  0x2c   : > { %v4362_v4 = vmax.f32 %v494_v50, %v510_v55  ;;  %v467_v5 = vunpack.c.l.bf16 %v403_v52  ;;  %v468_v6 = vunpack.c.l.bf16 %v404_v53  ;;  %v469_v7 = vunpack.c.l.bf16 %v405_v54  ;;  %v415_v49 = vld [vmem:[%s4276_s21 + $0x72] sm:$0x3]  ;;  %v416_v53 = vld [vmem:[%s4276_s21 + $0x74] sm:$0x3]  ;;  %v417_v54 = vld [vmem:[%s4276_s21 + $0x76] sm:$0x3] }
  0x2d   : > { %3299 = vrot.lane.b32.xlu0 %v3298_v62, %s4140_s27  ;;  %v4368_v11 = vmax.f32 %v495_v51, %v511_v63  ;;  %v496_v12 = vmax.f32 %v458_v56, %v459_v57  ;;  %v497_v13 = vmax.f32 %v460_v58, %v461_v0  ;;  %v474_v17 = vunpack.c.l.bf16 %v410_v59  ;;  %s4150_s21 = smov 32   ;;  %s5917_s24 = smov 56  }
  0x2e   : > { %v512_v18 = vmax.f32 %v466_v1, %v467_v5  ;;  %v513_v19 = vmax.f32 %v468_v6, %v469_v7  ;;  %v475_v20 = vunpack.c.l.bf16 %v411_v2  ;;  %v476_v22 = vunpack.c.l.bf16 %v412_v3  ;;  %s4154_s25 = smov 28  }
  0x2f   : > { %v3313_v23 = vpack.i.bf16 %v4368_v11, %v4362_v4  ;;  %v477_v24 = vunpack.c.l.bf16 %v413_v8  ;;  %v482_v25 = vunpack.c.l.bf16 %v418_v9  ;;  %v483_v26 = vunpack.c.l.bf16 %v419_v10 }
  0x30   : > { %v4374_v27 = vmax.f32 %v496_v12, %v512_v18  ;;  %v4376_v28 = vmax.f32 %v497_v13, %v513_v19  ;;  %v484_v29 = vunpack.c.l.bf16 %v420_v14  ;;  %v485_v30 = vunpack.c.l.bf16 %v421_v16 }
  0x31   : > { %3314 = vrot.lane.b32.xlu2 %v3313_v23, %s4140_s27  ;;  %v500_v31 = vmax.f32 %v474_v17, %v475_v20  ;;  %v501_v32 = vmax.f32 %v476_v22, %v477_v24  ;;  %v516_v33 = vmax.f32 %v482_v25, %v483_v26  ;;  %v4141_v36 = vmov 0.0  }
  0x32   : > { %v517_v35 = vmax.f32 %v484_v29, %v485_v30  ;;  %628 = vst.msk [vmem:[#allocation2 + $0x68] sm:$0x3f] %vm614_vm0, %v4141_v36  ;;  %v3318_v39 = vpack.i.bf16 %v4376_v28, %v4374_v27  ;;  %v470_v50 = vunpack.c.l.bf16 %v406_v43  ;;  %v471_v51 = vunpack.c.l.bf16 %v407_v44 }
  0x33   : > { %v4381_v37 = vmax.f32 %v500_v31, %v516_v33  ;;  %629 = vst.msk [vmem:[#allocation2 + $0x70] sm:$0x3f] %vm614_vm0, %v4141_v36  ;;  %v472_v52 = vunpack.c.l.bf16 %v408_v45  ;;  %v473_v55 = vunpack.c.l.bf16 %v409_v46  ;;  %v478_v56 = vunpack.c.l.bf16 %v414_v47 }
  0x34   : > { %v4385_v38 = vmax.f32 %v501_v32, %v517_v35  ;;  %615 = vst.msk [vmem:[#allocation2] sm:$0x3f] %vm614_vm0, %v4141_v36  ;;  %v479_v57 = vunpack.c.l.bf16 %v415_v49  ;;  %v480_v58 = vunpack.c.l.bf16 %v416_v53  ;;  %v481_v59 = vunpack.c.l.bf16 %v417_v54 }
  0x35   : > { %616 = vst.msk [vmem:[#allocation2 + $0x8] sm:$0x3f] %vm614_vm0, %v4141_v36  ;;  %v498_v62 = vmax.f32 %v470_v50, %v471_v51  ;;  %v499_v1 = vmax.f32 %v472_v52, %v473_v55  ;;  %vm652_vm1 = vcmask 27648   ;;  %vm783_vm2 = vcmask 31744  }
  0x36   : > { %v3328_v40 = vpack.i.bf16 %v4385_v38, %v4381_v37  ;;  %617 = vst.msk [vmem:[#allocation2 + $0x10] sm:$0x3f] %vm614_vm0, %v4141_v36  ;;  %v514_v2 = vmax.f32 %v478_v56, %v479_v57  ;;  %v515_v6 = vmax.f32 %v480_v58, %v481_v59  ;;  %vm785_vm3 = vcmask 64512  }
  0x37   : > { %618 = vst.msk [vmem:[#allocation2 + $0x18] sm:$0x3f] %vm614_vm0, %v4141_v36  ;;  %vm787_vm4 = vcmask 97280   ;;  %vm789_vm5 = vcmask 130048   ;;  %vm791_vm6 = vcmask 162816   ;;  %vm793_vm7 = vcmask 195584  }
  0x38   : > { %3329 = vrot.lane.b32.xlu1 %v3328_v40, %s4140_s27  ;;  %619 = vst.msk [vmem:[#allocation2 + $0x20] sm:$0x3f] %vm614_vm0, %v4141_v36  ;;  %v4472_v7 = vmax.f32 %v498_v62, %v514_v2  ;;  %v4477_v10 = vmax.f32 %v499_v1, %v515_v6  ;;  %vm795_vm8 = vcmask 228352   ;;  %vm797_vm9 = vcmask 261120  }
  0x39   : > { %3319 = vrot.lane.b32.xlu2 %v3318_v39, %s4140_s27  ;;  %620 = vst.msk [vmem:[#allocation2 + $0x28] sm:$0x3f] %vm614_vm0, %v4141_v36  ;;  %vm799_vm10 = vcmask 293888   ;;  %vm801_vm11 = vcmask 326656   ;;  %vm803_vm12 = vcmask 359424   ;;  %vm805_vm13 = vcmask 392192  }
  0x3a   : > { %621 = vst.msk [vmem:[#allocation2 + $0x30] sm:$0x3f] %vm614_vm0, %v4141_v36  ;;  %v3323_v12 = vpack.i.bf16 %v4477_v10, %v4472_v7  ;;  %vm807_vm14 = vcmask 424960   ;;  %vm809_vm15 = vcmask 457728  }
  0x3b   : > { %622 = vst.msk [vmem:[#allocation2 + $0x38] sm:$0x3f] %vm614_vm0, %v4141_v36  ;;  %v4488_v16 = vld [vmem:[#allocation2] sm:$0x3f] }
  0x3c   : > { %623 = vst.msk [vmem:[#allocation2 + $0x40] sm:$0x3f] %vm614_vm0, %v4141_v36  ;;  %v4469_v63 = vld [vmem:[#allocation2 + $0x8] sm:$0x3f]  ;;  %3324 = vrot.lane.b32.xlu0 %v3323_v12, %s4140_s27  ;;  %v727_v19 = vrot.slane %v4488_v16, 2  ;;  %s4155_s27 = smov 40  }
  0x3d   : > { %624 = vst.msk [vmem:[#allocation2 + $0x48] sm:$0x3f] %vm614_vm0, %v4141_v36  ;;  %v735_v3 = vrot.slane %v4469_v63, 1  ;;  %v4484_v13 = vld [vmem:[#allocation2 + $0x10] sm:$0x3f]  ;;  %v739_v55 = vrot.slane %v4469_v63, 2 }
  0x3e   : > { %625 = vst.msk [vmem:[#allocation2 + $0x50] sm:$0x3f] %vm614_vm0, %v4141_v36  ;;  %v4486_v14 = vld [vmem:[#allocation2 + $0x18] sm:$0x3f]  ;;  %v4491_v17 = vrot.slane %v4484_v13, 1 }
  0x3f   : > { %626 = vst.msk [vmem:[#allocation2 + $0x58] sm:$0x3f] %vm614_vm0, %v4141_v36  ;;  %v4494_v18 = vrot.slane %v4486_v14, 1 }
  0x40   : > { %627 = vst.msk [vmem:[#allocation2 + $0x60] sm:$0x3f] %vm614_vm0, %v4141_v36 }
  0x41   : > { %630 = vst.msk [vmem:[#allocation2 + $0x78] sm:$0x3f] %vm614_vm0, %v4141_v36  ;;  %v3348_v22 = vpack.i.bf16 %v4491_v17, %v4494_v18 }
  0x42   : > { %631 = vst.msk [vmem:[#allocation2 + $0x80] sm:$0x3f] %vm614_vm0, %v4141_v36 }
  0x43   : > { %632 = vst.msk [vmem:[#allocation2 + $0x88] sm:$0x3f] %vm614_vm0, %v4141_v36 }
  0x44   : > { %633 = vst.msk [vmem:[#allocation2 + $0x90] sm:$0x3f] %vm614_vm0, %v4141_v36 }
  0x45   : > { %634 = vst.msk [vmem:[#allocation2 + $0x98] sm:$0x3f] %vm614_vm0, %v4141_v36 }
  0x46   : > { %635 = vst.msk [vmem:[#allocation2 + $0xa0] sm:$0x3f] %vm614_vm0, %v4141_v36 }
  0x47   : > { %636 = vst.msk [vmem:[#allocation2 + $0xa8] sm:$0x3f] %vm614_vm0, %v4141_v36  ;;  %v717_v0 = vld [vmem:[#allocation2 + $0x60] sm:$0x3f] }
  0x48   : > { %637 = vst.msk [vmem:[#allocation2 + $0xb0] sm:$0x3f] %vm614_vm0, %v4141_v36  ;;  %v825_v5 = vrot.slane %v717_v0, 1  ;;  %v3338_v9 = vpack.i.bf16 %v717_v0, %v4469_v63  ;;  %v818_v20 = vrot.slane %v717_v0, 7  ;;  %v4557_v0 = vrot.slane %v4484_v13, 2 }
  0x49   : > { %638 = vst.msk [vmem:[#allocation2 + $0xb8] sm:$0x3f] %vm614_vm0, %v4141_v36 }
  0x4a   : > { %639 = vst.msk [vmem:[#allocation2 + $0xc0] sm:$0x3f] %vm614_vm0, %v4141_v36  ;;  %v3343_v8 = vpack.i.bf16 %v825_v5, %v735_v3  ;;  %3339 = vrot.lane.b32.xlu1 %v3338_v9, %s4143_s29  ;;  %v3333_v23 = vpack.i.bf16 %v818_v20, %v727_v19  ;;  %v4562_v2 = vld [vmem:[#allocation2 + $0x88] sm:$0x3f]  ;;  %v723_v20 = vrot.slane %v4488_v16, 1 }
  0x4b   : > { %640 = vst.msk [vmem:[#allocation2 + $0xc8] sm:$0x3f] %vm614_vm0, %v4141_v36 }
  0x4c   : > { %641 = vst.msk [vmem:[#allocation2 + $0xd0] sm:$0x3f] %vm614_vm0, %v4141_v36  ;;  %3344 = vrot.lane.b32.xlu2 %v3343_v8, %s4142_s28  ;;  %3334 = vrot.lane.b32.xlu0 %v3333_v23, %s4145_s16 }
  0x4d   : > { %642 = vst.msk [vmem:[#allocation2 + $0xd8] sm:$0x3f] %vm614_vm0, %v4141_v36 }
  0x4e   : > { %643 = vst.msk [vmem:[#allocation2 + $0xe0] sm:$0x3f] %vm614_vm0, %v4141_v36 }
  0x4f   : > { %644 = vst.msk [vmem:[#allocation2 + $0xe8] sm:$0x3f] %vm614_vm0, %v4141_v36 }
  0x50   : > { %645 = vst.msk [vmem:[#allocation2 + $0xf0] sm:$0x3f] %vm614_vm0, %v4141_v36 }
  0x51   : > { %646 = vst.msk [vmem:[#allocation2 + $0xf8] sm:$0x3f] %vm614_vm0, %v4141_v36 }
  0x52   : > { %647 = vst.msk [vmem:[#allocation2 + $0x100] sm:$0x3f] %vm614_vm0, %v4141_v36 }
  0x53   : > { %648 = vst.msk [vmem:[#allocation2 + $0x108] sm:$0x3f] %vm614_vm0, %v4141_v36 }
  0x54   : > { %649 = vst.msk [vmem:[#allocation2 + $0x110] sm:$0x3f] %vm614_vm0, %v4141_v36  ;;  %3349 = vrot.lane.b32.xlu2 %v3348_v22, %s4144_s10 }
  0x55   : > { %650 = vst.msk [vmem:[#allocation2 + $0x118] sm:$0x3f] %vm614_vm0, %v4141_v36  ;;  %vm811_vm0 = vcmask 490496  }
  0x94   : > { %v3305_v24 = vpop.permute.xlu1 %3304 }
  0x95   : > { %v3307_v25 = vunpack.i.h.bf16 %v3305_v24  ;;  %v3306_v26 = vunpack.i.l.bf16 %v3305_v24 }
  0x97   : > { %v603_v29 = vmax.f32 %v4306_v41, %v3307_v25  ;;  %v602_v30 = vmax.f32 %v4301_v34, %v3306_v26  ;;  %v3295_v31 = vpop.permute.xlu0 %3294  ;;  %v3315_v26 = vpop.permute.xlu2 %3314 }
  0x98   : > { %v3297_v32 = vunpack.i.h.bf16 %v3295_v31  ;;  %v3296_v33 = vunpack.i.l.bf16 %v3295_v31  ;;  %v3316_v31 = vunpack.i.l.bf16 %v3315_v26 }
  0x99   : > { %658 = vst.msk [vmem:[#allocation2 + $0x71] sm:$0xf] %vm652_vm1, %v603_v29 }
  0x9a   : > { %657 = vst.msk [vmem:[#allocation2 + $0x69] sm:$0xf] %vm652_vm1, %v602_v30  ;;  %v599_v35 = vmax.f32 %v4319_v61, %v3297_v32  ;;  %v598_v39 = vmax.f32 %v4317_v60, %v3296_v33  ;;  %v3317_v30 = vunpack.i.h.bf16 %v3315_v26 }
  0x9c   : > { %654 = vst.msk [vmem:[#allocation2 + $0x41] sm:$0xf] %vm652_vm1, %v599_v35  ;;  %v3310_v40 = vpop.permute.xlu1 %3309  ;;  %v607_v33 = vmax.f32 %v4368_v11, %v3317_v30  ;;  %v606_v35 = vmax.f32 %v4362_v4, %v3316_v31 }
  0x9d   : > { %653 = vst.msk [vmem:[#allocation2 + $0x39] sm:$0xf] %vm652_vm1, %v598_v39  ;;  %v3312_v43 = vunpack.i.h.bf16 %v3310_v40  ;;  %v3311_v41 = vunpack.i.l.bf16 %v3310_v40 }
  0x9e   : > { %662 = vst.msk [vmem:[#allocation2 + $0xa1] sm:$0xf] %vm652_vm1, %v607_v33 }
  0x9f   : > { %v605_v34 = vmax.f32 %v4336_v21, %v3312_v43  ;;  %v604_v44 = vmax.f32 %v4331_v15, %v3311_v41  ;;  %v3300_v45 = vpop.permute.xlu0 %3299  ;;  %v4524_v21 = vld [vmem:[#allocation2 + $0x30] sm:$0x3f]  ;;  %v4597_v41 = vld [vmem:[#allocation2 + $0x58] sm:$0x3f]  ;;  %661 = vst.msk [vmem:[#allocation2 + $0x99] sm:$0xf] %vm652_vm1, %v606_v35  ;;  %v3320_v4 = vpop.permute.xlu2 %3319 }
  0xa0   : > { %v3302_v46 = vunpack.i.h.bf16 %v3300_v45  ;;  %v3301_v47 = vunpack.i.l.bf16 %v3300_v45  ;;  %v4526_v51 = vld [vmem:[#allocation2 + $0x70] sm:$0x3f]  ;;  %v763_v12 = vrot.slane %v4524_v21, 2  ;;  %v1183_v11 = vrot.slane %v4597_v41, 1 }
  0xa1   : > { %660 = vst.msk [vmem:[#allocation2 + $0x81] sm:$0xf] %vm652_vm1, %v605_v34  ;;  %v4512_v49 = vld [vmem:[#allocation2 + $0x68] sm:$0x3f]  ;;  %v3358_v54 = vpack.i.bf16 %v4526_v51, %v4524_v21  ;;  %v4560_v1 = vrot.slane %v4526_v51, 7  ;;  %v3378_v25 = vpack.i.bf16 %v4484_v13, %v4526_v51  ;;  %v3322_v34 = vunpack.i.h.bf16 %v3320_v4 }
  0xa2   : > { %659 = vst.msk [vmem:[#allocation2 + $0x79] sm:$0xf] %vm652_vm1, %v604_v44  ;;  %v601_v60 = vmax.f32 %v4351_v48, %v3302_v46  ;;  %v600_v61 = vmax.f32 %v4347_v42, %v3301_v47  ;;  %v3353_v50 = vpack.i.bf16 %v4512_v49, %v4484_v13  ;;  %v830_v56 = vrot.slane %v4512_v49, 7 }
  0xa3   : > { %v4543_v57 = vld [vmem:[#allocation2 + $0x40] sm:$0x3f]  ;;  %v3418_v6 = vpack.i.bf16 %v4560_v1, %v4557_v0  ;;  %v837_v32 = vrot.slane %v4512_v49, 1  ;;  %v3321_v44 = vunpack.i.l.bf16 %v3320_v4  ;;  %v759_v45 = vrot.slane %v4524_v21, 1  ;;  %v1113_v4 = vld [vmem:[#allocation2 + $0x28] sm:$0x3f] }
  0xa4   : > { %656 = vst.msk [vmem:[#allocation2 + $0x51] sm:$0xf] %vm652_vm1, %v601_v60  ;;  %3354 = vrot.lane.b32.xlu1 %v3353_v50, %s4146_s17  ;;  %v4522_v15 = vld [vmem:[#allocation2 + $0x38] sm:$0x3f]  ;;  %v3408_v58 = vpack.i.bf16 %v830_v56, %v739_v55  ;;  %v4579_v22 = vrot.slane %v4543_v57, 1  ;;  %v918_v29 = vrot.slane %v4543_v57, 2 }
  0xa5   : > { %655 = vst.msk [vmem:[#allocation2 + $0x49] sm:$0xf] %vm652_vm1, %v600_v61  ;;  %v3363_v62 = vpack.i.bf16 %v4543_v57, %v4522_v15  ;;  %v775_v19 = vrot.slane %v4522_v15, 2  ;;  %v3413_v40 = vpack.i.bf16 %v837_v32, %v4491_v17  ;;  %v849_v46 = vrot.slane %v4526_v51, 1 }
  0xa6   : > { %v3403_v24 = vpack.i.bf16 %v4579_v22, %v723_v20  ;;  %v609_v61 = vmax.f32 %v4376_v28, %v3322_v34  ;;  %v608_v50 = vmax.f32 %v4374_v27, %v3321_v44 }
  0xa7   : > { %v3428_v23 = vpack.i.bf16 %v775_v19, %v763_v12  ;;  %v3438_v39 = vpack.i.bf16 %v918_v29, %v775_v19  ;;  %v1213_v12 = vrot.slane %v4562_v2, 1  ;;  %v3473_v20 = vpack.i.bf16 %v4491_v17, %v849_v46  ;;  %v4654_v26 = vpop.permute.xlu2 %3344 }
  0xa8   : > { %v4528_v52 = vld [vmem:[#allocation2 + $0x80] sm:$0x3f]  ;;  %664 = vst.msk [vmem:[#allocation2 + $0xb1] sm:$0xf] %vm652_vm1, %v609_v61 }
  0xa9   : > { %v4530_v48 = vld [vmem:[#allocation2 + $0x78] sm:$0x3f]  ;;  %v3398_v42 = vpack.i.bf16 %v4522_v15, %v4528_v52  ;;  %v3383_v59 = vpack.i.bf16 %v4528_v52, %v4526_v51  ;;  %663 = vst.msk [vmem:[#allocation2 + $0xa9] sm:$0xf] %vm652_vm1, %v608_v50  ;;  %v771_v51 = vrot.slane %v4522_v15, 1 }
  0xaa   : > { %v3373_v53 = vpack.i.bf16 %v4530_v48, %v4512_v49  ;;  %v3393_v8 = vpack.i.bf16 %v4562_v2, %v4530_v48  ;;  %v3388_v43 = vpack.i.bf16 %v4486_v14, %v4530_v48  ;;  %v964_v47 = vrot.slane %v4530_v48, 7 }
  0xab   : > { %3399 = vrot.lane.b32.xlu0 %v3398_v42, %s4147_s18  ;;  %v4616_v21 = vld [vmem:[#allocation2 + $0x50] sm:$0x3f]  ;;  %v971_v28 = vrot.slane %v4530_v48, 1  ;;  %v1092_v48 = vrot.slane %v4528_v52, 1 }
  0xac   : > { %3374 = vrot.lane.b32.xlu2 %v3373_v53, %s4143_s29  ;;  %3359 = vrot.lane.b32.xlu1 %v3358_v54, %s4147_s18  ;;  %v4564_v5 = vld [vmem:[#allocation2 + $0x48] sm:$0x3f]  ;;  %v3423_v53 = vpack.i.bf16 %v849_v46, %v759_v45  ;;  %v3448_v54 = vpack.i.bf16 %v964_v47, %v830_v56  ;;  %v1062_v27 = vrot.slane %v4616_v21, 1 }
  0xad   : > { %v3368_v9 = vpack.i.bf16 %v4564_v5, %v4543_v57  ;;  %v4608_v60 = vrot.slane %v4564_v5, 1  ;;  %v3458_v56 = vpack.i.bf16 %v971_v28, %v837_v32  ;;  %v3513_v17 = vpack.i.bf16 %v771_v51, %v1092_v48 }
  0xae   : > { %v3453_v49 = vpack.i.bf16 %v735_v3, %v1062_v27  ;;  %v3463_v3 = vpack.i.bf16 %v739_v55, %v4560_v1  ;;  %v3503_v55 = vpack.i.bf16 %v1213_v12, %v971_v28  ;;  %v3325_v30 = vpop.permute.xlu0 %3324 }
  0xaf   : > { %v3443_v42 = vpack.i.bf16 %v1183_v11, %v4608_v60  ;;  %v3327_v31 = vunpack.i.h.bf16 %v3325_v30  ;;  %v3326_v32 = vunpack.i.l.bf16 %v3325_v30  ;;  %v3553_v61 = vpack.i.bf16 %v4579_v22, %v4608_v60 }
  0xb1   : > { %v610_v35 = vmax.f32 %v4472_v7, %v3326_v32  ;;  %v1137_v7 = vrot.slane %v1113_v4, 1 }
  0xb3   : > { %3409 = vrot.lane.b32.xlu0 %v3408_v58, %s4148_s19  ;;  %v3433_v58 = vpack.i.bf16 %v4579_v22, %v771_v51  ;;  %665 = vst.msk [vmem:[#allocation2 + $0xc9] sm:$0xf] %vm652_vm1, %v610_v35  ;;  %v1039_v51 = vrot.slane %v4564_v5, 2 }
  0xb4   : > { %3384 = vrot.lane.b32.xlu2 %v3383_v59, %s4146_s17  ;;  %3364 = vrot.lane.b32.xlu1 %v3363_v62, %s4149_s20  ;;  %v1085_v59 = vrot.slane %v4528_v52, 7  ;;  %v3478_v62 = vpack.i.bf16 %v1092_v48, %v849_v46 }
  0xb6   : > { %v3468_v15 = vpack.i.bf16 %v1085_v59, %v4560_v1  ;;  %v3483_v1 = vpack.i.bf16 %v4557_v0, %v964_v47 }
  0xbb   : > { %3419 = vrot.lane.b32.xlu0 %v3418_v6, %s4150_s21  ;;  %v3330_v6 = vpop.permute.xlu1 %3329 }
  0xbc   : > { %3394 = vrot.lane.b32.xlu2 %v3393_v8, %s4147_s18  ;;  %3369 = vrot.lane.b32.xlu1 %v3368_v9, %s4151_s22  ;;  %v3332_v8 = vunpack.i.h.bf16 %v3330_v6  ;;  %v3331_v9 = vunpack.i.l.bf16 %v3330_v6 }
  0xbe   : > { %v613_v52 = vmax.f32 %v4385_v38, %v3332_v8  ;;  %v612_v19 = vmax.f32 %v4381_v37, %v3331_v9  ;;  %v899_v38 = vrot.slane %v4486_v14, 2  ;;  %v3335_v22 = vpop.permute.xlu0 %3334 }
  0xbf   : > { %v3337_v6 = vunpack.i.h.bf16 %v3335_v22  ;;  %v3336_v8 = vunpack.i.l.bf16 %v3335_v22 }
  0xc0   : > { %668 = vst.msk [vmem:[#allocation2 + $0xe1] sm:$0xf] %vm652_vm1, %v613_v52  ;;  %v3498_v11 = vpack.i.bf16 %v4557_v0, %v899_v38  ;;  %v1141_v0 = vrot.slane %v1113_v4, 2 }
  0xc1   : > { %667 = vst.msk [vmem:[#allocation2 + $0xd9] sm:$0xf] %vm652_vm1, %v612_v19  ;;  %v3346_v19 = vunpack.i.l.bf16 %v4654_v26 }
  0xc3   : > { %3429 = vrot.lane.b32.xlu0 %v3428_v23, %s4152_s23  ;;  %v1206_v23 = vrot.slane %v4562_v2, 7  ;;  %v611_v2 = vmax.f32 %v4477_v10, %v3327_v31  ;;  %v4669_v10 = vpop.permute.xlu2 %3349  ;;  %v3340_v50 = vpop.permute.xlu1 %3339 }
  0xc4   : > { %3404 = vrot.lane.b32.xlu2 %v3403_v24, %s4144_s10  ;;  %3379 = vrot.lane.b32.xlu1 %v3378_v25, %s4143_s29  ;;  %v992_v24 = vld [vmem:[#allocation2 + $0x20] sm:$0x3f]  ;;  %v3508_v25 = vpack.i.bf16 %v899_v38, %v1085_v59  ;;  %v3578_v59 = vpack.i.bf16 %v4616_v21, %v4597_v41  ;;  %v3341_v9 = vunpack.i.l.bf16 %v3340_v50 }
  0xc5   : > { %v3488_v37 = vpack.i.bf16 %v1206_v23, %v964_v47  ;;  %v1016_v33 = vrot.slane %v992_v24, 1  ;;  %666 = vst.msk [vmem:[#allocation2 + $0xd1] sm:$0xf] %vm652_vm1, %v611_v2  ;;  %v3533_v34 = vpack.i.bf16 %v992_v24, %v1113_v4  ;;  %v1020_v45 = vrot.slane %v992_v24, 2 }
  0xc6   : > { %v3548_v47 = vpack.i.bf16 %v4543_v57, %v4564_v5  ;;  %vm1302_vm1 = vcmask 1045504  }
  0xc7   : > { %v3538_v44 = vpack.i.bf16 %v1016_v33, %v1137_v7  ;;  %v3528_v46 = vpack.i.bf16 %v899_v38, %v1020_v45 }
  0xcb   : > { %3439 = vrot.lane.b32.xlu0 %v3438_v39, %s5917_s24  ;;  %s4156_s24 = smov 52   ;;  %v3518_v39 = vpack.i.bf16 %v4486_v14, %v992_v24 }
  0xcc   : > { %3414 = vrot.lane.b32.xlu2 %v3413_v40, %s4154_s25  ;;  %3389 = vrot.lane.b32.xlu1 %v3388_v43, %s4146_s17  ;;  %v3523_v40 = vpack.i.bf16 %v4494_v18, %v1016_v33  ;;  %v3493_v43 = vpack.i.bf16 %v4494_v18, %v971_v28  ;;  %v3568_v28 = vpack.i.bf16 %v4608_v60, %v1062_v27  ;;  %v1160_v60 = vrot.slane %v4616_v21, 2 }
  0xd3   : > { %3444 = vrot.lane.b32.xlu0 %v3443_v42, %s4144_s10 }
  0xd4   : > { %3424 = vrot.lane.b32.xlu2 %v3423_v53, %s4155_s27  ;;  %3449 = vrot.lane.b32.xlu1 %v3448_v54, %s4145_s16  ;;  %v3543_v53 = vpack.i.bf16 %v1020_v45, %v1141_v0  ;;  %v3563_v54 = vpack.i.bf16 %v4564_v5, %v4616_v21 }
  0xdb   : > { %3454 = vrot.lane.b32.xlu0 %v3453_v49, %s4144_s10 }
  0xdc   : > { %3459 = vrot.lane.b32.xlu1 %v3458_v56, %s4142_s28  ;;  %3434 = vrot.lane.b32.xlu2 %v3433_v58, %s4156_s24  ;;  %v3558_v58 = vpack.i.bf16 %v918_v29, %v1039_v51  ;;  %v3573_v29 = vpack.i.bf16 %v1039_v51, %v1160_v60 }
  0xe3   : > { %3469 = vrot.lane.b32.xlu0 %v3468_v15, %s4148_s19 }
  0xe4   : > { %3479 = vrot.lane.b32.xlu1 %v3478_v62, %s4154_s25  ;;  %3464 = vrot.lane.b32.xlu2 %v3463_v3, %s4145_s16 }
  0xeb   : > { %3474 = vrot.lane.b32.xlu0 %v3473_v20, %s4142_s28 }
  0xec   : > { %3504 = vrot.lane.b32.xlu1 %v3503_v55, %s4155_s27  ;;  %3484 = vrot.lane.b32.xlu2 %v3483_v1, %s4148_s19  ;;  %v3342_v1 = vunpack.i.h.bf16 %v3340_v50 }
  0xf3   : > { %3489 = vrot.lane.b32.xlu0 %v3488_v37, %s4150_s21 }
  0xf4   : > { %3514 = vrot.lane.b32.xlu1 %v3513_v17, %s4155_s27  ;;  %3509 = vrot.lane.b32.xlu2 %v3508_v25, %s4150_s21 }
  0xfb   : > { %3494 = vrot.lane.b32.xlu0 %v3493_v43, %s4154_s25 }
  0xfc   : > { %3519 = vrot.lane.b32.xlu1 %v3518_v39, %s4143_s29  ;;  %3524 = vrot.lane.b32.xlu2 %v3523_v40, %s4142_s28  ;;  %s5925_s28 = smov 56   ;;  %s4157_s29 = smov 64  }
 0x103   : > { %3499 = vrot.lane.b32.xlu0 %v3498_v11, %s4145_s16 }
 0x104   : > { %3534 = vrot.lane.b32.xlu1 %v3533_v34, %s4146_s17  ;;  %3539 = vrot.lane.b32.xlu2 %v3538_v44, %s4154_s25 }
 0x106   : > { %v4675_v18 = vpop.permute.xlu2 %3374 }
 0x10b   : > { %3529 = vrot.lane.b32.xlu0 %v3528_v46, %s4148_s19 }
 0x10c   : > { %3549 = vrot.lane.b32.xlu1 %v3548_v47, %s4147_s18  ;;  %3554 = vrot.lane.b32.xlu2 %v3553_v61, %s4155_s27 }
 0x10e   : > { %v4684_v42 = vpop.permute.xlu2 %3384 }
 0x113   : > { %3544 = vrot.lane.b32.xlu0 %v3543_v53, %s4150_s21 }
 0x114   : > { %3564 = vrot.lane.b32.xlu1 %v3563_v54, %s4149_s20  ;;  %3569 = vrot.lane.b32.xlu2 %v3568_v28, %s4156_s24 }
 0x116   : > { %v4695_v49 = vpop.permute.xlu2 %3394  ;;  %v3355_v56 = vpop.permute.xlu1 %3354 }
 0x117   : > { %v3356_v31 = vunpack.i.l.bf16 %v3355_v56  ;;  %v3357_v40 = vunpack.i.h.bf16 %v3355_v56 }
 0x11b   : > { %3559 = vrot.lane.b32.xlu0 %v3558_v58, %s4152_s23 }
 0x11c   : > { %3579 = vrot.lane.b32.xlu1 %v3578_v59, %s4151_s22 }
 0x11d   : > { %v4704_v27 = vpop.permute.xlu0 %3399 }
 0x11e   : > { %v3360_v48 = vpop.permute.xlu1 %3359  ;;  %v3405_v15 = vpop.permute.xlu2 %3404 }
 0x11f   : > { %v3407_v62 = vunpack.i.h.bf16 %v3405_v15  ;;  %v3406_v3 = vunpack.i.l.bf16 %v3405_v15  ;;  %v3362_v46 = vunpack.i.h.bf16 %v3360_v48  ;;  %v3361_v47 = vunpack.i.l.bf16 %v3360_v48 }
 0x121   : > { %v853_v12 = vsel %vm783_vm2, %v4543_v57, %v3407_v62  ;;  %v784_v52 = vsel %vm783_vm2, %v4488_v16, %v3406_v3  ;;  %v3347_v16 = vunpack.i.h.bf16 %v4654_v26 }
 0x122   : > { %v854_v20 = vsel %vm785_vm3, %v853_v12, %v3337_v6  ;;  %v786_v55 = vsel %vm785_vm3, %v784_v52, %v3336_v8 }
 0x123   : > { %3574 = vrot.lane.b32.xlu0 %v3573_v29, %s5925_s28  ;;  %v788_v23 = vsel %vm787_vm4, %v786_v55, %v3341_v9  ;;  %v855_v57 = vsel %vm787_vm4, %v854_v20, %v3342_v1 }
 0x124   : > { %v790_v38 = vsel %vm789_vm5, %v788_v23, %v3346_v19  ;;  %v856_v33 = vsel %vm789_vm5, %v855_v57, %v3347_v16 }
 0x125   : > { %v3410_v37 = vpop.permute.xlu0 %3409 }
 0x126   : > { %v3415_v24 = vpop.permute.xlu2 %3414  ;;  %v3412_v17 = vunpack.i.h.bf16 %v3410_v37  ;;  %v3411_v25 = vunpack.i.l.bf16 %v3410_v37  ;;  %v4718_v30 = vpop.permute.xlu1 %3364 }
 0x127   : > { %v3416_v32 = vunpack.i.l.bf16 %v3415_v24  ;;  %v3417_v4 = vunpack.i.h.bf16 %v3415_v24  ;;  %v3366_v62 = vunpack.i.l.bf16 %v4718_v30 }
 0x128   : > { %v792_v2 = vsel %vm791_vm6, %v790_v38, %v3411_v25  ;;  %v857_v35 = vsel %vm791_vm6, %v856_v33, %v3412_v17 }
 0x129   : > { %v794_v39 = vsel %vm793_vm7, %v792_v2, %v3356_v31  ;;  %v858_v43 = vsel %vm793_vm7, %v857_v35, %v3357_v40 }
 0x12a   : > { %v796_v26 = vsel %vm795_vm8, %v794_v39, %v3416_v32  ;;  %v859_v61 = vsel %vm795_vm8, %v858_v43, %v3417_v4 }
 0x12d   : > { %v3420_v7 = vpop.permute.xlu0 %3419 }
 0x12e   : > { %v3425_v11 = vpop.permute.xlu2 %3424  ;;  %v3422_v34 = vunpack.i.h.bf16 %v3420_v7  ;;  %v3421_v44 = vunpack.i.l.bf16 %v3420_v7  ;;  %v4726_v45 = vpop.permute.xlu1 %3369 }
 0x12f   : > { %v3427_v0 = vunpack.i.h.bf16 %v3425_v11  ;;  %v3426_v50 = vunpack.i.l.bf16 %v3425_v11  ;;  %v3371_v19 = vunpack.i.l.bf16 %v4726_v45 }
 0x130   : > { %v798_v53 = vsel %vm797_vm9, %v796_v26, %v3421_v44  ;;  %v860_v54 = vsel %vm797_vm9, %v859_v61, %v3422_v34  ;;  %v3377_v34 = vunpack.i.h.bf16 %v4675_v18  ;;  %v3387_v61 = vunpack.i.h.bf16 %v4684_v42 }
 0x131   : > { %v800_v28 = vsel %vm799_vm10, %v798_v53, %v3361_v47  ;;  %v861_v22 = vsel %vm799_vm10, %v860_v54, %v3362_v46 }
 0x132   : > { %v802_v51 = vsel %vm801_vm11, %v800_v28, %v3426_v50  ;;  %v862_v56 = vsel %vm801_vm11, %v861_v22, %v3427_v0  ;;  %v3386_v0 = vunpack.i.l.bf16 %v4684_v42 }
 0x133   : > { %v864_v58 = vrot.slane %v862_v56, 1 }
 0x135   : > { %v4735_v59 = vpop.permute.xlu0 %3429  ;;  %865 = vrot.lane.b32.xlu2 %v864_v58, %s4157_s29 }
 0x136   : > { %v4738_v60 = vpop.permute.xlu1 %3379  ;;  %v3431_v48 = vunpack.i.l.bf16 %v4735_v59  ;;  %v4741_v15 = vpop.permute.xlu2 %3434 }
 0x137   : > { %v3436_v6 = vunpack.i.l.bf16 %v4741_v15  ;;  %v3382_v32 = vunpack.i.h.bf16 %v4738_v60 }
 0x138   : > { %v804_v3 = vsel %vm803_vm12, %v802_v51, %v3431_v48 }
 0x139   : > { %v806_v8 = vsel %vm805_vm13, %v804_v3, %v3366_v62 }
 0x13a   : > { %v808_v29 = vsel %vm807_vm14, %v806_v8, %v3436_v6 }
 0x13d   : > { %v4748_v9 = vpop.permute.xlu0 %3439 }
 0x13e   : > { %v4750_v12 = vpop.permute.xlu1 %3389  ;;  %v3441_v52 = vunpack.i.l.bf16 %v4748_v9  ;;  %v3465_v38 = vpop.permute.xlu2 %3464 }
 0x13f   : > { %v3467_v17 = vunpack.i.h.bf16 %v3465_v38  ;;  %v3392_v42 = vunpack.i.h.bf16 %v4750_v12 }
 0x140   : > { %v810_v20 = vsel %vm809_vm15, %v808_v29, %v3441_v52  ;;  %v3466_v52 = vunpack.i.l.bf16 %v3465_v38 }
 0x141   : > { %v4756_v55 = vsel %vm811_vm0, %v810_v20, %v3371_v19 }
 0x145   : > { %v3445_v1 = vpop.permute.xlu0 %3444 }
 0x146   : > { %v3450_v23 = vpop.permute.xlu1 %3449  ;;  %v3447_v57 = vunpack.i.h.bf16 %v3445_v1  ;;  %v3446_v37 = vunpack.i.l.bf16 %v3445_v1  ;;  %v3485_v56 = vpop.permute.xlu2 %3484 }
 0x147   : > { %v3452_v25 = vunpack.i.h.bf16 %v3450_v23  ;;  %v3451_v31 = vunpack.i.l.bf16 %v3450_v23  ;;  %v3487_v3 = vunpack.i.h.bf16 %v3485_v56  ;;  %v3381_v23 = vunpack.i.l.bf16 %v4738_v60 }
 0x148   : > { %v1217_v33 = vsel %vm783_vm2, %v4597_v41, %v3447_v57  ;;  %v975_v2 = vsel %vm783_vm2, %v4564_v5, %v3446_v37  ;;  %v3376_v41 = vunpack.i.l.bf16 %v4675_v18 }
 0x149   : > { %v1218_v43 = vsel %vm785_vm3, %v1217_v33, %v3452_v25  ;;  %v976_v4 = vsel %vm785_vm3, %v975_v2, %v3451_v31 }
 0x14a   : > { %v977_v5 = vsel %vm787_vm4, %v976_v4, %v3376_v41  ;;  %v1219_v46 = vsel %vm787_vm4, %v1218_v43, %v3377_v34  ;;  %v3486_v4 = vunpack.i.l.bf16 %v3485_v56 }
 0x14d   : > { %v3455_v16 = vpop.permute.xlu0 %3454 }
 0x14e   : > { %v3457_v24 = vunpack.i.h.bf16 %v3455_v16  ;;  %v3460_v35 = vpop.permute.xlu1 %3459  ;;  %v3456_v58 = vunpack.i.l.bf16 %v3455_v16  ;;  %v3510_v41 = vpop.permute.xlu2 %3509 }
 0x14f   : > { %v3462_v7 = vunpack.i.h.bf16 %v3460_v35  ;;  %v3461_v11 = vunpack.i.l.bf16 %v3460_v35 }
 0x150   : > { %v926_v39 = vsel %vm783_vm2, %v4469_v63, %v3457_v24  ;;  %v1096_v8 = vsel %vm783_vm2, %v4616_v21, %v3456_v58  ;;  %v3396_v21 = vunpack.i.l.bf16 %v4695_v49 }
 0x151   : > { %v927_v40 = vsel %vm785_vm3, %v926_v39, %v3467_v17  ;;  %v978_v50 = vsel %vm789_vm5, %v977_v5, %v3461_v11  ;;  %v1220_v53 = vsel %vm789_vm5, %v1219_v46, %v3462_v7  ;;  %v1097_v20 = vsel %vm785_vm3, %v1096_v8, %v3466_v52 }
 0x152   : > { %v928_v26 = vsel %vm787_vm4, %v927_v40, %v3382_v32  ;;  %v3397_v17 = vunpack.i.h.bf16 %v4695_v49  ;;  %v1098_v32 = vsel %vm787_vm4, %v1097_v20, %v3381_v23  ;;  %v3391_v5 = vunpack.i.l.bf16 %v4750_v12 }
 0x153   : > { %v3442_v20 = vunpack.i.h.bf16 %v4748_v9  ;;  %v3182_v9 = vld [vmem:[%s5908_s1 + $0x30] sm:$0x30] }
 0x155   : > { %v3470_v44 = vpop.permute.xlu0 %3469 }
 0x156   : > { %v3472_v63 = vunpack.i.h.bf16 %v3470_v44  ;;  %v3471_v47 = vunpack.i.l.bf16 %v3470_v44  ;;  %v3480_v51 = vpop.permute.xlu1 %3479 }
 0x157   : > { %v3482_v57 = vunpack.i.h.bf16 %v3480_v51  ;;  %v3481_v37 = vunpack.i.l.bf16 %v3480_v51 }
 0x158   : > { %v979_v54 = vsel %vm791_vm6, %v978_v50, %v3471_v47  ;;  %v1221_v28 = vsel %vm791_vm6, %v1220_v53, %v3472_v63  ;;  %v3512_v50 = vunpack.i.h.bf16 %v3510_v41  ;;  %v3511_v53 = vunpack.i.l.bf16 %v3510_v41 }
 0x159   : > { %v980_v18 = vsel %vm793_vm7, %v979_v54, %v3386_v0  ;;  %v1222_v22 = vsel %vm793_vm7, %v1221_v28, %v3387_v61  ;;  %v3402_v28 = vunpack.i.h.bf16 %v4704_v27 }
 0x15a   : > { %v981_v38 = vsel %vm795_vm8, %v980_v18, %v3481_v37  ;;  %v1223_v33 = vsel %vm795_vm8, %v1222_v22, %v3482_v57  ;;  %v3401_v18 = vunpack.i.l.bf16 %v4704_v27  ;;  %v3525_v37 = vpop.permute.xlu2 %3524 }
 0x15d   : > { %v3475_v48 = vpop.permute.xlu0 %3474 }
 0x15e   : > { %v3477_v62 = vunpack.i.h.bf16 %v3475_v48  ;;  %v3505_v1 = vpop.permute.xlu1 %3504  ;;  %v3476_v16 = vunpack.i.l.bf16 %v3475_v48 }
 0x15f   : > { %v3507_v2 = vunpack.i.h.bf16 %v3505_v1  ;;  %v3506_v35 = vunpack.i.l.bf16 %v3505_v1 }
 0x160   : > { %v929_v6 = vsel %vm789_vm5, %v928_v26, %v3477_v62  ;;  %v1099_v40 = vsel %vm789_vm5, %v1098_v32, %v3476_v16  ;;  %v3432_v62 = vunpack.i.h.bf16 %v4735_v59  ;;  %v3372_v59 = vunpack.i.h.bf16 %v4726_v45 }
 0x161   : > { %v930_v29 = vsel %vm791_vm6, %v929_v6, %v3487_v3  ;;  %v1100_v44 = vsel %vm791_vm6, %v1099_v40, %v3486_v4  ;;  %v3367_v6 = vunpack.i.h.bf16 %v4718_v30  ;;  %v3352_v4 = vunpack.i.h.bf16 %v4669_v10 }
 0x162   : > { %v931_v19 = vsel %vm793_vm7, %v930_v29, %v3392_v42  ;;  %v1101_v54 = vsel %vm793_vm7, %v1100_v44, %v3391_v5  ;;  %v3437_v29 = vunpack.i.h.bf16 %v4741_v15  ;;  %v4826_v16 = vpop.permute.xlu2 %3539  ;;  %v3041_v15 = vld [vmem:[%s5908_s1 + $0x30] sm:$0xf]  ;;  %v3526_v5 = vunpack.i.l.bf16 %v3525_v37 }
 0x163   : > { %v3042_v45 = vor.u32 %v3182_v9, %v3041_v15  ;;  %v1047_v44 = vsel %vm783_vm2, %v4484_v13, %v3352_v4 }
 0x165   : > { %v3490_v24 = vpop.permute.xlu0 %3489 }
 0x166   : > { %v3492_v25 = vunpack.i.h.bf16 %v3490_v24  ;;  %v3491_v31 = vunpack.i.l.bf16 %v3490_v24  ;;  %v3515_v47 = vpop.permute.xlu1 %3514 }
 0x167   : > { %v3517_v12 = vunpack.i.h.bf16 %v3515_v47  ;;  %v3516_v56 = vunpack.i.l.bf16 %v3515_v47 }
 0x168   : > { %v982_v60 = vsel %vm797_vm9, %v981_v38, %v3491_v31  ;;  %v1224_v39 = vsel %vm797_vm9, %v1223_v33, %v3492_v25  ;;  %v3181_v25 = vld [vmem:[%s5908_s1 + $0x28] sm:$0xff]  ;;  %v3179_v33 = vld [vmem:[%s5908_s1 + $0x18] sm:$0xff] }
 0x169   : > { %v983_v26 = vsel %vm799_vm10, %v982_v60, %v3396_v21  ;;  %v1225_v43 = vsel %vm799_vm10, %v1224_v39, %v3397_v17  ;;  %v1304_v17 = vsel %vm1302_vm1, %v3042_v45, 0  ;;  %v3180_v21 = vld [vmem:[%s5908_s1 + $0x20] sm:$0xff]  ;;  %v3351_v60 = vunpack.i.l.bf16 %v4669_v10 }
 0x16a   : > { %v984_v49 = vsel %vm801_vm11, %v983_v26, %v3506_v35  ;;  %v1226_v7 = vsel %vm801_vm11, %v1225_v43, %v3507_v2  ;;  %v4834_v24 = vpop.permute.xlu2 %3554  ;;  %1307 = vmatpush.bf16.msra.mxu0 %v1304_v17  ;;  %v3178_v35 = vld [vmem:[%s5908_s1 + $0x10] sm:$0xff]  ;;  %v3177_v43 = vld [vmem:[%s5908_s1 + $0x8] sm:$0xff]  ;;  %vm669_vm1 = vcmask 62464  }
 0x16b   : > { %v986_v11 = vrot.slane %v984_v49, 1  ;;  %v1228_v34 = vrot.slane %v1226_v7, 1  ;;  %v1168_v49 = vsel %vm783_vm2, %v4486_v14, %v3351_v60  ;;  %vm868_vm2 = vcmask 523264   ;;  %670 = vst.msk [vmem:[#allocation3] sm:$0x3f] %vm669_vm1, %v4141_v36 }
 0x16c   : > { %671 = vst.msk [vmem:[#allocation3 + $0x8] sm:$0x3f] %vm669_vm1, %v4141_v36 }
 0x16d   : > { %v3495_v46 = vpop.permute.xlu0 %3494  ;;  %v3583_v63 = vpack.i.bf16 %v1228_v34, %v986_v11  ;;  %672 = vst.msk [vmem:[#allocation3 + $0x10] sm:$0x3f] %vm669_vm1, %v4141_v36 }
 0x16e   : > { %v3497_v61 = vunpack.i.h.bf16 %v3495_v46  ;;  %v3496_v0 = vunpack.i.l.bf16 %v3495_v46  ;;  %1308 = vmatpush.bf16.msra.mxu0 %v3181_v25  ;;  %v3520_v32 = vpop.permute.xlu1 %3519  ;;  %673 = vst.msk [vmem:[#allocation3 + $0x18] sm:$0x3f] %vm669_vm1, %v4141_v36 }
 0x16f   : > { %3584 = vrot.lane.b32.xlu2 %v3583_v63, %s4157_s29  ;;  %v3521_v7 = vunpack.i.l.bf16 %v3520_v32  ;;  %v3522_v46 = vunpack.i.h.bf16 %v3520_v32  ;;  %674 = vst.msk [vmem:[#allocation3 + $0x20] sm:$0x3f] %vm669_vm1, %v4141_v36 }
 0x170   : > { %v932_v22 = vsel %vm795_vm8, %v931_v19, %v3497_v61  ;;  %v1102_v51 = vsel %vm795_vm8, %v1101_v54, %v3496_v0  ;;  %v3527_v0 = vunpack.i.h.bf16 %v3525_v37  ;;  %675 = vst.msk [vmem:[#allocation3 + $0x28] sm:$0x3f] %vm669_vm1, %v4141_v36  ;;  %v3556_v37 = vunpack.i.l.bf16 %v4834_v24 }
 0x171   : > { %v933_v58 = vsel %vm797_vm9, %v932_v22, %v3512_v50  ;;  %v1103_v48 = vsel %vm797_vm9, %v1102_v51, %v3511_v53  ;;  %v3176_v50 = vld [vmem:[%s5908_s1] sm:$0xff]  ;;  %676 = vst.msk [vmem:[#allocation3 + $0x30] sm:$0x3f] %vm669_vm1, %v4141_v36 }
 0x172   : > { %v934_v3 = vsel %vm799_vm10, %v933_v58, %v3402_v28  ;;  %v1104_v42 = vsel %vm799_vm10, %v1103_v48, %v3401_v18  ;;  %v4842_v38 = vpop.permute.xlu2 %3569  ;;  %1309 = vmatpush.bf16.msra.mxu0 %v3180_v21  ;;  %677 = vst.msk [vmem:[#allocation3 + $0x38] sm:$0x3f] %vm669_vm1, %v4141_v36  ;;  %v3557_v21 = vunpack.i.h.bf16 %v4834_v24 }
 0x173   : > { %v935_v27 = vsel %vm801_vm11, %v934_v3, %v3517_v12  ;;  %v1105_v8 = vsel %vm801_vm11, %v1104_v42, %v3516_v56  ;;  %v3541_v56 = vunpack.i.l.bf16 %v4826_v16  ;;  %678 = vst.msk [vmem:[#allocation3 + $0x40] sm:$0x3f] %vm669_vm1, %v4141_v36  ;;  %v3571_v60 = vunpack.i.l.bf16 %v4842_v38 }
 0x174   : > { %v936_v52 = vsel %vm803_vm12, %v935_v27, %v3432_v62  ;;  %v1107_v19 = vrot.slane %v1105_v8, 1  ;;  %681 = vst.msk [vmem:[#allocation3 + $0x58] sm:$0x3f] %vm669_vm1, %v4141_v36 }
 0x175   : > { %v937_v1 = vsel %vm805_vm13, %v936_v52, %v3367_v6  ;;  %v3500_v31 = vpop.permute.xlu0 %3499  ;;  %682 = vst.msk [vmem:[#allocation3 + $0x60] sm:$0x3f] %vm669_vm1, %v4141_v36 }
 0x176   : > { %1108 = vrot.lane.b32.xlu0 %v1107_v19, %s4157_s29  ;;  %v938_v23 = vsel %vm807_vm14, %v937_v1, %v3437_v29  ;;  %1310 = vmatpush.bf16.msra.mxu0 %v3179_v33  ;;  %v3501_v39 = vunpack.i.l.bf16 %v3500_v31  ;;  %v3535_v40 = vpop.permute.xlu1 %3534  ;;  %v3502_v11 = vunpack.i.h.bf16 %v3500_v31  ;;  %683 = vst.msk [vmem:[#allocation3 + $0x68] sm:$0x3f] %vm669_vm1, %v4141_v36 }
 0x177   : > { %v939_v30 = vsel %vm809_vm15, %v938_v23, %v3442_v20  ;;  %v3536_v54 = vunpack.i.l.bf16 %v3535_v40  ;;  %v3537_v58 = vunpack.i.h.bf16 %v3535_v40  ;;  %684 = vst.msk [vmem:[#allocation3 + $0x70] sm:$0x3f] %vm669_vm1, %v4141_v36 }
 0x178   : > { %v940_v57 = vsel %vm811_vm0, %v939_v30, %v3372_v59  ;;  %v1169_v34 = vsel %vm785_vm3, %v1168_v49, %v3501_v39  ;;  %v1048_v63 = vsel %vm785_vm3, %v1047_v44, %v3502_v11  ;;  %vm1239_vm3 = vcmask 1043456   ;;  %685 = vst.msk [vmem:[#allocation3 + $0x78] sm:$0x3f] %vm669_vm1, %v4141_v36 }
 0x179   : > { %v1170_v47 = vsel %vm787_vm4, %v1169_v34, %v3521_v7  ;;  %v1049_v53 = vsel %vm787_vm4, %v1048_v63, %v3522_v46  ;;  %686 = vst.msk [vmem:[#allocation3 + $0x80] sm:$0x3f] %vm669_vm1, %v4141_v36  ;;  %v3572_v11 = vunpack.i.h.bf16 %v4842_v38  ;;  %vm1298_vm4 = vcmask 883712  }
 0x17a   : > { %1311 = vmatpush.bf16.msra.mxu0 %v3178_v35  ;;  %v1171_v13 = vsel %vm789_vm5, %v1170_v47, %v3526_v5  ;;  %v1050_v62 = vsel %vm789_vm5, %v1049_v53, %v3527_v0  ;;  %687 = vst.msk [vmem:[#allocation3 + $0x88] sm:$0x3f] %vm669_vm1, %v4141_v36  ;;  %v3589_v53 = vld [vmem:[%s5910_s3] ss:$0 sm:$0xff]  ;;  %vm1335_vm5 = vcmask 60416  }
 0x17b   : > { %688 = vst.msk [vmem:[#allocation3 + $0x90] sm:$0x3f] %vm669_vm1, %v4141_v36 }
 0x17c   : > { %689 = vst.msk [vmem:[#allocation3 + $0x98] sm:$0x3f] %vm669_vm1, %v4141_v36 }
 0x17d   : > { %v3530_v2 = vpop.permute.xlu0 %3529  ;;  %690 = vst.msk [vmem:[#allocation3 + $0xa0] sm:$0x3f] %vm669_vm1, %v4141_v36 }
 0x17e   : > { %1312 = vmatpush.bf16.msra.mxu0 %v3177_v43  ;;  %v3531_v61 = vunpack.i.l.bf16 %v3530_v2  ;;  %v3550_v28 = vpop.permute.xlu1 %3549  ;;  %v3532_v18 = vunpack.i.h.bf16 %v3530_v2  ;;  %691 = vst.msk [vmem:[#allocation3 + $0xa8] sm:$0x3f] %vm669_vm1, %v4141_v36 }
 0x17f   : > { %v3551_v1 = vunpack.i.l.bf16 %v3550_v28  ;;  %v3552_v15 = vunpack.i.h.bf16 %v3550_v28  ;;  %692 = vst.msk [vmem:[#allocation3 + $0xb0] sm:$0x3f] %vm669_vm1, %v4141_v36 }
 0x180   : > { %v1172_v22 = vsel %vm791_vm6, %v1171_v13, %v3531_v61  ;;  %v1051_v27 = vsel %vm791_vm6, %v1050_v62, %v3532_v18  ;;  %693 = vst.msk [vmem:[#allocation3 + $0xb8] sm:$0x3f] %vm669_vm1, %v4141_v36  ;;  %vm1338_vm6 = vcmask 64516  }
 0x181   : > { %v1173_v3 = vsel %vm793_vm7, %v1172_v22, %v3536_v54  ;;  %v1052_v52 = vsel %vm793_vm7, %v1051_v27, %v3537_v58  ;;  %694 = vst.msk [vmem:[#allocation3 + $0xc0] sm:$0x3f] %vm669_vm1, %v4141_v36 }
 0x182   : > { %1313 = vmatpush.bf16.msra.mxu0 %v3176_v50  ;;  %v1174_v29 = vsel %vm795_vm8, %v1173_v3, %v3541_v56  ;;  %695 = vst.msk [vmem:[#allocation3 + $0xc8] sm:$0x3f] %vm669_vm1, %v4141_v36  ;;  %v3588_v50 = vld [vmem:[%s5909_s2] ss:$0 sm:$0xff] }
 0x183   : > { %696 = vst.msk [vmem:[#allocation3 + $0xd0] sm:$0x3f] %vm669_vm1, %v4141_v36 }
 0x184   : > { %697 = vst.msk [vmem:[#allocation3 + $0xd8] sm:$0x3f] %vm669_vm1, %v4141_v36 }
 0x185   : > { %v3545_v41 = vpop.permute.xlu0 %3544  ;;  %698 = vst.msk [vmem:[#allocation3 + $0xe0] sm:$0x3f] %vm669_vm1, %v4141_v36 }
 0x186   : > { %v3546_v42 = vunpack.i.l.bf16 %v3545_v41  ;;  %v3547_v19 = vunpack.i.h.bf16 %v3545_v41  ;;  %v3565_v59 = vpop.permute.xlu1 %3564  ;;  %699 = vst.msk [vmem:[#allocation3 + $0xe8] sm:$0x3f] %vm669_vm1, %v4141_v36 }
 0x187   : > { %v3566_v32 = vunpack.i.l.bf16 %v3565_v59  ;;  %v3567_v24 = vunpack.i.h.bf16 %v3565_v59  ;;  %700 = vst.msk [vmem:[#allocation3 + $0xf0] sm:$0x3f] %vm669_vm1, %v4141_v36 }
 0x188   : > { %v1175_v20 = vsel %vm797_vm9, %v1174_v29, %v3546_v42  ;;  %701 = vst.msk [vmem:[#allocation3 + $0xf8] sm:$0x3f] %vm669_vm1, %v4141_v36 }
 0x189   : > { %v1176_v30 = vsel %vm799_vm10, %v1175_v20, %v3551_v1  ;;  %702 = vst.msk [vmem:[#allocation3 + $0x100] sm:$0x3f] %vm669_vm1, %v4141_v36 }
 0x18a   : > { %v1177_v9 = vsel %vm801_vm11, %v1176_v30, %v3556_v37  ;;  %703 = vst.msk [vmem:[#allocation3 + $0x108] sm:$0x3f] %vm669_vm1, %v4141_v36 }
 0x18b   : > { %704 = vst.msk [vmem:[#allocation3 + $0x110] sm:$0x3f] %vm669_vm1, %v4141_v36 }
 0x18c   : > { %705 = vst.msk [vmem:[#allocation3 + $0x118] sm:$0x3f] %vm669_vm1, %v4141_v36 }
 0x18d   : > { %v3560_v8 = vpop.permute.xlu0 %3559  ;;  %679 = vst.msk [vmem:[#allocation3 + $0x48] sm:$0x3f] %vm669_vm1, %v4141_v36 }
 0x18e   : > { %v3562_v17 = vunpack.i.h.bf16 %v3560_v8  ;;  %v3580_v40 = vpop.permute.xlu1 %3579  ;;  %680 = vst.msk [vmem:[#allocation3 + $0x50] sm:$0x3f] %vm669_vm1, %v4141_v36 }
 0x18f   : > { %v866_v26 = vpop.permute.xlu2 %865  ;;  %v3581_v34 = vunpack.i.l.bf16 %v3580_v40  ;;  %v3582_v38 = vunpack.i.h.bf16 %v3580_v40 }
 0x190   : > { %v869_v48 = vsel %vm868_vm2, %v4756_v55, %v866_v26  ;;  %v3542_v55 = vunpack.i.h.bf16 %v4826_v16 }
 0x192   : > { %v1053_v23 = vsel %vm795_vm8, %v1052_v52, %v3542_v55 }
 0x193   : > { %v1054_v16 = vsel %vm797_vm9, %v1053_v23, %v3547_v19 }
 0x194   : > { %v1055_v45 = vsel %vm799_vm10, %v1054_v16, %v3552_v15 }
 0x195   : > { %v3575_v31 = vpop.permute.xlu0 %3574  ;;  %v1056_v33 = vsel %vm801_vm11, %v1055_v45, %v3557_v21 }
 0x196   : > { %v3576_v35 = vunpack.i.l.bf16 %v3575_v31  ;;  %v1057_v39 = vsel %vm803_vm12, %v1056_v33, %v3562_v17  ;;  %v3577_v4 = vunpack.i.h.bf16 %v3575_v31 }
 0x197   : > { %v1058_v43 = vsel %vm805_vm13, %v1057_v39, %v3567_v24 }
 0x198   : > { %v1059_v44 = vsel %vm807_vm14, %v1058_v43, %v3572_v11 }
 0x199   : > { %v1060_v46 = vsel %vm809_vm15, %v1059_v44, %v3577_v4 }
 0x19a   : > { %v1061_v47 = vsel %vm811_vm0, %v1060_v46, %v3582_v38 }
 0x1c9   : > { %v4862_v10 = vpop.permute.xlu2 %3584 }
 0x1ca   : > { %v3586_v14 = vunpack.i.l.bf16 %v4862_v10  ;;  %v3587_v7 = vunpack.i.h.bf16 %v4862_v10 }
 0x1cc   : > { %v990_v51 = vsel %vm868_vm2, %v940_v57, %v3586_v14  ;;  %v3561_v57 = vunpack.i.l.bf16 %v3560_v8 }
 0x1cd   : > { %v1234_v12 = vrot.slane %v990_v51, 4 }
 0x1ce   : > { %v1178_v25 = vsel %vm803_vm12, %v1177_v9, %v3561_v57 }
 0x1cf   : > { %v4880_v6 = vsel %vm1239_vm3, %v869_v48, %v1234_v12  ;;  %v1179_v2 = vsel %vm805_vm13, %v1178_v25, %v3566_v32 }
 0x1d0   : > { %v1180_v26 = vsel %vm807_vm14, %v1179_v2, %v3571_v60 }
 0x1d1   : > { %v1181_v49 = vsel %vm809_vm15, %v1180_v26, %v3576_v35 }
 0x1d2   : > { %v1182_v41 = vsel %vm811_vm0, %v1181_v49, %v3581_v34 }
 0x1d3   : > { %v1232_v5 = vsel %vm868_vm2, %v1182_v41, %v3587_v7 }
 0x1d4   : > { %v1237_v63 = vrot.slane %v1232_v5, 4 }
 0x1e8   : > { %v1109_v61 = vpop.permute.xlu0 %1108 }
 0x1e9   : > { %v1111_v10 = vsel %vm868_vm2, %v1061_v47, %v1109_v61 }
 0x1ea   : > { %v1241_v0 = vsel %vm1239_vm3, %v1111_v10, %v1237_v63 }
 0x1eb   : > { %v1242_v14 = vpack.c.bf16 %v1241_v0, %v4880_v6 }
 0x1ed   : > { %3043 = vmatmul.msk.bf16.vlgmr.msra.gmra.mxu0 %vm1298_vm4, %v1242_v14 }
 0x26a   : > { %v1315_v54 = vpop.f32.mrf.mxu0 }
 0x26b   : > { %v1324_v13 = vmul.f32 %v3588_v50, %v1315_v54 }
 0x26d   : > { %v1330_v28 = vadd.f32 %v3589_v53, %v1324_v13 }
 0x26f   : > { %v1332_v18 = vmax.f32 %v1330_v28, 0.0 }
 0x271   : > { %1336 = vst.msk [vmem:[#allocation3 + $0x39] sm:$0xf] %vm1335_vm5, %v1332_v18 }
 0x272   : > { %1339 = vst.msk [vmem:[#allocation3 + $0x3d] sm:$0xf0] %vm1338_vm6, %v1332_v18  ;;  %v1317_v22 = vpop.f32.mrf.mxu0 }
 0x273   : > { %v1325_v51 = vmul.f32 %v3588_v50, %v1317_v22 }
 0x275   : > { %v1331_v12 = vadd.f32 %v3589_v53, %v1325_v51 }
 0x277   : > { %v1333_v36 = vmax.f32 %v1331_v12, 0.0 }
 0x279   : > { %1341 = vst.msk [vmem:[#allocation3 + $0x49] sm:$0xf] %vm1335_vm5, %v1333_v36 }
 0x27a   : > { %1343 = vst.msk [vmem:[#allocation3 + $0x4d] sm:$0xf0] %vm1338_vm6, %v1333_v36 }
 0x27b PF: > { %s1344_s21 = sadd.s32 1, %s4122_s30 }
 0x27c   : > { %p3044_p8 = scmp.ge.s32.totalorder %s1344_s21, 4 }
 0x27d   : > { %s5918_s22 = smul.u32 (!%p3044_p8), 48, %s4122_s30  ;;  %s4158_s24 = smov (!%p3044_p8), 12  }
 0x27e   : > { %1348 = sbr.rel (%p3044_p8) target bundleno = 1116 (0x45c), region = 64  ;;  %s4159_s25 = smov (!%p3044_p8), 4  }
 0x27f   : > { %s4992_s23 = scalar_lea.vmem (!%p3044_p8), [#allocation2], %s5918_s22  ;;  %s4160_s27 = smov (!%p3044_p8), 20  }
 0x280   : > { %s4161_s28 = smov (!%p3044_p8), 16   ;;  %s4162_s29 = smov (!%p3044_p8), 8  }
 0x281   : > { %s4163_s10 = smov (!%p3044_p8), 24   ;;  %s4164_s16 = smov (!%p3044_p8), 32  }
 0x282   : > { %s4165_s17 = smov (!%p3044_p8), 28   ;;  %s4166_s18 = smov (!%p3044_p8), 36  }
 0x283   : > { %v4995_v56 = vld [vmem:[%s4992_s23 + $0x38] sm:$0x3f]  ;;  %v3051_v58 = vld [vmem:[%s4992_s23 + $0x90] sm:$0x3f]  ;;  %v5026_v30 = vld [vmem:[%s4992_s23 + $0x40] sm:$0x3f] }
 0x284   : > { %v4999_v48 = vld [vmem:[%s4992_s23 + $0x30] sm:$0x3f]  ;;  %v3600_v62 = vpack.i.bf16 %v3051_v58, %v4995_v56  ;;  %v1391_v27 = vrot.slane %v4995_v56, 1  ;;  %v1481_v8 = vrot.slane %v3051_v58, 1  ;;  %v5012_v55 = vld [vmem:[%s4992_s23 + $0x98] sm:$0x3f] }
 0x285   : > { %v5003_v3 = vld [vmem:[%s4992_s23 + $0x70] sm:$0x3f]  ;;  %v1379_v42 = vrot.slane %v4999_v48, 1  ;;  %v1395_v52 = vrot.slane %v4995_v56, 2  ;;  %v1486_v19 = vrot.slane %v5012_v55, 7  ;;  %v1383_v20 = vrot.slane %v4999_v48, 2 }
 0x286   : > { %v5007_v6 = vrot.slane %v5003_v3, 1  ;;  %3601 = vrot.lane.b32.xlu1 %v3600_v62, %s4158_s24  ;;  %v1474_v1 = vrot.slane %v3051_v58, 7  ;;  %v3605_v59 = vpack.i.bf16 %v1481_v8, %v1391_v27  ;;  %v5029_v57 = vld [vmem:[%s4992_s23 + $0xa0] sm:$0x3f]  ;;  %v5034_v16 = vrot.slane %v5026_v30, 2  ;;  %s5919_s19 = smov 44  }
 0x287   : > { %v3610_v23 = vpack.i.bf16 %v1486_v19, %v1395_v52  ;;  %v5037_v15 = vrot.slane %v5029_v57, 7  ;;  %v3615_v9 = vpack.i.bf16 %v5012_v55, %v5026_v30  ;;  %v5043_v45 = vrot.slane %v5026_v30, 1  ;;  %v3048_v31 = vld [vmem:[%s4992_s23 + $0x60] sm:$0x3f]  ;;  %v5050_v21 = vld [vmem:[%s4992_s23 + $0x68] sm:$0x3f] }
 0x288   : > { %v3590_v29 = vpack.i.bf16 %v5007_v6, %v1379_v42  ;;  %v3595_v37 = vpack.i.bf16 %v1474_v1, %v1383_v20  ;;  %v1493_v17 = vrot.slane %v5012_v55, 1  ;;  %v1419_v33 = vrot.slane %v3048_v31, 2  ;;  %s4168_s20 = smov 40   ;;  %v5069_v7 = vld [vmem:[%s4992_s23 + $0x78] sm:$0x3f]  ;;  %s5920_s21 = smov 48  }
 0x289   : > { %3611 = vrot.lane.b32.xlu2 %v3610_v23, %s4160_s27  ;;  %v3625_v25 = vpack.i.bf16 %v5037_v15, %v5034_v16  ;;  %v1431_v2 = vrot.slane %v5050_v21, 2  ;;  %v3630_v35 = vpack.i.bf16 %v5029_v57, %v3048_v31  ;;  %v1415_v60 = vrot.slane %v3048_v31, 1  ;;  %v5072_v11 = vld [vmem:[%s4992_s23 + $0x88] sm:$0x3f]  ;;  %s4170_s22 = smov 56  }
 0x28a   : > { %3591 = vrot.lane.b32.xlu0 %v3590_v29, %s4159_s25  ;;  %v3620_v32 = vpack.i.bf16 %v1493_v17, %v5043_v45  ;;  %v1505_v39 = vrot.slane %v5029_v57, 1  ;;  %v1577_v26 = vrot.slane %v5003_v3, 2  ;;  %v3645_v43 = vpack.i.bf16 %v5003_v3, %v5050_v21  ;;  %v3056_v38 = vld [vmem:[%s4992_s23 + $0xa8] sm:$0x3f]  ;;  %v5089_v63 = vld [vmem:[%s4992_s23 + $0x80] sm:$0x3f] }
 0x28b   : > { %v3640_v24 = vpack.i.bf16 %v1431_v2, %v1419_v33  ;;  %v1427_v4 = vrot.slane %v5050_v21, 1  ;;  %v5080_v41 = vrot.slane %v5069_v7, 1  ;;  %v1848_v44 = vrot.slane %v5072_v11, 1  ;;  %v3059_v50 = vld [vmem:[%s4992_s23 + $0xb0] sm:$0x3f] }
 0x28c   : > { %v3635_v40 = vpack.i.bf16 %v1505_v39, %v1415_v60  ;;  %v3655_v49 = vpack.i.bf16 %v1577_v26, %v1431_v2  ;;  %v3660_v5 = vpack.i.bf16 %v5069_v7, %v5003_v3  ;;  %v1623_v47 = vrot.slane %v3056_v38, 7  ;;  %v3062_v36 = vld [vmem:[%s4992_s23 + $0xb8] sm:$0x3f] }
 0x28d   : > { %v3650_v34 = vpack.i.bf16 %v5007_v6, %v1427_v4  ;;  %v3665_v46 = vpack.i.bf16 %v1848_v44, %v5080_v41  ;;  %v3675_v61 = vpack.i.bf16 %v3056_v38, %v5012_v55  ;;  %v1724_v10 = vrot.slane %v5089_v63, 1  ;;  %v5123_v55 = vld [vmem:[%s4992_s23 + $0x48] sm:$0x3f]  ;;  %v5149_v33 = vld [vmem:[%s4992_s23 + $0x58] sm:$0x3f] }
 0x28e   : > { %3606 = vrot.lane.b32.xlu1 %v3605_v59, %s4161_s28  ;;  %v3670_v0 = vpack.i.bf16 %v1623_v47, %v1486_v19  ;;  %v1630_v53 = vrot.slane %v3056_v38, 1  ;;  %v3690_v54 = vpack.i.bf16 %v1395_v52, %v5037_v15  ;;  %v1747_v13 = vrot.slane %v3059_v50, 7 }
 0x28f   : > { %v3680_v14 = vpack.i.bf16 %v1391_v27, %v1724_v10  ;;  %v3705_v22 = vpack.i.bf16 %v3059_v50, %v5029_v57  ;;  %v3700_v51 = vpack.i.bf16 %v5026_v30, %v5029_v57  ;;  %v3710_v12 = vpack.i.bf16 %v5043_v45, %v1505_v39 }
 0x290   : > { %v3685_v28 = vpack.i.bf16 %v1630_v53, %v1493_v17  ;;  %v3695_v18 = vpack.i.bf16 %v1747_v13, %v5037_v15  ;;  %v1754_v58 = vrot.slane %v3059_v50, 1  ;;  %v3720_v62 = vpack.i.bf16 %v5034_v16, %v1623_v47 }
 0x291   : > { %3616 = vrot.lane.b32.xlu2 %v3615_v9, %s4163_s10  ;;  %v1871_v42 = vrot.slane %v3062_v36, 7  ;;  %v3735_v29 = vpack.i.bf16 %v3062_v36, %v3056_v38  ;;  %v1554_v52 = vrot.slane %v5123_v55, 1  ;;  %v3730_v19 = vpack.i.bf16 %v5123_v55, %v3056_v38  ;;  %v5139_v9 = vld [vmem:[%s4992_s23 + $0x50] sm:$0x3f]  ;;  %s5926_s23 = smov 44  }
 0x292   : > { %3596 = vrot.lane.b32.xlu0 %v3595_v37, %s4162_s29  ;;  %v3715_v27 = vpack.i.bf16 %v1754_v58, %v1505_v39  ;;  %v1558_v20 = vrot.slane %v5123_v55, 2  ;;  %v1878_v59 = vrot.slane %v3062_v36, 1  ;;  %v3755_v37 = vpack.i.bf16 %v5050_v21, %v3059_v50 }
 0x293   : > { %v3725_v8 = vpack.i.bf16 %v1871_v42, %v1623_v47  ;;  %v3740_v1 = vpack.i.bf16 %v1554_v52, %v1630_v53  ;;  %v3765_v15 = vpack.i.bf16 %v5043_v45, %v1554_v52  ;;  %v3760_v17 = vpack.i.bf16 %v1427_v4, %v1754_v58 }
 0x294   : > { %v3750_v23 = vpack.i.bf16 %v1558_v20, %v1747_v13  ;;  %v3745_v57 = vpack.i.bf16 %v1878_v59, %v1630_v53  ;;  %v1802_v45 = vrot.slane %v5149_v33, 1  ;;  %v3770_v21 = vpack.i.bf16 %v5034_v16, %v1558_v20 }
 0x295   : > { %v3810_v60 = vpack.i.bf16 %v5007_v6, %v5080_v41  ;;  %v1682_v39 = vrot.slane %v5139_v9, 2  ;;  %v3825_v16 = vpack.i.bf16 %v5080_v41, %v1724_v10  ;;  %vm1439_vm7 = vcmask 31744  }
 0x296   : > { %3626 = vrot.lane.b32.xlu1 %v3625_v25, %s4164_s16  ;;  %v1678_v25 = vrot.slane %v5139_v9, 1  ;;  %vm1441_vm8 = vcmask 64512   ;;  %vm1443_vm9 = vcmask 97280   ;;  %vm1445_vm10 = vcmask 130048  }
 0x297   : > { %vm1447_vm11 = vcmask 162816   ;;  %v1701_v53 = vrot.slane %v5069_v7, 2  ;;  %vm1449_vm12 = vcmask 195584   ;;  %vm1451_vm13 = vcmask 228352  }
 0x298   : > { %v3780_v31 = vpack.i.bf16 %v1554_v52, %v1678_v25  ;;  %v3795_v2 = vpack.i.bf16 %v1678_v25, %v1802_v45  ;;  %vm1453_vm14 = vcmask 261120   ;;  %vm1455_vm15 = vcmask 293888  }
 0x299   : > { %3631 = vrot.lane.b32.xlu2 %v3630_v35, %s4166_s18  ;;  %v3815_v42 = vpack.i.bf16 %v1577_v26, %v1701_v53  ;;  %vm1457_vm0 = vcmask 326656   ;;  %vm1459_vm2 = vcmask 359424   ;;  %vm1461_vm3 = vcmask 392192  }
 0x29a   : > { %3621 = vrot.lane.b32.xlu0 %v3620_v32, %s4165_s17  ;;  %vm1463_vm1 = vcmask 424960   ;;  %vm1465_vm4 = vcmask 457728   ;;  %vm1467_vm5 = vcmask 490496   ;;  %vm1967_vm6 = vcmask 1045504  }
 0x29e   : > { %3641 = vrot.lane.b32.xlu1 %v3640_v24, %s5919_s19  ;;  %s4171_s19 = smov 52  }
 0x2a1   : > { %3646 = vrot.lane.b32.xlu2 %v3645_v43, %s5920_s21  ;;  %s4172_s21 = smov 60  }
 0x2a2   : > { %3636 = vrot.lane.b32.xlu0 %v3635_v40, %s4168_s20  ;;  %v3785_v40 = vpack.i.bf16 %v1558_v20, %v1682_v39 }
 0x2a6   : > { %3656 = vrot.lane.b32.xlu1 %v3655_v49, %s4170_s22  ;;  %v1806_v49 = vrot.slane %v5149_v33, 2 }
 0x2a8   : > { %v3800_v6 = vpack.i.bf16 %v1682_v39, %v1806_v49 }
 0x2a9   : > { %3661 = vrot.lane.b32.xlu2 %v3660_v5, %s4172_s21 }
 0x2aa   : > { %3651 = vrot.lane.b32.xlu0 %v3650_v34, %s4171_s19 }
 0x2ae   : > { %3666 = vrot.lane.b32.xlu1 %v3665_v46, %s4159_s25 }
 0x2b1   : > { %3671 = vrot.lane.b32.xlu2 %v3670_v0, %s4162_s29 }
 0x2b2   : > { %3676 = vrot.lane.b32.xlu0 %v3675_v61, %s4158_s24 }
 0x2b6   : > { %3681 = vrot.lane.b32.xlu1 %v3680_v14, %s4159_s25 }
 0x2b9   : > { %3686 = vrot.lane.b32.xlu2 %v3685_v28, %s4161_s28 }
 0x2ba   : > { %3691 = vrot.lane.b32.xlu0 %v3690_v54, %s4162_s29 }
 0x2be   : > { %3696 = vrot.lane.b32.xlu1 %v3695_v18, %s4160_s27 }
 0x2c1   : > { %3701 = vrot.lane.b32.xlu2 %v3700_v51, %s4158_s24 }
 0x2c2   : > { %3706 = vrot.lane.b32.xlu0 %v3705_v22, %s4163_s10 }
 0x2c6   : > { %3711 = vrot.lane.b32.xlu1 %v3710_v12, %s4161_s28 }
 0x2c9   : > { %3716 = vrot.lane.b32.xlu2 %v3715_v27, %s4165_s17  ;;  %v3775_v27 = vpack.i.bf16 %v5123_v55, %v5139_v9 }
 0x2ca   : > { %3721 = vrot.lane.b32.xlu0 %v3720_v62, %s4160_s27 }
 0x2ce   : > { %3726 = vrot.lane.b32.xlu1 %v3725_v8, %s4164_s16 }
 0x2d1   : > { %3731 = vrot.lane.b32.xlu2 %v3730_v19, %s4163_s10 }
 0x2d2   : > { %3736 = vrot.lane.b32.xlu0 %v3735_v29, %s4166_s18 }
 0x2d6   : > { %3741 = vrot.lane.b32.xlu1 %v3740_v1, %s4165_s17 }
 0x2d9   : > { %3746 = vrot.lane.b32.xlu2 %v3745_v57, %s4168_s20  ;;  %v1825_v57 = vrot.slane %v5089_v63, 2 }
 0x2da   : > { %3751 = vrot.lane.b32.xlu0 %v3750_v23, %s4164_s16 }
 0x2de   : > { %3756 = vrot.lane.b32.xlu1 %v3755_v37, %s4166_s18 }
 0x2e1   : > { %3761 = vrot.lane.b32.xlu2 %v3760_v17, %s4168_s20 }
 0x2e2   : > { %3766 = vrot.lane.b32.xlu0 %v3765_v15, %s4159_s25 }
 0x2e3   : > { %v5146_v32 = vpop.permute.xlu2 %3611 }
 0x2e4   : > { %v3613_v38 = vunpack.i.l.bf16 %v5146_v32  ;;  %v3614_v8 = vunpack.i.h.bf16 %v5146_v32 }
 0x2e6   : > { %3771 = vrot.lane.b32.xlu1 %v3770_v21, %s4162_s29  ;;  %v3830_v21 = vpack.i.bf16 %v1701_v53, %v1825_v57 }
 0x2e9   : > { %3776 = vrot.lane.b32.xlu2 %v3775_v27, %s4158_s24  ;;  %s5927_s24 = smov 48  }
 0x2ea   : > { %3781 = vrot.lane.b32.xlu0 %v3780_v31, %s4161_s28 }
 0x2eb   : > { %v5153_v35 = vpop.permute.xlu2 %3616 }
 0x2ec   : > { %v3618_v51 = vunpack.i.l.bf16 %v5153_v35  ;;  %v3619_v1 = vunpack.i.h.bf16 %v5153_v35 }
 0x2ee   : > { %3786 = vrot.lane.b32.xlu1 %v3785_v40, %s4160_s27 }
 0x2f2   : > { %3796 = vrot.lane.b32.xlu0 %v3795_v2, %s4165_s17  ;;  %s5928_s17 = smul.u32 48, %s4122_s30 }
 0x2f3   : > { %v5161_v24 = vpop.permute.xlu2 %3631 }
 0x2f4   : > { %v3633_v37 = vunpack.i.l.bf16 %v5161_v24  ;;  %v3634_v40 = vunpack.i.h.bf16 %v5161_v24 }
 0x2f6   : > { %3801 = vrot.lane.b32.xlu1 %v3800_v6, %s4164_s16 }
 0x2f8   : > { %v3602_v43 = vpop.permute.xlu1 %3601 }
 0x2f9   : > { %v3604_v41 = vunpack.i.h.bf16 %v3602_v43  ;;  %v3603_v0 = vunpack.i.l.bf16 %v3602_v43 }
 0x2fa   : > { %3811 = vrot.lane.b32.xlu0 %v3810_v60, %s4168_s20  ;;  %v3790_v60 = vpack.i.bf16 %v5139_v9, %v5149_v33 }
 0x2fb   : > { %v5169_v34 = vpop.permute.xlu2 %3646 }
 0x2fc   : > { %v3592_v4 = vpop.permute.xlu0 %3591  ;;  %3791 = vrot.lane.b32.xlu2 %v3790_v60, %s4163_s10  ;;  %v3648_v9 = vunpack.i.l.bf16 %v5169_v34 }
 0x2fd   : > { %v3594_v5 = vunpack.i.h.bf16 %v3592_v4  ;;  %v3593_v46 = vunpack.i.l.bf16 %v3592_v4 }
 0x2fe   : > { %3816 = vrot.lane.b32.xlu1 %v3815_v42, %s5926_s23 }
 0x2ff   : > { %v1509_v14 = vsel %vm1439_vm7, %v5003_v3, %v3594_v5  ;;  %v1440_v50 = vsel %vm1439_vm7, %v4999_v48, %v3593_v46 }
 0x300   : > { %v3607_v44 = vpop.permute.xlu1 %3606 }
 0x301   : > { %v3609_v54 = vunpack.i.h.bf16 %v3607_v44  ;;  %v3608_v13 = vunpack.i.l.bf16 %v3607_v44 }
 0x302   : > { %3826 = vrot.lane.b32.xlu0 %v3825_v16, %s4171_s19 }
 0x303   : > { %v5181_v22 = vpop.permute.xlu2 %3661 }
 0x304   : > { %v3597_v47 = vpop.permute.xlu0 %3596 }
 0x305   : > { %v3599_v61 = vunpack.i.h.bf16 %v3597_v47  ;;  %v3598_v10 = vunpack.i.l.bf16 %v3597_v47 }
 0x306   : > { %3831 = vrot.lane.b32.xlu1 %v3830_v21, %s4170_s22  ;;  %s4173_s22 = smov 64  }
 0x307   : > { %v1442_v28 = vsel %vm1441_vm8, %v1440_v50, %v3598_v10  ;;  %v1510_v18 = vsel %vm1441_vm8, %v1509_v14, %v3599_v61  ;;  %v3663_v14 = vunpack.i.l.bf16 %v5181_v22 }
 0x308   : > { %v1444_v12 = vsel %vm1443_vm9, %v1442_v28, %v3603_v0  ;;  %v1511_v36 = vsel %vm1443_vm9, %v1510_v18, %v3604_v41  ;;  %v3627_v62 = vpop.permute.xlu1 %3626  ;;  %v3805_v41 = vpack.i.bf16 %v5003_v3, %v5069_v7 }
 0x309   : > { %v1446_v58 = vsel %vm1445_vm10, %v1444_v12, %v3608_v13  ;;  %v1512_v48 = vsel %vm1445_vm10, %v1511_v36, %v3609_v54  ;;  %v3628_v23 = vunpack.i.l.bf16 %v3627_v62  ;;  %v3629_v45 = vunpack.i.h.bf16 %v3627_v62 }
 0x30a   : > { %v1448_v29 = vsel %vm1447_vm11, %v1446_v58, %v3613_v38  ;;  %v1513_v20 = vsel %vm1447_vm11, %v1512_v48, %v3614_v8  ;;  %3806 = vrot.lane.b32.xlu2 %v3805_v41, %s4166_s18  ;;  %v3820_v54 = vpack.i.bf16 %v5069_v7, %v5089_v63  ;;  %v3835_v12 = vpack.i.bf16 %v5089_v63, %v5072_v11  ;;  %s2890_s18 = scalar_lea.vmem [#allocation3], %s5928_s17 }
 0x30b   : > { %v1450_v52 = vsel %vm1449_vm12, %v1448_v29, %v3618_v51  ;;  %v1514_v17 = vsel %vm1449_vm12, %v1513_v20, %v3619_v1  ;;  %v5203_v25 = vpop.permute.xlu2 %3671 }
 0x30c   : > { %v3622_v19 = vpop.permute.xlu0 %3621  ;;  %v3674_v20 = vunpack.i.h.bf16 %v5203_v25  ;;  %v3673_v1 = vunpack.i.l.bf16 %v5203_v25 }
 0x30d   : > { %v3624_v26 = vunpack.i.h.bf16 %v3622_v19  ;;  %v3623_v59 = vunpack.i.l.bf16 %v3622_v19 }
 0x30f   : > { %v1452_v15 = vsel %vm1451_vm13, %v1450_v52, %v3623_v59  ;;  %v1515_v32 = vsel %vm1451_vm13, %v1514_v17, %v3624_v26 }
 0x310   : > { %v1454_v31 = vsel %vm1453_vm14, %v1452_v15, %v3628_v23  ;;  %v5207_v2 = vpop.permute.xlu1 %3641  ;;  %v1516_v39 = vsel %vm1453_vm14, %v1515_v32, %v3629_v45 }
 0x311   : > { %v1456_v35 = vsel %vm1455_vm15, %v1454_v31, %v3633_v37  ;;  %v3643_v49 = vunpack.i.l.bf16 %v5207_v2  ;;  %v1517_v6 = vsel %vm1455_vm15, %v1516_v39, %v3634_v40 }
 0x312   : > { %3821 = vrot.lane.b32.xlu2 %v3820_v54, %s5927_s24 }
 0x313   : > { %v3687_v47 = vpop.permute.xlu2 %3686 }
 0x314   : > { %v3637_v43 = vpop.permute.xlu0 %3636  ;;  %v3689_v31 = vunpack.i.h.bf16 %v3687_v47  ;;  %v3688_v32 = vunpack.i.l.bf16 %v3687_v47 }
 0x315   : > { %v3639_v4 = vunpack.i.h.bf16 %v3637_v43  ;;  %v3638_v16 = vunpack.i.l.bf16 %v3637_v43 }
 0x317   : > { %v1458_v33 = vsel %vm1457_vm0, %v1456_v35, %v3638_v16  ;;  %v1518_v44 = vsel %vm1457_vm0, %v1517_v6, %v3639_v4 }
 0x318   : > { %v1460_v5 = vsel %vm1459_vm2, %v1458_v33, %v3643_v49  ;;  %v1520_v46 = vrot.slane %v1518_v44, 1  ;;  %v5222_v24 = vpop.permute.xlu1 %3656 }
 0x319   : > { %v1462_v38 = vsel %vm1461_vm3, %v1460_v5, %v3648_v9  ;;  %v3658_v0 = vunpack.i.l.bf16 %v5222_v24 }
 0x31a   : > { %1521 = vrot.lane.b32.xlu0 %v1520_v46, %s4173_s22  ;;  %3836 = vrot.lane.b32.xlu2 %v3835_v12, %s4172_s21 }
 0x31b   : > { %v5241_v28 = vpop.permute.xlu2 %3701 }
 0x31c   : > { %v5229_v61 = vpop.permute.xlu0 %3651  ;;  %v3704_v62 = vunpack.i.h.bf16 %v5241_v28 }
 0x31d   : > { %v3653_v10 = vunpack.i.l.bf16 %v5229_v61 }
 0x31f   : > { %v1464_v50 = vsel %vm1463_vm1, %v1462_v38, %v3653_v10 }
 0x320   : > { %v1466_v3 = vsel %vm1465_vm4, %v1464_v50, %v3658_v0  ;;  %v3667_v53 = vpop.permute.xlu1 %3666 }
 0x321   : > { %v5239_v13 = vsel %vm1467_vm5, %v1466_v3, %v3663_v14  ;;  %v3669_v8 = vunpack.i.h.bf16 %v3667_v53  ;;  %v3668_v29 = vunpack.i.l.bf16 %v3667_v53 }
 0x323   : > { %v3717_v27 = vpop.permute.xlu2 %3716  ;;  %v1882_v59 = vsel %vm1439_vm7, %v5072_v11, %v3669_v8 }
 0x324   : > { %v3677_v18 = vpop.permute.xlu0 %3676  ;;  %v1883_v17 = vsel %vm1441_vm8, %v1882_v59, %v3674_v20  ;;  %v3719_v46 = vunpack.i.h.bf16 %v3717_v27  ;;  %v3718_v38 = vunpack.i.l.bf16 %v3717_v27 }
 0x325   : > { %v3679_v23 = vunpack.i.h.bf16 %v3677_v18  ;;  %v3678_v57 = vunpack.i.l.bf16 %v3677_v18 }
 0x327   : > { %v1884_v25 = vsel %vm1443_vm9, %v1883_v17, %v3679_v23 }
 0x328   : > { %v3682_v51 = vpop.permute.xlu1 %3681  ;;  %v1885_v40 = vsel %vm1445_vm10, %v1884_v25, %v3689_v31 }
 0x329   : > { %v3684_v36 = vunpack.i.h.bf16 %v3682_v51  ;;  %v3683_v5 = vunpack.i.l.bf16 %v3682_v51  ;;  %v3703_v51 = vunpack.i.l.bf16 %v5241_v28 }
 0x32b   : > { %v1585_v58 = vsel %vm1439_vm7, %v4995_v56, %v3684_v36  ;;  %v1634_v56 = vsel %vm1439_vm7, %v5069_v7, %v3668_v29  ;;  %v5260_v45 = vpop.permute.xlu2 %3731  ;;  %v1758_v53 = vsel %vm1439_vm7, %v5089_v63, %v3683_v5 }
 0x32c   : > { %v3692_v48 = vpop.permute.xlu0 %3691  ;;  %v1635_v15 = vsel %vm1441_vm8, %v1634_v56, %v3673_v1  ;;  %v3734_v6 = vunpack.i.h.bf16 %v5260_v45  ;;  %v3733_v17 = vunpack.i.l.bf16 %v5260_v45 }
 0x32d   : > { %v3694_v42 = vunpack.i.h.bf16 %v3692_v48  ;;  %v1636_v35 = vsel %vm1443_vm9, %v1635_v15, %v3678_v57  ;;  %v3693_v14 = vunpack.i.l.bf16 %v3692_v48 }
 0x32e   : > { %v1637_v7 = vsel %vm1445_vm10, %v1636_v35, %v3688_v32 }
 0x32f   : > { %v1586_v52 = vsel %vm1441_vm8, %v1585_v58, %v3694_v42  ;;  %v1759_v8 = vsel %vm1441_vm8, %v1758_v53, %v3693_v14  ;;  %v3659_v14 = vunpack.i.h.bf16 %v5222_v24  ;;  %v3189_v24 = vld [vmem:[%s5908_s1 + $0x30] sm:$0x30] }
 0x330   : > { %v1587_v19 = vsel %vm1443_vm9, %v1586_v52, %v3704_v62  ;;  %v3697_v26 = vpop.permute.xlu1 %3696  ;;  %v1760_v20 = vsel %vm1443_vm9, %v1759_v8, %v3703_v51  ;;  %v3187_v51 = vld [vmem:[%s5908_s1 + $0x20] sm:$0xff] }
 0x331   : > { %v3699_v21 = vunpack.i.h.bf16 %v3697_v26  ;;  %v3698_v11 = vunpack.i.l.bf16 %v3697_v26 }
 0x333   : > { %v1638_v9 = vsel %vm1447_vm11, %v1637_v7, %v3698_v11  ;;  %v1886_v33 = vsel %vm1447_vm11, %v1885_v40, %v3699_v21  ;;  %v3747_v3 = vpop.permute.xlu2 %3746 }
 0x334   : > { %v3707_v37 = vpop.permute.xlu0 %3706  ;;  %v3749_v27 = vunpack.i.h.bf16 %v3747_v3  ;;  %v3748_v48 = vunpack.i.l.bf16 %v3747_v3 }
 0x335   : > { %v3709_v43 = vunpack.i.h.bf16 %v3707_v37  ;;  %v3708_v4 = vunpack.i.l.bf16 %v3707_v37 }
 0x337   : > { %v1639_v41 = vsel %vm1449_vm12, %v1638_v9, %v3708_v4  ;;  %v1887_v10 = vsel %vm1449_vm12, %v1886_v33, %v3709_v43  ;;  %v3644_v33 = vunpack.i.h.bf16 %v5207_v2  ;;  %v3664_v2 = vunpack.i.h.bf16 %v5181_v22 }
 0x338   : > { %v3712_v60 = vpop.permute.xlu1 %3711  ;;  %v1640_v12 = vsel %vm1451_vm13, %v1639_v41, %v3718_v38  ;;  %v1888_v36 = vsel %vm1451_vm13, %v1887_v10, %v3719_v46  ;;  %v3649_v46 = vunpack.i.h.bf16 %v5169_v34  ;;  %v3654_v41 = vunpack.i.h.bf16 %v5229_v61  ;;  %v3089_v61 = vld [vmem:[%s5908_s1 + $0x30] sm:$0xf] }
 0x339   : > { %v3714_v39 = vunpack.i.h.bf16 %v3712_v60  ;;  %v3713_v29 = vunpack.i.l.bf16 %v3712_v60 }
 0x33b   : > { %v1588_v16 = vsel %vm1445_vm10, %v1587_v19, %v3714_v39  ;;  %v1761_v56 = vsel %vm1445_vm10, %v1760_v20, %v3713_v29  ;;  %v3762_v60 = vpop.permute.xlu2 %3761  ;;  %v3186_v20 = vld [vmem:[%s5908_s1 + $0x18] sm:$0xff] }
 0x33c   : > { %v3722_v49 = vpop.permute.xlu0 %3721  ;;  %v3764_v45 = vunpack.i.h.bf16 %v3762_v60 }
 0x33d   : > { %v3724_v44 = vunpack.i.h.bf16 %v3722_v49  ;;  %v3723_v1 = vunpack.i.l.bf16 %v3722_v49 }
 0x33f   : > { %v1589_v47 = vsel %vm1447_vm11, %v1588_v16, %v3724_v44  ;;  %v1762_v32 = vsel %vm1447_vm11, %v1761_v56, %v3723_v1  ;;  %v3763_v16 = vunpack.i.l.bf16 %v3762_v60 }
 0x340   : > { %v1590_v0 = vsel %vm1449_vm12, %v1589_v47, %v3734_v6  ;;  %v3727_v50 = vpop.permute.xlu1 %3726  ;;  %v1763_v39 = vsel %vm1449_vm12, %v1762_v32, %v3733_v17 }
 0x341   : > { %v3729_v54 = vunpack.i.h.bf16 %v3727_v50  ;;  %v3728_v18 = vunpack.i.l.bf16 %v3727_v50 }
 0x343   : > { %v1641_v58 = vsel %vm1453_vm14, %v1640_v12, %v3728_v18  ;;  %v1889_v62 = vsel %vm1453_vm14, %v1888_v36, %v3729_v54  ;;  %v3090_v54 = vor.u32 %v3189_v24, %v3089_v61  ;;  %v3188_v18 = vld [vmem:[%s5908_s1 + $0x28] sm:$0xff] }
 0x344   : > { %v3737_v42 = vpop.permute.xlu0 %3736 }
 0x345   : > { %v3739_v52 = vunpack.i.h.bf16 %v3737_v42  ;;  %v3738_v63 = vunpack.i.l.bf16 %v3737_v42  ;;  %v1969_v22 = vsel %vm1967_vm6, %v3090_v54, 0 }
 0x346   : > { %1972 = vmatpush.bf16.msra.mxu0 %v1969_v22 }
 0x347   : > { %v1642_v19 = vsel %vm1455_vm15, %v1641_v58, %v3738_v63  ;;  %v1890_v28 = vsel %vm1455_vm15, %v1889_v62, %v3739_v52  ;;  %v3777_v62 = vpop.permute.xlu2 %3776 }
 0x348   : > { %v1643_v26 = vsel %vm1457_vm0, %v1642_v19, %v3748_v48  ;;  %v1891_v59 = vsel %vm1457_vm0, %v1890_v28, %v3749_v27  ;;  %v3742_v23 = vpop.permute.xlu1 %3741  ;;  %v3778_v52 = vunpack.i.l.bf16 %v3777_v62  ;;  %v3779_v56 = vunpack.i.h.bf16 %v3777_v62 }
 0x349   : > { %v1645_v57 = vrot.slane %v1643_v26, 1  ;;  %v1893_v37 = vrot.slane %v1891_v59, 1  ;;  %v3744_v15 = vunpack.i.h.bf16 %v3742_v23  ;;  %v3743_v25 = vunpack.i.l.bf16 %v3742_v23 }
 0x34a   : > { %1973 = vmatpush.bf16.msra.mxu0 %v3188_v18 }
 0x34b   : > { %v3840_v31 = vpack.i.bf16 %v1893_v37, %v1645_v57  ;;  %v1591_v35 = vsel %vm1451_vm13, %v1590_v0, %v3744_v15  ;;  %v1764_v43 = vsel %vm1451_vm13, %v1763_v39, %v3743_v25  ;;  %v3185_v37 = vld [vmem:[%s5908_s1 + $0x10] sm:$0xff] }
 0x34c   : > { %v3752_v21 = vpop.permute.xlu0 %3751 }
 0x34d   : > { %v3754_v11 = vunpack.i.h.bf16 %v3752_v21  ;;  %3841 = vrot.lane.b32.xlu0 %v3840_v31, %s4173_s22  ;;  %v3753_v7 = vunpack.i.l.bf16 %v3752_v21 }
 0x34e   : > { %1974 = vmatpush.bf16.msra.mxu0 %v3187_v51 }
 0x34f   : > { %v1592_v40 = vsel %vm1453_vm14, %v1591_v35, %v3754_v11  ;;  %v1765_v9 = vsel %vm1453_vm14, %v1764_v43, %v3753_v7 }
 0x350   : > { %v3757_v4 = vpop.permute.xlu1 %3756 }
 0x351   : > { %v3759_v49 = vunpack.i.h.bf16 %v3757_v4  ;;  %v3758_v6 = vunpack.i.l.bf16 %v3757_v4  ;;  %v3183_v4 = vld [vmem:[%s5908_s1] sm:$0xff] }
 0x352   : > { %1975 = vmatpush.bf16.msra.mxu0 %v3186_v20 }
 0x353   : > { %v1593_v44 = vsel %vm1455_vm15, %v1592_v40, %v3759_v49  ;;  %v1766_v5 = vsel %vm1455_vm15, %v1765_v9, %v3758_v6 }
 0x354   : > { %v1594_v38 = vsel %vm1457_vm0, %v1593_v44, %v3764_v45  ;;  %v1767_v47 = vsel %vm1457_vm0, %v1766_v5, %v3763_v16  ;;  %v3767_v12 = vpop.permute.xlu0 %3766 }
 0x355   : > { %v1595_v10 = vsel %vm1459_vm2, %v1594_v38, %v3644_v33  ;;  %v1769_v0 = vrot.slane %v1767_v47, 1  ;;  %v3768_v42 = vunpack.i.l.bf16 %v3767_v12  ;;  %v3769_v8 = vunpack.i.h.bf16 %v3767_v12 }
 0x356   : > { %v1596_v50 = vsel %vm1461_vm3, %v1595_v10, %v3649_v46  ;;  %v3792_v59 = vpop.permute.xlu2 %3791  ;;  %1976 = vmatpush.bf16.msra.mxu0 %v3185_v37 }
 0x357   : > { %1770 = vrot.lane.b32.xlu1 %v1769_v0, %s4173_s22  ;;  %v1597_v3 = vsel %vm1463_vm1, %v1596_v50, %v3654_v41  ;;  %v1833_v29 = vsel %vm1439_vm7, %v5123_v55, %v3768_v42  ;;  %v1709_v1 = vsel %vm1439_vm7, %v5026_v30, %v3769_v8  ;;  %v3184_v30 = vld [vmem:[%s5908_s1 + $0x8] sm:$0xff]  ;;  %v3793_v25 = vunpack.i.l.bf16 %v3792_v59 }
 0x358   : > { %v1598_v34 = vsel %vm1465_vm4, %v1597_v3, %v3659_v14  ;;  %v3772_v58 = vpop.permute.xlu1 %3771  ;;  %v3794_v7 = vunpack.i.h.bf16 %v3792_v59  ;;  %vm1524_vm7 = vcmask 523264  }
 0x359   : > { %v5311_v53 = vsel %vm1467_vm5, %v1598_v34, %v3664_v2  ;;  %v3773_v48 = vunpack.i.l.bf16 %v3772_v58  ;;  %v3774_v19 = vunpack.i.h.bf16 %v3772_v58 }
 0x35a   : > { %1977 = vmatpush.bf16.msra.mxu0 %v3184_v30 }
 0x35b   : > { %v1834_v28 = vsel %vm1441_vm8, %v1833_v29, %v3773_v48  ;;  %v1710_v55 = vsel %vm1441_vm8, %v1709_v1, %v3774_v19  ;;  %vm1904_vm8 = vcmask 1043456  }
 0x35c   : > { %v3782_v36 = vpop.permute.xlu0 %3781  ;;  %v1835_v23 = vsel %vm1443_vm9, %v1834_v28, %v3778_v52  ;;  %v1711_v32 = vsel %vm1443_vm9, %v1710_v55, %v3779_v56  ;;  %vm1963_vm9 = vcmask 883712  }
 0x35d   : > { %v3783_v26 = vunpack.i.l.bf16 %v3782_v36  ;;  %v3784_v17 = vunpack.i.h.bf16 %v3782_v36 }
 0x35e   : > { %1978 = vmatpush.bf16.msra.mxu0 %v3183_v4 }
 0x35f   : > { %v1836_v31 = vsel %vm1445_vm10, %v1835_v23, %v3783_v26  ;;  %v1712_v60 = vsel %vm1445_vm10, %v1711_v32, %v3784_v17  ;;  %vm2000_vm10 = vcmask 60416  }
 0x360   : > { %v3787_v63 = vpop.permute.xlu1 %3786 }
 0x361   : > { %v3788_v15 = vunpack.i.l.bf16 %v3787_v63  ;;  %v3789_v35 = vunpack.i.h.bf16 %v3787_v63 }
 0x363   : > { %v1837_v21 = vsel %vm1447_vm11, %v1836_v31, %v3788_v15  ;;  %v1713_v45 = vsel %vm1447_vm11, %v1712_v60, %v3789_v35  ;;  %vm2003_vm11 = vcmask 64516  }
 0x364   : > { %v3797_v27 = vpop.permute.xlu0 %3796  ;;  %v1838_v40 = vsel %vm1449_vm12, %v1837_v21, %v3793_v25  ;;  %v3807_v43 = vpop.permute.xlu2 %3806  ;;  %v1714_v33 = vsel %vm1449_vm12, %v1713_v45, %v3794_v7  ;;  %v3845_v21 = vld [vmem:[%s5909_s2] ss:$0 sm:$0xff] }
 0x365   : > { %v3798_v39 = vunpack.i.l.bf16 %v3797_v27  ;;  %v3799_v6 = vunpack.i.h.bf16 %v3797_v27  ;;  %v3808_v44 = vunpack.i.l.bf16 %v3807_v43  ;;  %v3809_v10 = vunpack.i.h.bf16 %v3807_v43 }
 0x367   : > { %v1839_v9 = vsel %vm1451_vm13, %v1838_v40, %v3798_v39  ;;  %v1715_v38 = vsel %vm1451_vm13, %v1714_v33, %v3799_v6 }
 0x368   : > { %v3802_v11 = vpop.permute.xlu1 %3801 }
 0x369   : > { %v3803_v49 = vunpack.i.l.bf16 %v3802_v11  ;;  %v3804_v5 = vunpack.i.h.bf16 %v3802_v11  ;;  %v3846_v11 = vld [vmem:[%s5910_s3] ss:$0 sm:$0xff] }
 0x36b   : > { %v1840_v46 = vsel %vm1453_vm14, %v1839_v9, %v3803_v49  ;;  %v1716_v14 = vsel %vm1453_vm14, %v1715_v38, %v3804_v5 }
 0x36c   : > { %v3812_v57 = vpop.permute.xlu0 %3811  ;;  %v1841_v0 = vsel %vm1455_vm15, %v1840_v46, %v3808_v44  ;;  %v3822_v50 = vpop.permute.xlu2 %3821  ;;  %v1717_v24 = vsel %vm1455_vm15, %v1716_v14, %v3809_v10 }
 0x36d   : > { %v3813_v41 = vunpack.i.l.bf16 %v3812_v57  ;;  %v3814_v3 = vunpack.i.h.bf16 %v3812_v57  ;;  %v3823_v54 = vunpack.i.l.bf16 %v3822_v50  ;;  %v3824_v58 = vunpack.i.h.bf16 %v3822_v50 }
 0x36f   : > { %v1842_v61 = vsel %vm1457_vm0, %v1841_v0, %v3813_v41  ;;  %v1718_v51 = vsel %vm1457_vm0, %v1717_v24, %v3814_v3 }
 0x370   : > { %v3817_v47 = vpop.permute.xlu1 %3816 }
 0x371   : > { %v3818_v2 = vunpack.i.l.bf16 %v3817_v47  ;;  %v3819_v22 = vunpack.i.h.bf16 %v3817_v47 }
 0x373   : > { %v1843_v18 = vsel %vm1459_vm2, %v1842_v61, %v3818_v2  ;;  %v1719_v42 = vsel %vm1459_vm2, %v1718_v51, %v3819_v22 }
 0x374   : > { %v3827_v16 = vpop.permute.xlu0 %3826  ;;  %v1844_v62 = vsel %vm1461_vm3, %v1843_v18, %v3823_v54  ;;  %v3837_v48 = vpop.permute.xlu2 %3836  ;;  %v1720_v19 = vsel %vm1461_vm3, %v1719_v42, %v3824_v58 }
 0x375   : > { %v3828_v12 = vunpack.i.l.bf16 %v3827_v16  ;;  %v3829_v29 = vunpack.i.h.bf16 %v3827_v16  ;;  %v3838_v28 = vunpack.i.l.bf16 %v3837_v48  ;;  %v3839_v37 = vunpack.i.h.bf16 %v3837_v48 }
 0x377   : > { %v1845_v52 = vsel %vm1463_vm1, %v1844_v62, %v3828_v12  ;;  %v1721_v57 = vsel %vm1463_vm1, %v1720_v19, %v3829_v29 }
 0x378   : > { %v3832_v36 = vpop.permute.xlu1 %3831 }
 0x379   : > { %v3833_v27 = vunpack.i.l.bf16 %v3832_v36  ;;  %v3834_v1 = vunpack.i.h.bf16 %v3832_v36 }
 0x37b   : > { %v1846_v26 = vsel %vm1465_vm4, %v1845_v52, %v3833_v27 }
 0x37c   : > { %v1847_v15 = vsel %vm1467_vm5, %v1846_v26, %v3838_v28 }
 0x38c   : > { %v1522_v34 = vpop.permute.xlu0 %1521 }
 0x38d   : > { %v1525_v23 = vsel %vm1524_vm7, %v5239_v13, %v1522_v34 }
 0x3bf   : > { %v3842_v8 = vpop.permute.xlu0 %3841 }
 0x3c0   : > { %v3843_v63 = vunpack.i.l.bf16 %v3842_v8  ;;  %v3844_v59 = vunpack.i.h.bf16 %v3842_v8 }
 0x3c2   : > { %v1649_v20 = vsel %vm1524_vm7, %v5311_v53, %v3843_v63  ;;  %v1897_v17 = vsel %vm1524_vm7, %v1847_v15, %v3844_v59  ;;  %v1722_v53 = vsel %vm1465_vm4, %v1721_v57, %v3834_v1 }
 0x3c3   : > { %v1899_v56 = vrot.slane %v1649_v20, 4  ;;  %v1902_v31 = vrot.slane %v1897_v17, 4  ;;  %v1723_v30 = vsel %vm1467_vm5, %v1722_v53, %v3839_v37 }
 0x3c5   : > { %v1905_v55 = vsel %vm1904_vm8, %v1525_v23, %v1899_v56 }
 0x3c9   : > { %v1771_v32 = vpop.permute.xlu1 %1770 }
 0x3ca   : > { %v1773_v25 = vsel %vm1524_vm7, %v1723_v30, %v1771_v32 }
 0x3cb   : > { %v1906_v13 = vsel %vm1904_vm8, %v1773_v25, %v1902_v31 }
 0x3cc   : > { %v1907_v35 = vpack.c.bf16 %v1906_v13, %v1905_v55 }
 0x3ce   : > { %3091 = vmatmul.msk.bf16.vlgmr.msra.gmra.mxu0 %vm1963_vm9, %v1907_v35 }
 0x44b   : > { %v1980_v60 = vpop.f32.mrf.mxu0 }
 0x44c   : > { %v1989_v39 = vmul.f32 %v3845_v21, %v1980_v60 }
 0x44e   : > { %v1995_v7 = vadd.f32 %v3846_v11, %v1989_v39 }
 0x450   : > { %v1997_v40 = vmax.f32 %v1995_v7, 0.0 }
 0x452   : > { %3092 = vst.msk [vmem:[%s2890_s18 + $0x69] sm:$0xf] %vm2000_vm10, %v1997_v40 }
 0x453   : > { %3093 = vst.msk [vmem:[%s2890_s18 + $0x6d] sm:$0xf0] %vm2003_vm11, %v1997_v40  ;;  %v1982_v43 = vpop.f32.mrf.mxu0 }
 0x454   : > { %v1990_v4 = vmul.f32 %v3845_v21, %v1982_v43 }
 0x456   : > { %v1996_v45 = vadd.f32 %v3846_v11, %v1990_v4 }
 0x458   : > { %v1998_v16 = vmax.f32 %v1996_v45, 0.0 }
 0x45a   : > { %3094 = vst.msk [vmem:[%s2890_s18 + $0x79] sm:$0xf] %vm2000_vm10, %v1998_v16 }
 0x45b   : > { %3095 = vst.msk [vmem:[%s2890_s18 + $0x7d] sm:$0xf0] %vm2003_vm11, %v1998_v16 }
 0x45c PF: > { %s5921_s19 = smul.u32 48, %s4122_s30  ;;  %s4174_s21 = smov 24   ;;  %vm2098_vm12 = vcmask 64512   ;;  %vm2100_vm13 = vcmask 130048   ;;  %vm2102_vm14 = vcmask 195584   ;;  %vm2104_vm15 = vcmask 261120  }
 0x45d   : > { %s4175_s23 = smov 40   ;;  %s4176_s22 = smov 8   ;;  %vm2106_vm0 = vcmask 326656   ;;  %vm2108_vm2 = vcmask 392192   ;;  %vm2110_vm3 = vcmask 457728   ;;  %vm2112_vm1 = vcmask 523264  }
 0x45e   : > { %s5388_s20 = scalar_lea.vmem [#allocation3], %s5921_s19  ;;  %s4177_s24 = smov 32   ;;  %vm2114_vm4 = vcmask 588800   ;;  %vm2116_vm5 = vcmask 654336   ;;  %vm2118_vm6 = vcmask 719872   ;;  %vm2120_vm7 = vcmask 785408  }
 0x45f   : > { %s4178_s25 = smov 48   ;;  %s4179_s27 = smov 16   ;;  %vm2122_vm8 = vcmask 850944   ;;  %vm2124_vm9 = vcmask 916480   ;;  %vm5924_vm10 = vcmask 982016   ;;  %vm2552_vm11 = vcmask 1043456  }
 0x460   : > { %s4180_s28 = smov 64   ;;  %s4181_s29 = smov 72  }
 0x461   : > { %s4182_s10 = smov 56   ;;  %s5923_s16 = smov 88  }
 0x462   : > { %v5391_v49 = vld [vmem:[%s5388_s20 + $0x8] sm:$0x3f]  ;;  %v3101_v6 = vld [vmem:[%s5388_s20 + $0x60] sm:$0x3f]  ;;  %v5420_v2 = vld [vmem:[%s5388_s20 + $0x10] sm:$0x3f] }
 0x463   : > { %v5395_v9 = vld [vmem:[%s5388_s20 + $0x68] sm:$0x3f]  ;;  %v3857_v33 = vpack.i.bf16 %v3101_v6, %v5391_v49  ;;  %v2054_v44 = vrot.slane %v5391_v49, 2  ;;  %v5401_v46 = vld [vmem:[%s5388_s20] sm:$0x3f]  ;;  %v2050_v0 = vrot.slane %v5391_v49, 1 }
 0x464   : > { %v2145_v5 = vrot.slane %v5395_v9, 7  ;;  %v5404_v38 = vld [vmem:[%s5388_s20 + $0x40] sm:$0x3f]  ;;  %v2038_v47 = vrot.slane %v5401_v46, 1  ;;  %v2140_v14 = vrot.slane %v3101_v6, 1  ;;  %v2042_v3 = vrot.slane %v5401_v46, 2 }
 0x465   : > { %v5408_v41 = vrot.slane %v5404_v38, 1  ;;  %3858 = vrot.lane.b32.xlu1 %v3857_v33, %s4174_s21  ;;  %v2133_v34 = vrot.slane %v3101_v6, 7  ;;  %v5426_v24 = vld [vmem:[%s5388_s20 + $0x70] sm:$0x3f]  ;;  %v3872_v54 = vpack.i.bf16 %v5395_v9, %v5420_v2  ;;  %v5432_v18 = vrot.slane %v5420_v2, 2  ;;  %s5922_s17 = smov 96  }
 0x466   : > { %v3867_v10 = vpack.i.bf16 %v2145_v5, %v2054_v44  ;;  %v3862_v61 = vpack.i.bf16 %v2140_v14, %v2050_v0  ;;  %v5435_v51 = vrot.slane %v5426_v24, 7  ;;  %v3098_v12 = vld [vmem:[%s5388_s20 + $0x30] sm:$0x3f]  ;;  %v5441_v36 = vrot.slane %v5420_v2, 1  ;;  %v5447_v42 = vld [vmem:[%s5388_s20 + $0x38] sm:$0x3f] }
 0x467   : > { %v3847_v50 = vpack.i.bf16 %v5408_v41, %v2038_v47  ;;  %v3852_v22 = vpack.i.bf16 %v2133_v34, %v2042_v3  ;;  %v2152_v58 = vrot.slane %v5395_v9, 1  ;;  %v3887_v27 = vpack.i.bf16 %v5426_v24, %v3098_v12  ;;  %s4185_s18 = smov 80   ;;  %v5468_v26 = vld [vmem:[%s5388_s20 + $0x48] sm:$0x3f]  ;;  %v5474_v23 = vld [vmem:[%s5388_s20 + $0x18] sm:$0x3f] }
 0x468   : > { %3868 = vrot.lane.b32.xlu2 %v3867_v10, %s4175_s23  ;;  %v3882_v62 = vpack.i.bf16 %v5435_v51, %v5432_v18  ;;  %v2078_v8 = vrot.slane %v3098_v12, 2  ;;  %v2090_v29 = vrot.slane %v5447_v42, 2  ;;  %v2074_v52 = vrot.slane %v3098_v12, 1  ;;  %s4186_s19 = smov 112   ;;  %v5486_v15 = vld [vmem:[%s5388_s20 + $0x20] sm:$0x3f] }
 0x469   : > { %3848 = vrot.lane.b32.xlu0 %v3847_v50, %s4176_s22  ;;  %v3877_v48 = vpack.i.bf16 %v2152_v58, %v5441_v36  ;;  %v5458_v63 = vrot.slane %v5426_v24, 1  ;;  %v3902_v28 = vpack.i.bf16 %v5404_v38, %v5447_v42  ;;  %v2232_v1 = vrot.slane %v5404_v38, 2  ;;  %v3110_v25 = vld [vmem:[%s5388_s20 + $0x28] sm:$0x3f]  ;;  %v5516_v4 = vld [vmem:[%s5388_s20 + $0x50] sm:$0x3f] }
 0x46a   : > { %v3897_v19 = vpack.i.bf16 %v2090_v29, %v2078_v8  ;;  %v2086_v59 = vrot.slane %v5447_v42, 1  ;;  %v3917_v57 = vpack.i.bf16 %v5468_v26, %v5404_v38  ;;  %v2213_v37 = vrot.slane %v5474_v23, 2  ;;  %v5519_v45 = vld [vmem:[%s5388_s20 + $0x58] sm:$0x3f] }
 0x46b   : > { %v3892_v20 = vpack.i.bf16 %v5458_v63, %v2074_v52  ;;  %v3912_v56 = vpack.i.bf16 %v2232_v1, %v2090_v29  ;;  %v2209_v17 = vrot.slane %v5474_v23, 1  ;;  %v3932_v31 = vpack.i.bf16 %v5486_v15, %v5420_v2 }
 0x46c   : > { %v3907_v55 = vpack.i.bf16 %v5408_v41, %v2086_v59  ;;  %v3927_v53 = vpack.i.bf16 %v2213_v37, %v2054_v44  ;;  %v2333_v32 = vrot.slane %v5486_v15, 2  ;;  %v2329_v13 = vrot.slane %v5486_v15, 1  ;;  %v3106_v44 = vld [vmem:[%s5388_s20 + $0x78] sm:$0x3f] }
 0x46d   : > { %3863 = vrot.lane.b32.xlu1 %v3862_v61, %s4177_s24  ;;  %v3922_v30 = vpack.i.bf16 %v2209_v17, %v2050_v0  ;;  %v3947_v21 = vpack.i.bf16 %v3110_v25, %v5474_v23  ;;  %v5506_v60 = vrot.slane %v5468_v26, 1  ;;  %v2450_v39 = vrot.slane %v3110_v25, 1 }
 0x46e   : > { %v3942_v35 = vpack.i.bf16 %v2333_v32, %v5432_v18  ;;  %v3937_v11 = vpack.i.bf16 %v2329_v13, %v5441_v36  ;;  %v3962_v40 = vpack.i.bf16 %v2145_v5, %v5432_v18  ;;  %v2375_v16 = vrot.slane %v5516_v4, 1  ;;  %v3109_v18 = vld [vmem:[%s5388_s20 + $0x80] sm:$0x3f] }
 0x46f   : > { %v3957_v7 = vpack.i.bf16 %v5506_v60, %v5441_v36  ;;  %v3952_v43 = vpack.i.bf16 %v2450_v39, %v2209_v17  ;;  %v2496_v6 = vrot.slane %v5519_v45, 1  ;;  %v3972_v33 = vpack.i.bf16 %v2152_v58, %v2209_v17 }
 0x470   : > { %3873 = vrot.lane.b32.xlu2 %v3872_v54, %s4178_s25  ;;  %v3967_v47 = vpack.i.bf16 %v5395_v9, %v5474_v23  ;;  %v2278_v10 = vrot.slane %v3106_v44, 7  ;;  %v2454_v0 = vrot.slane %v3110_v25, 2  ;;  %v3982_v3 = vpack.i.bf16 %v5435_v51, %v2213_v37 }
 0x471   : > { %3853 = vrot.lane.b32.xlu0 %v3852_v22, %s4179_s27  ;;  %v3977_v5 = vpack.i.bf16 %v2496_v6, %v2375_v16  ;;  %v4002_v9 = vpack.i.bf16 %v3106_v44, %v5426_v24  ;;  %v4007_v34 = vpack.i.bf16 %v5468_v26, %v5447_v42  ;;  %v3997_v61 = vpack.i.bf16 %v5426_v24, %v5486_v15 }
 0x472   : > { %v3987_v14 = vpack.i.bf16 %v2278_v10, %v5435_v51  ;;  %v3992_v50 = vpack.i.bf16 %v2454_v0, %v2213_v37  ;;  %v2285_v54 = vrot.slane %v3106_v44, 1  ;;  %v4022_v51 = vpack.i.bf16 %v5506_v60, %v2086_v59 }
 0x473   : > { %v4012_v12 = vpack.i.bf16 %v5458_v63, %v2329_v13  ;;  %v2398_v36 = vrot.slane %v3109_v18, 7  ;;  %v2352_v42 = vrot.slane %v5468_v26, 2  ;;  %v4042_v52 = vpack.i.bf16 %v3109_v18, %v3106_v44 }
 0x474   : > { %v4017_v22 = vpack.i.bf16 %v2285_v54, %v5458_v63  ;;  %v4052_v29 = vpack.i.bf16 %v2285_v54, %v5408_v41  ;;  %v3112_v63 = vld [vmem:[%s5388_s20 + $0x88] sm:$0x3f]  ;;  %v4062_v59 = vpack.i.bf16 %v5468_v26, %v5516_v4 }
 0x475   : > { %3883 = vrot.lane.b32.xlu1 %v3882_v62, %s4180_s28  ;;  %v4032_v58 = vpack.i.bf16 %v2398_v36, %v2278_v10  ;;  %v4037_v62 = vpack.i.bf16 %v3106_v44, %v5404_v38  ;;  %v4047_v8 = vpack.i.bf16 %v2232_v1, %v2352_v42  ;;  %v2473_v1 = vrot.slane %v5516_v4, 2 }
 0x476   : > { %v4077_v37 = vpack.i.bf16 %v3112_v63, %v3109_v18 }
 0x477   : > { %v4082_v17 = vpack.i.bf16 %v2352_v42, %v2473_v1 }
 0x478   : > { %3888 = vrot.lane.b32.xlu2 %v3887_v27, %s4181_s29  ;;  %v4027_v27 = vpack.i.bf16 %v2278_v10, %v2333_v32 }
 0x479   : > { %3878 = vrot.lane.b32.xlu0 %v3877_v48, %s4182_s10 }
 0x47d   : > { %3898 = vrot.lane.b32.xlu1 %v3897_v19, %s5923_s16  ;;  %s4188_s16 = smov 104   ;;  %v2519_v19 = vrot.slane %v3112_v63, 7 }
 0x480   : > { %3903 = vrot.lane.b32.xlu2 %v3902_v28, %s5922_s17  ;;  %s4187_s17 = smov 120   ;;  %v2405_v28 = vrot.slane %v3109_v18, 1 }
 0x481   : > { %3893 = vrot.lane.b32.xlu0 %v3892_v20, %s4185_s18 }
 0x485   : > { %3913 = vrot.lane.b32.xlu1 %v3912_v56, %s4186_s19  ;;  %v4067_v56 = vpack.i.bf16 %v2519_v19, %v2398_v36 }
 0x488   : > { %3918 = vrot.lane.b32.xlu2 %v3917_v57, %s4187_s17  ;;  %v4057_v57 = vpack.i.bf16 %v2405_v28, %v2285_v54 }
 0x489   : > { %3908 = vrot.lane.b32.xlu0 %v3907_v55, %s4188_s16 }
 0x48d   : > { %3928 = vrot.lane.b32.xlu1 %v3927_v53, %s4179_s27  ;;  %v4072_v53 = vpack.i.bf16 %v5506_v60, %v2375_v16 }
 0x490   : > { %3933 = vrot.lane.b32.xlu2 %v3932_v31, %s4174_s21  ;;  %v2526_v31 = vrot.slane %v3112_v63, 1 }
 0x491   : > { %3923 = vrot.lane.b32.xlu0 %v3922_v30, %s4176_s22 }
 0x492   : > { %v4087_v60 = vpack.i.bf16 %v2526_v31, %v2405_v28 }
 0x495   : > { %3943 = vrot.lane.b32.xlu1 %v3942_v35, %s4175_s23 }
 0x498   : > { %3948 = vrot.lane.b32.xlu2 %v3947_v21, %s4178_s25  ;;  %v4092_v21 = vpack.i.bf16 %v5516_v4, %v5519_v45 }
 0x499   : > { %3938 = vrot.lane.b32.xlu0 %v3937_v11, %s4177_s24 }
 0x49d   : > { %3958 = vrot.lane.b32.xlu1 %v3957_v7, %s4176_s22 }
 0x4a0   : > { %3963 = vrot.lane.b32.xlu2 %v3962_v40, %s4179_s27 }
 0x4a1   : > { %3953 = vrot.lane.b32.xlu0 %v3952_v43, %s4182_s10 }
 0x4a5   : > { %3973 = vrot.lane.b32.xlu1 %v3972_v33, %s4177_s24 }
 0x4a8   : > { %3978 = vrot.lane.b32.xlu2 %v3977_v5, %s4176_s22  ;;  %s5931_s22 = smul.u32 48, %s4122_s30 }
 0x4a9   : > { %3968 = vrot.lane.b32.xlu0 %v3967_v47, %s4174_s21 }
 0x4ad   : > { %3988 = vrot.lane.b32.xlu1 %v3987_v14, %s4179_s27 }
 0x4b0   : > { %3993 = vrot.lane.b32.xlu2 %v3992_v50, %s4180_s28 }
 0x4b1   : > { %3983 = vrot.lane.b32.xlu0 %v3982_v3, %s4175_s23 }
 0x4b5   : > { %4003 = vrot.lane.b32.xlu1 %v4002_v9, %s4174_s21  ;;  %s5929_s21 = smov 88  }
 0x4b8   : > { %4008 = vrot.lane.b32.xlu2 %v4007_v34, %s4181_s29 }
 0x4b9   : > { %3998 = vrot.lane.b32.xlu0 %v3997_v61, %s4178_s25 }
 0x4bd   : > { %4018 = vrot.lane.b32.xlu1 %v4017_v22, %s4177_s24  ;;  %s2955_s24 = scalar_lea.vmem [#allocation2], %s5931_s22 }
 0x4c0   : > { %4023 = vrot.lane.b32.xlu2 %v4022_v51, %s4185_s18 }
 0x4c1   : > { %4013 = vrot.lane.b32.xlu0 %v4012_v12, %s4182_s10 }
 0x4c2   : > { %v5558_v24 = vpop.permute.xlu2 %3868 }
 0x4c3   : > { %v3871_v13 = vunpack.i.h.bf16 %v5558_v24  ;;  %v3870_v14 = vunpack.i.l.bf16 %v5558_v24 }
 0x4c5   : > { %4033 = vrot.lane.b32.xlu1 %v4032_v58, %s4175_s23  ;;  %s5930_s23 = smov 96  }
 0x4c8   : > { %4038 = vrot.lane.b32.xlu2 %v4037_v62, %s4181_s29 }
 0x4c9   : > { %4028 = vrot.lane.b32.xlu0 %v4027_v27, %s4180_s28 }
 0x4ca   : > { %v5565_v48 = vpop.permute.xlu2 %3873 }
 0x4cb   : > { %v3876_v39 = vunpack.i.h.bf16 %v5565_v48  ;;  %v3875_v7 = vunpack.i.l.bf16 %v5565_v48 }
 0x4cd   : > { %4048 = vrot.lane.b32.xlu1 %v4047_v8, %s5929_s21 }
 0x4d0   : > { %4053 = vrot.lane.b32.xlu2 %v4052_v29, %s4185_s18 }
 0x4d1   : > { %4043 = vrot.lane.b32.xlu0 %v4042_v52, %s4178_s25 }
 0x4d2   : > { %v5574_v20 = vpop.permute.xlu2 %3888 }
 0x4d3   : > { %v3891_v24 = vunpack.i.h.bf16 %v5574_v20  ;;  %v3890_v58 = vunpack.i.l.bf16 %v5574_v20 }
 0x4d5   : > { %4063 = vrot.lane.b32.xlu1 %v4062_v59, %s5930_s23 }
 0x4d7   : > { %v3859_v41 = vpop.permute.xlu1 %3858 }
 0x4d8   : > { %4068 = vrot.lane.b32.xlu2 %v4067_v56, %s4180_s28  ;;  %v3861_v16 = vunpack.i.h.bf16 %v3859_v41  ;;  %v3860_v6 = vunpack.i.l.bf16 %v3859_v41 }
 0x4d9   : > { %4058 = vrot.lane.b32.xlu0 %v4057_v57, %s4182_s10 }
 0x4da   : > { %v5582_v55 = vpop.permute.xlu2 %3903 }
 0x4db   : > { %v3849_v15 = vpop.permute.xlu0 %3848  ;;  %v3905_v56 = vunpack.i.l.bf16 %v5582_v55 }
 0x4dc   : > { %v3851_v32 = vunpack.i.h.bf16 %v3849_v15  ;;  %v3850_v25 = vunpack.i.l.bf16 %v3849_v15 }
 0x4dd   : > { %4078 = vrot.lane.b32.xlu1 %v4077_v37, %s4181_s29 }
 0x4de   : > { %v2168_v33 = vsel %vm2098_vm12, %v5404_v38, %v3851_v32  ;;  %v2099_v44 = vsel %vm2098_vm12, %v5401_v46, %v3850_v25 }
 0x4df   : > { %v3864_v30 = vpop.permute.xlu1 %3863 }
 0x4e0   : > { %4083 = vrot.lane.b32.xlu2 %v4082_v17, %s4186_s19  ;;  %v3866_v5 = vunpack.i.h.bf16 %v3864_v30  ;;  %v3865_v47 = vunpack.i.l.bf16 %v3864_v30 }
 0x4e1   : > { %4073 = vrot.lane.b32.xlu0 %v4072_v53, %s4188_s16 }
 0x4e2   : > { %v5591_v35 = vpop.permute.xlu2 %3918 }
 0x4e3   : > { %v3854_v11 = vpop.permute.xlu0 %3853  ;;  %v3920_v25 = vunpack.i.l.bf16 %v5591_v35 }
 0x4e4   : > { %v3856_v40 = vunpack.i.h.bf16 %v3854_v11  ;;  %v3855_v43 = vunpack.i.l.bf16 %v3854_v11 }
 0x4e5   : > { %4093 = vrot.lane.b32.xlu1 %v4092_v21, %s4187_s17 }
 0x4e6   : > { %v2101_v10 = vsel %vm2100_vm13, %v2099_v44, %v3855_v43  ;;  %v2169_v0 = vsel %vm2100_vm13, %v2168_v33, %v3856_v40 }
 0x4e7   : > { %v2103_v50 = vsel %vm2102_vm14, %v2101_v10, %v3860_v6  ;;  %v2170_v3 = vsel %vm2102_vm14, %v2169_v0, %v3861_v16  ;;  %v3884_v46 = vpop.permute.xlu1 %3883 }
 0x4e8   : > { %v2105_v38 = vsel %vm2104_vm15, %v2103_v50, %v3865_v47  ;;  %v2171_v9 = vsel %vm2104_vm15, %v2170_v3, %v3866_v5  ;;  %v3886_v51 = vunpack.i.h.bf16 %v3884_v46  ;;  %v3885_v12 = vunpack.i.l.bf16 %v3884_v46 }
 0x4e9   : > { %4088 = vrot.lane.b32.xlu0 %v4087_v60, %s4185_s18  ;;  %v2107_v34 = vsel %vm2106_vm0, %v2105_v38, %v3870_v14  ;;  %v2172_v61 = vsel %vm2106_vm0, %v2171_v9, %v3871_v13 }
 0x4ea   : > { %v3934_v54 = vpop.permute.xlu2 %3933  ;;  %v2109_v22 = vsel %vm2108_vm2, %v2107_v34, %v3875_v7  ;;  %v2173_v18 = vsel %vm2108_vm2, %v2172_v61, %v3876_v39 }
 0x4eb   : > { %v3879_v36 = vpop.permute.xlu0 %3878  ;;  %v3936_v6 = vunpack.i.h.bf16 %v3934_v54  ;;  %v3935_v33 = vunpack.i.l.bf16 %v3934_v54 }
 0x4ec   : > { %v3881_v62 = vunpack.i.h.bf16 %v3879_v36  ;;  %v3880_v27 = vunpack.i.l.bf16 %v3879_v36 }
 0x4ee   : > { %v2111_v42 = vsel %vm2110_vm3, %v2109_v22, %v3880_v27  ;;  %v2174_v48 = vsel %vm2110_vm3, %v2173_v18, %v3881_v62 }
 0x4ef   : > { %v2113_v8 = vsel %vm2112_vm1, %v2111_v42, %v3885_v12  ;;  %v2175_v29 = vsel %vm2112_vm1, %v2174_v48, %v3886_v51  ;;  %v5620_v52 = vpop.permute.xlu1 %3898 }
 0x4f0   : > { %v2115_v63 = vsel %vm2114_vm4, %v2113_v8, %v3890_v58  ;;  %v2176_v19 = vsel %vm2114_vm4, %v2175_v29, %v3891_v24  ;;  %v3900_v20 = vunpack.i.l.bf16 %v5620_v52 }
 0x4f2   : > { %v3949_v28 = vpop.permute.xlu2 %3948 }
 0x4f3   : > { %v3894_v59 = vpop.permute.xlu0 %3893  ;;  %v3951_v54 = vunpack.i.h.bf16 %v3949_v28  ;;  %v3950_v22 = vunpack.i.l.bf16 %v3949_v28 }
 0x4f4   : > { %v3896_v57 = vunpack.i.h.bf16 %v3894_v59  ;;  %v3895_v41 = vunpack.i.l.bf16 %v3894_v59 }
 0x4f6   : > { %v2117_v1 = vsel %vm2116_vm5, %v2115_v63, %v3895_v41  ;;  %v5628_v37 = vsel %vm2116_vm5, %v2176_v19, %v3896_v57  ;;  %v3901_v57 = vunpack.i.h.bf16 %v5620_v52  ;;  %v3197_v52 = vld [vmem:[%s5911_s4 + $0x38] sm:$0xff] }
 0x4f7   : > { %v2119_v15 = vsel %vm2118_vm6, %v2117_v1, %v3900_v20  ;;  %v5631_v17 = vpop.permute.xlu1 %3913  ;;  %v3906_v1 = vunpack.i.h.bf16 %v5582_v55  ;;  %2673 = vmatpush.bf16.msra.mxu0 %v3197_v52 }
 0x4f8   : > { %v2121_v53 = vsel %vm2120_vm7, %v2119_v15, %v3905_v56  ;;  %v3915_v30 = vunpack.i.l.bf16 %v5631_v17 }
 0x4fa   : > { %v5634_v31 = vpop.permute.xlu2 %3963 }
 0x4fb   : > { %v3909_v32 = vpop.permute.xlu0 %3908 }
 0x4fc   : > { %v3910_v13 = vunpack.i.l.bf16 %v3909_v32 }
 0x4fe   : > { %v2123_v21 = vsel %vm2122_vm8, %v2121_v53, %v3910_v13  ;;  %v3911_v53 = vunpack.i.h.bf16 %v3909_v32 }
 0x4ff   : > { %v2125_v11 = vsel %vm2124_vm9, %v2123_v21, %v3915_v30  ;;  %v3929_v60 = vpop.permute.xlu1 %3928  ;;  %v3921_v21 = vunpack.i.h.bf16 %v5591_v35  ;;  %v3196_v35 = vld [vmem:[%s5911_s4 + $0x30] sm:$0xff] }
 0x500   : > { %v2127_v39 = vsel %vm5924_vm10, %v2125_v11, %v3920_v25  ;;  %v3931_v40 = vunpack.i.h.bf16 %v3929_v60  ;;  %v3930_v43 = vunpack.i.l.bf16 %v3929_v60  ;;  %v3916_v25 = vunpack.i.h.bf16 %v5631_v17  ;;  %2674 = vmatpush.bf16.msra.mxu0 %v3196_v35 }
 0x502   : > { %v5641_v7 = vpop.permute.xlu2 %3978 }
 0x503   : > { %v3924_v16 = vpop.permute.xlu0 %3923 }
 0x504   : > { %v3926_v44 = vunpack.i.h.bf16 %v3924_v16  ;;  %v3925_v5 = vunpack.i.l.bf16 %v3924_v16  ;;  %v2585_v16 = vld [vmem:[%s5911_s4 + $0x68] sm:$0xf] }
 0x506   : > { %v2481_v47 = vsel %vm2098_vm12, %v5474_v23, %v3926_v44  ;;  %v2240_v10 = vsel %vm2098_vm12, %v5391_v49, %v3925_v5  ;;  %v3195_v44 = vld [vmem:[%s5911_s4 + $0x28] sm:$0xff] }
 0x507   : > { %v2482_v0 = vsel %vm2100_vm13, %v2481_v47, %v3931_v40  ;;  %v2241_v14 = vsel %vm2100_vm13, %v2240_v10, %v3930_v43  ;;  %v3944_v50 = vpop.permute.xlu1 %3943  ;;  %2675 = vmatpush.bf16.msra.mxu0 %v3195_v44  ;;  %v3190_v44 = vld [vmem:[%s5911_s4] sm:$0xff] }
 0x508   : > { %v2242_v3 = vsel %vm2102_vm14, %v2241_v14, %v3935_v33  ;;  %v2483_v38 = vsel %vm2102_vm14, %v2482_v0, %v3936_v6  ;;  %v3946_v46 = vunpack.i.h.bf16 %v3944_v50  ;;  %v3945_v34 = vunpack.i.l.bf16 %v3944_v50  ;;  %v3202_v50 = vld [vmem:[%s5911_s4 + $0x60] sm:$0xff] }
 0x509   : > { %v2639_v33 = vunpack.c.l.b16 %v2585_v16 }
 0x50a   : > { %v5651_v9 = vpop.permute.xlu2 %3993 }
 0x50b   : > { %v3939_v61 = vpop.permute.xlu0 %3938  ;;  %v3995_v8 = vunpack.i.l.bf16 %v5651_v9  ;;  %v2653_v5 = vpack.c.b16 %v2639_v33, %v2639_v33 }
 0x50c   : > { %v3941_v23 = vunpack.i.h.bf16 %v3939_v61  ;;  %v3940_v18 = vunpack.i.l.bf16 %v3939_v61 }
 0x50d   : > { %v2671_v10 = vsel %vm2552_vm11, %v2653_v5, 0 }
 0x50e   : > { %v2243_v49 = vsel %vm2104_vm15, %v2242_v3, %v3940_v18  ;;  %v2484_v51 = vsel %vm2104_vm15, %v2483_v38, %v3941_v23  ;;  %2689 = vmatpush.bf16.msra.mxu1 %v2671_v10  ;;  %v3193_v38 = vld [vmem:[%s5911_s4 + $0x18] sm:$0xff]  ;;  %v3169_v23 = vld [vmem:[%s2955_s24 + $0x41] sm:$0xf]  ;;  %v3171_v18 = vld [vmem:[%s2955_s24 + $0x51] sm:$0xf] }
 0x50f   : > { %v2244_v12 = vsel %vm2106_vm0, %v2243_v49, %v3945_v34  ;;  %v2485_v36 = vsel %vm2106_vm0, %v2484_v51, %v3946_v46  ;;  %v5657_v24 = vpop.permute.xlu1 %3958  ;;  %v3966_v46 = vunpack.i.h.bf16 %v5634_v31  ;;  %v3192_v49 = vld [vmem:[%s5911_s4 + $0x10] sm:$0xff]  ;;  %v2722_v51 = vrot.slane %v3169_v23, 4 }
 0x510   : > { %v2245_v58 = vsel %vm2108_vm2, %v2244_v12, %v3950_v22  ;;  %v5661_v62 = vsel %vm2108_vm2, %v2485_v36, %v3951_v54  ;;  %v3961_v0 = vunpack.i.h.bf16 %v5657_v24  ;;  %v3201_v22 = vld [vmem:[%s5911_s4 + $0x58] sm:$0xff]  ;;  %v2725_v12 = vrot.slane %v3171_v18, 4 }
 0x511   : > { %v3965_v18 = vunpack.i.l.bf16 %v5634_v31 }
 0x512   : > { %v5663_v27 = vpop.permute.xlu2 %4008  ;;  %2690 = vmatpush.bf16.msra.mxu1 %v3202_v50  ;;  %v2289_v34 = vsel %vm2098_vm12, %v5468_v26, %v3961_v0  ;;  %v2730_v26 = vld [vmem:[%s5914_s7] sm:$0x3] }
 0x513   : > { %v5665_v42 = vpop.permute.xlu0 %3953  ;;  %v4010_v63 = vunpack.i.l.bf16 %v5663_v27  ;;  %v4011_v31 = vunpack.i.h.bf16 %v5663_v27 }
 0x514   : > { %v3955_v48 = vunpack.i.l.bf16 %v5665_v42 }
 0x516   : > { %v2246_v29 = vsel %vm2110_vm3, %v2245_v58, %v3955_v48  ;;  %2691 = vmatpush.bf16.msra.mxu1 %v3201_v22  ;;  %v2290_v58 = vsel %vm2100_vm13, %v2289_v34, %v3966_v46  ;;  %v3960_v46 = vunpack.i.l.bf16 %v5657_v24  ;;  %v3996_v24 = vunpack.i.h.bf16 %v5651_v9 }
 0x517   : > { %v5671_v19 = vpop.permute.xlu1 %3973  ;;  %v2247_v28 = vsel %vm2112_vm1, %v2246_v29, %v3995_v8  ;;  %v3168_v8 = vld [vmem:[%s2955_s24 + $0x39] sm:$0xf]  ;;  %v3170_v29 = vld [vmem:[%s2955_s24 + $0x49] sm:$0xf] }
 0x518   : > { %v2248_v41 = vsel %vm2114_vm4, %v2247_v28, %v4010_v63  ;;  %v3976_v36 = vunpack.i.h.bf16 %v5671_v19 }
 0x51a   : > { %v5674_v20 = vpop.permute.xlu2 %4023 }
 0x51b   : > { %v4025_v59 = vunpack.i.l.bf16 %v5674_v20  ;;  %v5677_v56 = vpop.permute.xlu0 %3968 }
 0x51c   : > { %v3971_v61 = vunpack.i.h.bf16 %v5677_v56 }
 0x51d   : > { %v2249_v15 = vsel %vm2116_vm5, %v2248_v41, %v4025_v59  ;;  %v3200_v59 = vld [vmem:[%s5911_s4 + $0x50] sm:$0xff]  ;;  %v2728_v41 = vsel %vm2552_vm11, %v3170_v29, %v2725_v12  ;;  %v3975_v12 = vunpack.i.l.bf16 %v5671_v19 }
 0x51e   : > { %v2250_v30 = vsel %vm2118_vm6, %v2249_v15, %v3901_v57  ;;  %v2291_v63 = vsel %vm2102_vm14, %v2290_v58, %v3971_v61  ;;  %v2727_v57 = vsel %vm2552_vm11, %v3168_v8, %v2722_v51  ;;  %2692 = vmatpush.bf16.msra.mxu1 %v3200_v59  ;;  %v3956_v61 = vunpack.i.h.bf16 %v5665_v42 }
 0x51f   : > { %v2251_v13 = vsel %vm2120_vm7, %v2250_v30, %v3906_v1  ;;  %v5687_v11 = vpop.permute.xlu1 %3988  ;;  %v3980_v51 = vunpack.i.l.bf16 %v5641_v7 }
 0x520   : > { %v2252_v60 = vsel %vm2122_vm8, %v2251_v13, %v3911_v53  ;;  %v2729_v53 = vpack.c.bf16 %v2728_v41, %v2727_v57  ;;  %v3191_v13 = vld [vmem:[%s5911_s4 + $0x8] sm:$0xff]  ;;  %v2487_v42 = vsel %vm2110_vm3, %v5661_v62, %v3956_v61  ;;  %v4026_v62 = vunpack.i.h.bf16 %v5674_v20 }
 0x521   : > { %v2253_v55 = vsel %vm2124_vm9, %v2252_v60, %v3916_v25  ;;  %v2488_v9 = vsel %vm2112_vm1, %v2487_v42, %v3996_v24  ;;  %v2409_v8 = vsel %vm2098_vm12, %v5516_v4, %v3980_v51  ;;  %v3991_v27 = vunpack.i.h.bf16 %v5687_v11 }
 0x522   : > { %v2254_v32 = vsel %vm5924_vm10, %v2253_v55, %v3921_v21  ;;  %v5718_v14 = vpop.permute.xlu2 %4038  ;;  %vm2739_vm10 = vcmask 1041408   ;;  %v2292_v21 = vsel %vm2104_vm15, %v2291_v63, %v3976_v36  ;;  %v3990_v29 = vunpack.i.l.bf16 %v5687_v11 }
 0x523   : > { %v5695_v40 = vpop.permute.xlu0 %3983  ;;  %v2543_v17 = vrot.slane %v2254_v32, 4  ;;  %v2741_v48 = vsel %vm2739_vm10, %v2730_v26, 0  ;;  %vm2735_vm10 = vcmask 31744   ;;  %v4041_v52 = vunpack.i.h.bf16 %v5718_v14  ;;  %v3199_v32 = vld [vmem:[%s5911_s4 + $0x48] sm:$0xff] }
 0x524   : > { %v3986_v28 = vunpack.i.h.bf16 %v5695_v40  ;;  %2750 = vmatpush.bf16.msra.mxu2 %v2741_v48  ;;  %2693 = vmatpush.bf16.msra.mxu1 %v3199_v32  ;;  %v3970_v26 = vunpack.i.l.bf16 %v5677_v56  ;;  %v3985_v56 = vunpack.i.l.bf16 %v5695_v40 }
 0x525   : > { %v5701_v43 = vsel %vm2552_vm11, %v2127_v39, %v2543_v17  ;;  %v3194_v39 = vld [vmem:[%s5911_s4 + $0x20] sm:$0xff] }
 0x526   : > { %2676 = vmatpush.bf16.msra.mxu0 %v3194_v39  ;;  %v2293_v60 = vsel %vm2106_vm0, %v2292_v21, %v3986_v28  ;;  %v3198_v39 = vld [vmem:[%s5911_s4 + $0x40] sm:$0xff] }
 0x527   : > { %v5706_v6 = vpop.permute.xlu1 %4003  ;;  %3172 = vmatmul.msk.bf16.vlgmr.msra.gmra.mxu2 %vm2735_vm10, %v2729_v53  ;;  %v2410_v53 = vsel %vm2100_vm13, %v2409_v8, %v3990_v29 }
 0x528   : > { %2694 = vmatpush.bf16.msra.mxu1 %v3198_v39  ;;  %v4005_v59 = vunpack.i.l.bf16 %v5706_v6 }
 0x52a   : > { %2677 = vmatpush.bf16.msra.mxu0 %v3193_v38  ;;  %v5758_v25 = vpop.permute.xlu2 %4053  ;;  %v2179_v38 = vrot.slane %v5628_v37, 1  ;;  %v3981_v37 = vunpack.i.h.bf16 %v5641_v7 }
 0x52b   : > { %v5711_v47 = vpop.permute.xlu0 %3998  ;;  %v4056_v16 = vunpack.i.h.bf16 %v5758_v25 }
 0x52c   : > { %v4001_v1 = vunpack.i.h.bf16 %v5711_v47  ;;  %v2530_v7 = vsel %vm2098_vm12, %v5519_v45, %v3981_v37  ;;  %v4000_v19 = vunpack.i.l.bf16 %v5711_v47  ;;  %v4006_v45 = vunpack.i.h.bf16 %v5706_v6 }
 0x52d   : > { %v2489_v47 = vsel %vm2114_vm4, %v2488_v9, %v4011_v31 }
 0x52e   : > { %2678 = vmatpush.bf16.msra.mxu0 %v3192_v49  ;;  %v2294_v17 = vsel %vm2108_vm2, %v2293_v60, %v4001_v1  ;;  %v2360_v49 = vsel %vm2098_vm12, %v5420_v2, %v3960_v46  ;;  %v2490_v41 = vsel %vm2116_vm5, %v2489_v47, %v4026_v62  ;;  %v2531_v1 = vsel %vm2100_vm13, %v2530_v7, %v3991_v27 }
 0x52f   : > { %v5723_v3 = vpop.permute.xlu1 %4018  ;;  %v2361_v36 = vsel %vm2100_vm13, %v2360_v49, %v3965_v18  ;;  %v2532_v21 = vsel %vm2102_vm14, %v2531_v1, %v4006_v45  ;;  %vm5932_vm12 = vcmask 982016  }
 0x530   : > { %v2362_v2 = vsel %vm2102_vm14, %v2361_v36, %v3970_v26  ;;  %v4020_v4 = vunpack.i.l.bf16 %v5723_v3 }
 0x531   : > { %v2363_v28 = vsel %vm2104_vm15, %v2362_v2, %v3975_v12 }
 0x532   : > { %2679 = vmatpush.bf16.msra.mxu0 %v3191_v13  ;;  %v5810_v48 = vpop.permute.xlu2 %4068  ;;  %v2364_v57 = vsel %vm2106_vm0, %v2363_v28, %v3985_v56  ;;  %v2411_v13 = vsel %vm2102_vm14, %v2410_v53, %v4005_v59  ;;  %vm5933_vm14 = vmmov %vm5932_vm12 }
 0x533   : > { %v5732_v54 = vpop.permute.xlu0 %4013  ;;  %v2365_v11 = vsel %vm2108_vm2, %v2364_v57, %v4000_v19  ;;  %v2412_v32 = vsel %vm2104_vm15, %v2411_v13, %v4020_v4 }
 0x534   : > { %v4016_v30 = vunpack.i.h.bf16 %v5732_v54  ;;  %v4015_v40 = vunpack.i.l.bf16 %v5732_v54  ;;  %v4021_v54 = vunpack.i.h.bf16 %v5723_v3 }
 0x536   : > { %v2295_v33 = vsel %vm2110_vm3, %v2294_v17, %v4016_v30  ;;  %2680 = vmatpush.bf16.msra.mxu0 %v3190_v44  ;;  %v2366_v6 = vsel %vm2110_vm3, %v2365_v11, %v4015_v40  ;;  %v4040_v30 = vunpack.i.l.bf16 %v5718_v14  ;;  %v4070_v44 = vunpack.i.l.bf16 %v5810_v48 }
 0x537   : > { %v5755_v15 = vpop.permute.xlu1 %4033 }
 0x538   : > { %v4036_v3 = vunpack.i.h.bf16 %v5755_v15  ;;  %v4035_v17 = vunpack.i.l.bf16 %v5755_v15 }
 0x53a   : > { %v4084_v15 = vpop.permute.xlu2 %4083  ;;  %v2413_v18 = vsel %vm2106_vm0, %v2412_v32, %v4035_v17 }
 0x53b   : > { %v5766_v55 = vpop.permute.xlu0 %4028  ;;  %v4086_v51 = vunpack.i.h.bf16 %v4084_v15 }
 0x53c   : > { %v4031_v35 = vunpack.i.h.bf16 %v5766_v55  ;;  %v4030_v20 = vunpack.i.l.bf16 %v5766_v55 }
 0x53e   : > { %v2296_v5 = vsel %vm2112_vm1, %v2295_v33, %v4031_v35  ;;  %v2367_v60 = vsel %vm2112_vm1, %v2366_v6, %v4030_v20  ;;  %v4071_v33 = vunpack.i.h.bf16 %v5810_v48 }
 0x53f   : > { %v2297_v10 = vsel %vm2114_vm4, %v2296_v5, %v4041_v52  ;;  %v5784_v50 = vpop.permute.xlu1 %4048  ;;  %v4055_v52 = vunpack.i.l.bf16 %v5758_v25  ;;  %v2368_v5 = vsel %vm2114_vm4, %v2367_v60, %v4040_v30 }
 0x540   : > { %v2298_v0 = vsel %vm2116_vm5, %v2297_v10, %v4056_v16  ;;  %v4050_v35 = vunpack.i.l.bf16 %v5784_v50  ;;  %v2533_v16 = vsel %vm2104_vm15, %v2532_v21, %v4021_v54  ;;  %v4051_v25 = vunpack.i.h.bf16 %v5784_v50 }
 0x541   : > { %v3113_v34 = vrot.slane %v2298_v0, 5  ;;  %v2534_v49 = vsel %vm2106_vm0, %v2533_v16, %v4036_v3  ;;  %v2369_v50 = vsel %vm2116_vm5, %v2368_v5, %v4055_v52  ;;  %v4097_v52 = vld [vmem:[%s5915_s8] ss:$0 sm:$0xff] }
 0x542   : > { %v2491_v26 = vsel %vm2118_vm6, %v2490_v41, %v4050_v35  ;;  %v2370_v42 = vsel %vm2118_vm6, %v2369_v50, %v4051_v25 }
 0x543   : > { %v5789_v22 = vpop.permute.xlu0 %4043  ;;  %v5792_v23 = vsel %vm2552_vm11, %v2179_v38, %v3113_v34 }
 0x544   : > { %v4046_v10 = vunpack.i.h.bf16 %v5789_v22  ;;  %v4045_v39 = vunpack.i.l.bf16 %v5789_v22  ;;  %v4085_v22 = vunpack.i.l.bf16 %v4084_v15 }
 0x546   : > { %v2535_v12 = vsel %vm2108_vm2, %v2534_v49, %v4046_v10  ;;  %v2414_v36 = vsel %vm2108_vm2, %v2413_v18, %v4045_v39 }
 0x547   : > { %v5805_v58 = vpop.permute.xlu1 %4063 }
 0x548   : > { %v4065_v14 = vunpack.i.l.bf16 %v5805_v58  ;;  %v4066_v38 = vunpack.i.h.bf16 %v5805_v58 }
 0x54a   : > { %v2492_v24 = vsel %vm2120_vm7, %v2491_v26, %v4065_v14  ;;  %v2371_v31 = vsel %vm2120_vm7, %v2370_v42, %v4066_v38 }
 0x54b   : > { %v4059_v63 = vpop.permute.xlu0 %4058 }
 0x54c   : > { %v4061_v46 = vunpack.i.h.bf16 %v4059_v63  ;;  %v4060_v34 = vunpack.i.l.bf16 %v4059_v63 }
 0x54e   : > { %v2415_v2 = vsel %vm2110_vm3, %v2414_v36, %v4060_v34  ;;  %v2536_v56 = vsel %vm2110_vm3, %v2535_v12, %v4061_v46 }
 0x54f   : > { %v4079_v55 = vpop.permute.xlu1 %4078  ;;  %v2416_v29 = vsel %vm2112_vm1, %v2415_v2, %v4070_v44  ;;  %v2537_v40 = vsel %vm2112_vm1, %v2536_v56, %v4071_v33 }
 0x550   : > { %v4081_v48 = vunpack.i.h.bf16 %v4079_v55  ;;  %v4080_v9 = vunpack.i.l.bf16 %v4079_v55  ;;  %v4098_v55 = vld [vmem:[%s5912_s5] ss:$0 sm:$0xff] }
 0x552   : > { %v2417_v57 = vsel %vm2114_vm4, %v2416_v29, %v4080_v9  ;;  %v2538_v4 = vsel %vm2114_vm4, %v2537_v40, %v4081_v48 }
 0x553   : > { %v4074_v0 = vpop.permute.xlu0 %4073 }
 0x554   : > { %v4075_v61 = vunpack.i.l.bf16 %v4074_v0  ;;  %v4076_v37 = vunpack.i.h.bf16 %v4074_v0 }
 0x556   : > { %v2493_v58 = vsel %vm2122_vm8, %v2492_v24, %v4075_v61  ;;  %v2372_v62 = vsel %vm2122_vm8, %v2371_v31, %v4076_v37 }
 0x557   : > { %v4094_v7 = vpop.permute.xlu1 %4093  ;;  %v2494_v27 = vsel %vm2124_vm9, %v2493_v58, %v4085_v22  ;;  %v2373_v45 = vsel %vm2124_vm9, %v2372_v62, %v4086_v51 }
 0x558   : > { %v4096_v19 = vunpack.i.h.bf16 %v4094_v7  ;;  %v4095_v8 = vunpack.i.l.bf16 %v4094_v7 }
 0x55a   : > { %v2495_v63 = vsel %vm5932_vm12, %v2494_v27, %v4095_v8  ;;  %v2374_v41 = vsel %vm5933_vm14, %v2373_v45, %v4096_v19 }
 0x55b   : > { %v4089_v28 = vpop.permute.xlu0 %4088  ;;  %v2548_v59 = vrot.slane %v2495_v63, 4 }
 0x55c   : > { %v4091_v20 = vunpack.i.h.bf16 %v4089_v28  ;;  %v4090_v47 = vunpack.i.l.bf16 %v4089_v28 }
 0x55d   : > { %v2555_v1 = vsel %vm2552_vm11, %v2374_v41, %v2548_v59 }
 0x55e   : > { %v2418_v11 = vsel %vm2116_vm5, %v2417_v57, %v4090_v47  ;;  %v2539_v54 = vsel %vm2116_vm5, %v2538_v4, %v4091_v20  ;;  %v2557_v30 = vpack.c.bf16 %v2555_v1, %v5701_v43  ;;  %v4099_v43 = vld [vmem:[%s5913_s6] ss:$0 sm:$0xff] }
 0x55f   : > { %v2420_v53 = vrot.slane %v2418_v11, 1  ;;  %v3114_v6 = vrot.slane %v2539_v54, 5 }
 0x560   : > { %2681 = vmatmul.bf16.vlgmr.msra.gmra.mxu0 %v2557_v30 }
 0x561   : > { %v2556_v13 = vsel %vm2552_vm11, %v2420_v53, %v3114_v6 }
 0x562   : > { %v2558_v21 = vpack.c.bf16 %v2556_v13, %v5792_v23 }
 0x564   : > { %3167 = vmatmul.msk.bf16.vlgmr.msra.gmra.mxu1 %vm2118_vm6, %v2558_v21 }
 0x5aa   : > { %v2752_v32 = vpop.f32.mrf.mxu2 }
 0x5ab   : > { %v2753_v35 = vadd.f32 %v4097_v52, %v2752_v32 }
 0x5b2   : > { %v2754_v10 = vpop.f32.mrf.mxu2 }
 0x5b3   : > { %v2755_v0 = vadd.f32 %v4097_v52, %v2754_v10 }
 0x5dd   : > { %v2682_v60 = vpop.f32.mrf.mxu0 }
 0x5e1   : > { %v2696_v3 = vpop.f32.mrf.mxu1 }
 0x5e2   : > { %v2697_v17 = vadd.f32 %v2696_v3, %v2682_v60 }
 0x5e4   : > { %v2705_v23 = vmul.f32 %v4098_v55, %v2697_v17 }
 0x5e5   : > { %v2684_v33 = vpop.f32.mrf.mxu0 }
 0x5e6   : > { %v2711_v16 = vadd.f32 %v4099_v43, %v2705_v23 }
 0x5e8   : > { %v2757_v14 = vadd.f32 %v2753_v35, %v2711_v16 }
 0x5e9   : > { %v2698_v44 = vpop.f32.mrf.mxu1 }
 0x5ea   : > { %v2699_v5 = vadd.f32 %v2698_v44, %v2684_v33  ;;  %v2759_v25 = vmax.f32 %v2757_v14, 0.0 }
 0x5ec   : > { %v2706_v39 = vmul.f32 %v4098_v55, %v2699_v5  ;;  %2761 = vxpose.xlu2.b32.start [1/2] (short) (narrow) %v2759_v25, 8 }
 0x5ee   : > { %v2712_v15 = vadd.f32 %v4099_v43, %v2706_v39 }
 0x5f0   : > { %v2758_v38 = vadd.f32 %v2755_v0, %v2712_v15 }
 0x5f2   : > { %v2760_v46 = vmax.f32 %v2758_v38, 0.0 }
 0x5f4   : > { %2762 = vxpose.xlu2.b32.end [2/2] (short) (narrow) %v2760_v46, 8 }
 0x685   : > { %v2777_v34 = vpop.trf.xlu2 }
 0x686   : > { %2793 = vst.msk [vmem:[%s4281_s26] sm:$0xff] %vm2100_vm13, %v2777_v34 }
 0x687 PF: > { %s19_s13 = sadd.s32 1, %s4138_s13   ;;  %s5934_s30 = smov %s4130_s11 }
 0x688   : > { %p16_p9 = scmp.ge.s32.totalorder %s19_s13, 10   ;;  %s5935_s10 = smov %s4134_s12 }
 0x689   : > { %s5936_s11 = smov %s5939_s14  ;;  %s5937_s12 = smov %s5943_s15 }
 0x68a   :  { %18 = sbr.rel (!%p16_p9) target bundleno = 3 (0x3), region = 159 }

</bundles_post_ra>
